<compile_context>
chip_gen: v6e
topology: v6e:2x2x1
jax: 0.10.0
libtpu: 0.0.40
codegen_flags: <defaults>
</compile_context>

<pallas_src>
import jax
import jax.numpy as jnp
from jax import lax
from jax.experimental import pallas as pl
from jax.experimental.pallas import tpu as pltpu

LANES = 128            # vreg lane width
SLOT = 32              # lanes reserved per lane-packed sample (= max channel count here)
PACK = LANES // SLOT   # 4 samples lane-packed per grid step
C_IN = 4
H_IN = W_IN = 16


# ----------------------------------------------------------------------------
# Pack-time helper: 0/1 selection matrix for one conv tap (dh, dw) at `stride`.
# Row m = (oy, ox) has a single 1 at padded-input position (oy*stride+dh, ox*stride+dw)
# when in bounds, else the row is all zeros (implements zero padding).
# Built ONCE at pack time (hoisted out of the kernel per the perf review).
# ----------------------------------------------------------------------------
def _sel_matrix(hout, wout, hin, win, stride, dh, dw):
    m = hout * wout
    k = hin * win
    oi = lax.broadcasted_iota(jnp.int32, (m, k), 0)
    ii = lax.broadcasted_iota(jnp.int32, (m, k), 1)
    oy = oi // wout
    ox = oi % wout
    iy = oy * stride + dh
    ix = ox * stride + dw
    ok = (iy >= 0) & (iy < hin) & (ix >= 0) & (ix < win) & (ii == iy * win + ix)
    return jnp.where(ok, 1.0, 0.0).astype(jnp.float32)


# ----------------------------------------------------------------------------
# Fused backbone kernel: one grid step == 4 lane-packed samples.
# Activations are [H*W, 128] f32 matrices; sample s lives in lanes [s*32, s*32+C).
# ----------------------------------------------------------------------------
def _backbone_kernel(x_ref, selstem_ref, wstem_ref, wpw_ref, wdw_ref, b_ref,
                     selsub_ref, o_ref):
    f32, bf16 = jnp.float32, jnp.bfloat16

    def bias(i):                                   # [1, 128] f32, loaded per use
        return b_ref[i:i + 1, :]

    def pw(x, widx, bidx, relu6, residual=None):
        # 1x1 conv (block-diag over the 4 sample slots), bf16 MXU + f32 epilogue.
        y = jnp.dot(x.astype(bf16), wpw_ref[widx], preferred_element_type=f32)
        y = y + bias(bidx)
        if residual is not None:
            y = y + residual                       # skip tensor never leaves VMEM/vregs
        if relu6:
            y = jnp.clip(y, 0.0, 6.0)
        return y

    def dw3x3_s1(x, lidx, bidx, hw):
        # Stride-1 depthwise 3x3 on [hw*hw, 128] via sublane rolls + boundary masks.
        # Pure XLU/VPU work (no MXU, no selection matrices); hw is a power of two so
        # y/x indices come from shifts/ands, not int div/mod.
        m = hw * hw
        sh = hw.bit_length() - 1
        w9 = wdw_ref[lidx]                         # [9, 128] f32 (tiny)
        row = lax.broadcasted_iota(jnp.int32, (m, 1), 0)
        ry = row >> sh
        rx = row & (hw - 1)
        acc = jnp.zeros((m, LANES), f32)
        for kh in (-1, 0, 1):
            ok_y = (ry + kh >= 0) & (ry + kh < hw)
            for kw in (-1, 0, 1):
                t = (kh + 1) * 3 + (kw + 1)
                delta = kh * hw + kw               # sublane offset of tap (kh, kw)
                src = pltpu.roll(x, shift=(-delta) % m, axis=0) if delta else x
                ok = ok_y & (rx + kw >= 0) & (rx + kw < hw)
                acc = acc + jnp.where(ok, src, 0.0) * w9[t:t + 1, :]
        return jnp.clip(acc + bias(bidx), 0.0, 6.0)

    # --- stem: 3x3 stride-2 ConvBNReLU6, 16x16 -> 8x8 -------------------------------
    # gather-first ordering: (sel @ x) @ W_t; with 4 lane-packed samples every dot is
    # K/N = 128 or 256 wide, so no tiny-K latency-dominated MXU pushes remain.
    xin = x_ref[0]                                 # [256, 128] bf16
    acc = jnp.zeros((64, LANES), f32)
    for t in range(9):
        g = jnp.dot(selstem_ref[t], xin, preferred_element_type=f32)             # [64,128]
        acc = acc + jnp.dot(g.astype(bf16), wstem_ref[t], preferred_element_type=f32)
    x = jnp.clip(acc + bias(0), 0.0, 6.0)          # [64, 128]  (8x8 spatial)

    # --- block1: t=1 (dw3x3 s1 + linear 1x1), residual ------------------------------
    h = dw3x3_s1(x, 0, 1, 8)
    x = pw(h, 0, 2, relu6=False, residual=x)

    # --- block2: t=2, stride-2 dw, no residual ---------------------------------------
    h = pw(x, 1, 3, relu6=True)                    # expand 8 -> 16
    h = dw3x3_s1(h, 1, 4, 8)                       # stride-1 dw at 8x8 (BN+ReLU6 inside)
    h = jnp.dot(selsub_ref[...], h.astype(bf16), preferred_element_type=f32)  # 8x8 -> 4x4
    x = pw(h, 2, 5, relu6=False)                   # linear project, [16, 128]

    # --- block3: t=2, stride 1, residual ---------------------------------------------
    h = pw(x, 3, 6, relu6=True)
    h = dw3x3_s1(h, 2, 7, 4)
    x = pw(h, 4, 8, relu6=False, residual=x)

    # --- head: 1x1 ConvBNReLU6 ---------------------------------------------------------
    o_ref[0] = pw(x, 5, 9, relu6=True)             # lane-dense [16, 128] store


# ----------------------------------------------------------------------------
# Wrapper: one pallas_call for the whole backbone. NCHW in, NCHW out.
# ----------------------------------------------------------------------------
def resnet_backbone_forward(x_nchw, packed):
    """ResNetBackbone.forward == mobilenet.features(x)."""
    wstem, wpw, wdw, biases, sel_stem, sel_sub = packed
    n, c, h, w = x_nchw.shape
    assert (c, h, w) == (C_IN, H_IN, W_IN), (c, h, w)

    # Boundary layout glue (tiny, once per call): NCHW -> lane-packed groups of PACK
    # samples, [G, H*W, 128]; sample s of a group sits in lanes [s*SLOT, s*SLOT+C).
    n_pad = -(-n // PACK) * PACK
    g = n_pad // PACK
    x = jnp.transpose(x_nchw, (0, 2, 3, 1)).astype(jnp.float32).reshape(n, h * w, c)
    x = jnp.pad(x, ((0, n_pad - n), (0, 0), (0, SLOT - c)))
    x = x.reshape(g, PACK, h * w, SLOT).transpose(0, 2, 1, 3).reshape(g, h * w, LANES)
    x = x.astype(jnp.bfloat16)                     # MXU operand; also halves the input DMA

    out = pl.pallas_call(
        _backbone_kernel,
        out_shape=jax.ShapeDtypeStruct((g, 16, LANES), jnp.float32),
        grid=(g,),
        in_specs=[
            pl.BlockSpec((1, h * w, LANES), lambda i: (i, 0, 0)),
            # constant-index blocks are fetched once and stay VMEM-resident:
            pl.BlockSpec((9, 64, h * w), lambda i: (0, 0, 0)),
            pl.BlockSpec((9, LANES, LANES), lambda i: (0, 0, 0)),
            pl.BlockSpec((6, LANES, LANES), lambda i: (0, 0, 0)),
            pl.BlockSpec((3, 9, LANES), lambda i: (0, 0, 0)),
            pl.BlockSpec((10, LANES), lambda i: (0, 0)),
            pl.BlockSpec((16, 64), lambda i: (0, 0)),
        ],
        out_specs=pl.BlockSpec((1, 16, LANES), lambda i: (i, 0, 0)),
        compiler_params=pltpu.CompilerParams(
            dimension_semantics=("parallel",),     # batch-group axis -> both TCs on v7x
        ),
    )(x, sel_stem, wstem, wpw, wdw, biases, sel_sub)

    # [G, 16, PACK*SLOT] -> NCHW [N, 32, 4, 4]
    y = out.reshape(g, 16, PACK, SLOT).transpose(0, 2, 1, 3).reshape(n_pad, 16, SLOT)
    y = y[:n].reshape(n, 4, 4, SLOT)
    return jnp.transpose(y, (0, 3, 1, 2))


# ----------------------------------------------------------------------------
# Parameters: deterministic synthetic MobileNetV2 features
#   stem ConvBNReLU6 3x3 s2 (4->8)
#   IRB1: t=1, 8->8,  s=1 (residual)
#   IRB2: t=2, 8->16, s=2
#   IRB3: t=2, 16->16, s=1 (residual)
#   head ConvBNReLU6 1x1 (16->32)
# ----------------------------------------------------------------------------
def init_params(key):
    def conv_w(shape, tag):
        return (0.1 * jax.random.normal(jax.random.fold_in(key, tag), shape)
                ).astype(jnp.float32)

    def bn(c, tag):
        k = jax.random.fold_in(key, tag)
        k1, k2, k3, k4 = jax.random.split(k, 4)
        gamma = 1.0 + 0.1 * jax.random.normal(k1, (c,))
        beta = 0.1 * jax.random.normal(k2, (c,))
        mean = 0.1 * jax.random.normal(k3, (c,))
        var = 0.5 + jax.random.uniform(k4, (c,))
        scale = gamma / jnp.sqrt(var + 1e-5)      # folded eval-mode BatchNorm
        bias = beta - mean * scale
        return scale.astype(jnp.float32), bias.astype(jnp.float32)

    p = {}
    p["stem_w"] = conv_w((8, 4, 3, 3), 1);   p["stem_s"], p["stem_b"] = bn(8, 2)
    p["b1_dw_w"] = conv_w((8, 1, 3, 3), 3);  p["b1_dw_s"], p["b1_dw_b"] = bn(8, 4)
    p["b1_pw_w"] = conv_w((8, 8, 1, 1), 5);  p["b1_pw_s"], p["b1_pw_b"] = bn(8, 6)
    p["b2_ex_w"] = conv_w((16, 8, 1, 1), 7);  p["b2_ex_s"], p["b2_ex_b"] = bn(16, 8)
    p["b2_dw_w"] = conv_w((16, 1, 3, 3), 9);  p["b2_dw_s"], p["b2_dw_b"] = bn(16, 10)
    p["b2_pw_w"] = conv_w((16, 16, 1, 1), 11); p["b2_pw_s"], p["b2_pw_b"] = bn(16, 12)
    p["b3_ex_w"] = conv_w((32, 16, 1, 1), 13); p["b3_ex_s"], p["b3_ex_b"] = bn(32, 14)
    p["b3_dw_w"] = conv_w((32, 1, 3, 3), 15);  p["b3_dw_s"], p["b3_dw_b"] = bn(32, 16)
    p["b3_pw_w"] = conv_w((16, 32, 1, 1), 17); p["b3_pw_s"], p["b3_pw_b"] = bn(32 // 2, 18)
    p["head_w"] = conv_w((32, 16, 1, 1), 19); p["head_s"], p["head_b"] = bn(32, 20)
    return p


def pack_params(p):
    """Fold eval-mode BN into the convs, block-diagonalize 1x1 weights for 4-way lane
    packing, cast MXU-bound weights to bf16, and build all selection matrices once."""
    eyeP = jnp.eye(PACK, dtype=jnp.float32)

    def blkdiag(w):                       # [Cin, Cout] -> [128, 128], one block per slot
        w = jnp.pad(w, ((0, SLOT - w.shape[0]), (0, SLOT - w.shape[1])))
        return jnp.kron(eyeP, w)

    def pw(wname, sname):                 # 1x1 conv, BN-folded -> bf16 block-diag
        w = p[wname][:, :, 0, 0].astype(jnp.float32)          # [Cout, Cin]
        return blkdiag(w.T * p[sname][None, :]).astype(jnp.bfloat16)

    def dw(wname, sname):                 # depthwise 3x3, BN-folded -> f32 [9, 128] (VPU)
        w = p[wname][:, 0].astype(jnp.float32)                # [C, 3, 3]
        wk = jnp.transpose(w, (1, 2, 0)).reshape(9, -1) * p[sname][None, :]
        wk = jnp.pad(wk, ((0, 0), (0, SLOT - wk.shape[1])))
        return jnp.tile(wk, (1, PACK))

    def bias(name):                       # folded BN bias -> f32 [128], tiled per slot
        b = jnp.pad(p[name].astype(jnp.float32), (0, SLOT - p[name].shape[0]))
        return jnp.tile(b, (PACK,))

    ws = jnp.transpose(p["stem_w"].astype(jnp.float32), (2, 3, 1, 0))   # [3,3,Cin,Cout]
    ws = (ws * p["stem_s"]).reshape(9, C_IN, -1)
    wstem = jnp.stack([blkdiag(ws[t]) for t in range(9)]).astype(jnp.bfloat16)

    wpw = jnp.stack([pw("b1_pw_w", "b1_pw_s"), pw("b2_ex_w", "b2_ex_s"),
                     pw("b2_pw_w", "b2_pw_s"), pw("b3_ex_w", "b3_ex_s"),
                     pw("b3_pw_w", "b3_pw_s"), pw("head_w", "head_s")])
    wdw = jnp.stack([dw("b1_dw_w", "b1_dw_s"), dw("b2_dw_w", "b2_dw_s"),
                     dw("b3_dw_w", "b3_dw_s")])
    biases = jnp.stack([bias(k) for k in
                        ("stem_b", "b1_dw_b", "b1_pw_b", "b2_ex_b", "b2_dw_b",
                         "b2_pw_b", "b3_ex_b", "b3_dw_b", "b3_pw_b", "head_b")])

    # 0/1 selection matrices, hoisted out of the kernel (exact in bf16):
    #   sel_stem[t]: stride-2 gather 16x16 -> 8x8 for tap t = kh*3 + kw
    #   sel_sub    : stride-2 row subsample 8x8 -> 4x4 (block-2 depthwise)
    sel_stem = jnp.stack([_sel_matrix(8, 8, 16, 16, 2, kh - 1, kw - 1)
                          for kh in range(3) for kw in range(3)]).astype(jnp.bfloat16)
    sel_sub = _sel_matrix(4, 4, 8, 8, 2, 0, 0).astype(jnp.bfloat16)
    return wstem, wpw, wdw, biases, sel_stem, sel_sub


# ----------------------------------------------------------------------------
# Pure-JAX reference (lax convs, f32 HIGHEST) for numerical sanity.
# ----------------------------------------------------------------------------
def _reference_forward(x_nchw, p):
    x = jnp.transpose(x_nchw, (0, 2, 3, 1)).astype(jnp.float32)

    def conv(x, w, stride, groups=1):
        wk = jnp.transpose(w, (2, 3, 1, 0)).astype(jnp.float32)   # -> HWIO
        pad = ((1, 1), (1, 1)) if w.shape[2] == 3 else ((0, 0), (0, 0))
        return lax.conv_general_dilated(
            x, wk, (stride, stride), pad,
            dimension_numbers=("NHWC", "HWIO", "NHWC"),
            feature_group_count=groups,
            precision=lax.Precision.HIGHEST)

    def bn(y, s, b):
        return y * s + b

    x = jnp.clip(bn(conv(x, p["stem_w"], 2), p["stem_s"], p["stem_b"]), 0, 6)
    h = jnp.clip(bn(conv(x, p["b1_dw_w"], 1, 8), p["b1_dw_s"], p["b1_dw_b"]), 0, 6)
    x = bn(conv(h, p["b1_pw_w"], 1), p["b1_pw_s"], p["b1_pw_b"]) + x
    h = jnp.clip(bn(conv(x, p["b2_ex_w"], 1), p["b2_ex_s"], p["b2_ex_b"]), 0, 6)
    h = jnp.clip(bn(conv(h, p["b2_dw_w"], 2, 16), p["b2_dw_s"], p["b2_dw_b"]), 0, 6)
    x = bn(conv(h, p["b2_pw_w"], 1), p["b2_pw_s"], p["b2_pw_b"])
    h = jnp.clip(bn(conv(x, p["b3_ex_w"], 1), p["b3_ex_s"], p["b3_ex_b"]), 0, 6)
    h = jnp.clip(bn(conv(h, p["b3_dw_w"], 1, 32), p["b3_dw_s"], p["b3_dw_b"]), 0, 6)
    x = bn(conv(h, p["b3_pw_w"], 1), p["b3_pw_s"], p["b3_pw_b"]) + x
    x = jnp.clip(bn(conv(x, p["head_w"], 1), p["head_s"], p["head_b"]), 0, 6)
    return jnp.transpose(x, (0, 3, 1, 2))


if __name__ == "__main__":
    key = jax.random.PRNGKey(0)
    params = init_params(key)
    n = 8                                          # -> 2 grid steps of 4 lane-packed samples
    x = jax.random.normal(jax.random.fold_in(key, 1000),
                          (n, C_IN, H_IN, W_IN), jnp.float32)

    packed = pack_params(params)                   # BN fold + block-diag + bf16, done once
    fwd = jax.jit(resnet_backbone_forward)
    y = jax.block_until_ready(fwd(x, packed))

    assert y.shape == (n, 32, 4, 4), y.shape
    assert y.dtype == jnp.float32
    assert bool(jnp.all(jnp.isfinite(y)))

    # Tolerance sized for bf16 MXU operands (f32 accumulation, f32 epilogue): expected
    # max-abs error is a few 1e-3; anything structural (wrong tap/bias/residual) is >>0.1.
    y_ref = _reference_forward(x, params)
    err = float(jnp.max(jnp.abs(y - y_ref)))
    mean_err = float(jnp.mean(jnp.abs(y - y_ref)))
    assert err < 1.5e-2, err
    assert mean_err < 2e-3, mean_err
    print("KERNEL_OK")
</pallas_src>

<mosaic_0001>
module attributes {stable_mosaic.version = 11 : i64} {
  func.func @_backbone_kernel(%arg0: i32, %arg1: memref<1x256x128xbf16, #tpu.memory_space<vmem>>, %arg2: memref<9x64x256xbf16, #tpu.memory_space<vmem>>, %arg3: memref<9x128x128xbf16, #tpu.memory_space<vmem>>, %arg4: memref<6x128x128xbf16, #tpu.memory_space<vmem>>, %arg5: memref<3x9x128xf32, #tpu.memory_space<vmem>>, %arg6: memref<10x128xf32, #tpu.memory_space<vmem>>, %arg7: memref<16x64xbf16, #tpu.memory_space<vmem>>, %arg8: memref<1x16x128xf32, #tpu.memory_space<vmem>>) attributes {dimension_semantics = [#tpu.dimension_semantics<parallel>], iteration_bounds = array<i64: 2>, scalar_prefetch = 0 : i64, scratch_operands = 0 : i64, tpu.core_type = #tpu.core_type<tc>, window_params = [{transform_indices = @transform_0, window_bounds = array<i64: 1, 256, 128>}, {pipeline_mode = #tpu.pipeline_mode<synchronous>, transform_indices = @transform_1, window_bounds = array<i64: 9, 64, 256>}, {pipeline_mode = #tpu.pipeline_mode<synchronous>, transform_indices = @transform_2, window_bounds = array<i64: 9, 128, 128>}, {pipeline_mode = #tpu.pipeline_mode<synchronous>, transform_indices = @transform_3, window_bounds = array<i64: 6, 128, 128>}, {pipeline_mode = #tpu.pipeline_mode<synchronous>, transform_indices = @transform_4, window_bounds = array<i64: 3, 9, 128>}, {pipeline_mode = #tpu.pipeline_mode<synchronous>, transform_indices = @transform_5, window_bounds = array<i64: 10, 128>}, {pipeline_mode = #tpu.pipeline_mode<synchronous>, transform_indices = @transform_6, window_bounds = array<i64: 16, 64>}, {transform_indices = @transform_7, window_bounds = array<i64: 1, 16, 128>}]} {
    %c0 = arith.constant 0 : index
    %c0_0 = arith.constant 0 : index
    %c0_1 = arith.constant 0 : index
    %0 = vector.load %arg1[%c0, %c0_0, %c0_1] : memref<1x256x128xbf16, #tpu.memory_space<vmem>>, vector<1x256x128xbf16>
    %1 = vector.shape_cast %0 : vector<1x256x128xbf16> to vector<256x128xbf16>
    %cst = arith.constant 0.000000e+00 : f32
    %2 = vector.broadcast %cst : f32 to vector<64x128xf32>
    %c0_2 = arith.constant 0 : index
    %c0_3 = arith.constant 0 : index
    %c0_4 = arith.constant 0 : index
    %3 = vector.load %arg2[%c0_2, %c0_3, %c0_4] : memref<9x64x256xbf16, #tpu.memory_space<vmem>>, vector<1x64x256xbf16>
    %4 = vector.shape_cast %3 : vector<1x64x256xbf16> to vector<64x256xbf16>
    %cst_5 = arith.constant dense<0.000000e+00> : vector<64x128xf32>
    %5 = tpu.matmul %4, %1, %cst_5 {dimension_numbers = #tpu.dot_dimension_numbers<[1], [0], [0], [1], [0, 0, 1, 1], [], []>} : vector<64x256xbf16>, vector<256x128xbf16>, vector<64x128xf32> -> vector<64x128xf32>
    %6 = arith.truncf %5 : vector<64x128xf32> to vector<64x128xbf16>
    %c0_6 = arith.constant 0 : index
    %c0_7 = arith.constant 0 : index
    %c0_8 = arith.constant 0 : index
    %7 = vector.load %arg3[%c0_6, %c0_7, %c0_8] : memref<9x128x128xbf16, #tpu.memory_space<vmem>>, vector<1x128x128xbf16>
    %8 = vector.shape_cast %7 : vector<1x128x128xbf16> to vector<128x128xbf16>
    %cst_9 = arith.constant dense<0.000000e+00> : vector<64x128xf32>
    %9 = tpu.matmul %6, %8, %cst_9 {dimension_numbers = #tpu.dot_dimension_numbers<[1], [0], [0], [1], [0, 0, 1, 1], [], []>} : vector<64x128xbf16>, vector<128x128xbf16>, vector<64x128xf32> -> vector<64x128xf32>
    %10 = arith.addf %2, %9 : vector<64x128xf32>
    %c1 = arith.constant 1 : index
    %c0_10 = arith.constant 0 : index
    %c0_11 = arith.constant 0 : index
    %11 = vector.load %arg2[%c1, %c0_10, %c0_11] : memref<9x64x256xbf16, #tpu.memory_space<vmem>>, vector<1x64x256xbf16>
    %12 = vector.shape_cast %11 : vector<1x64x256xbf16> to vector<64x256xbf16>
    %cst_12 = arith.constant dense<0.000000e+00> : vector<64x128xf32>
    %13 = tpu.matmul %12, %1, %cst_12 {dimension_numbers = #tpu.dot_dimension_numbers<[1], [0], [0], [1], [0, 0, 1, 1], [], []>} : vector<64x256xbf16>, vector<256x128xbf16>, vector<64x128xf32> -> vector<64x128xf32>
    %14 = arith.truncf %13 : vector<64x128xf32> to vector<64x128xbf16>
    %c1_13 = arith.constant 1 : index
    %c0_14 = arith.constant 0 : index
    %c0_15 = arith.constant 0 : index
    %15 = vector.load %arg3[%c1_13, %c0_14, %c0_15] : memref<9x128x128xbf16, #tpu.memory_space<vmem>>, vector<1x128x128xbf16>
    %16 = vector.shape_cast %15 : vector<1x128x128xbf16> to vector<128x128xbf16>
    %cst_16 = arith.constant dense<0.000000e+00> : vector<64x128xf32>
    %17 = tpu.matmul %14, %16, %cst_16 {dimension_numbers = #tpu.dot_dimension_numbers<[1], [0], [0], [1], [0, 0, 1, 1], [], []>} : vector<64x128xbf16>, vector<128x128xbf16>, vector<64x128xf32> -> vector<64x128xf32>
    %18 = arith.addf %10, %17 : vector<64x128xf32>
    %c2 = arith.constant 2 : index
    %c0_17 = arith.constant 0 : index
    %c0_18 = arith.constant 0 : index
    %19 = vector.load %arg2[%c2, %c0_17, %c0_18] : memref<9x64x256xbf16, #tpu.memory_space<vmem>>, vector<1x64x256xbf16>
    %20 = vector.shape_cast %19 : vector<1x64x256xbf16> to vector<64x256xbf16>
    %cst_19 = arith.constant dense<0.000000e+00> : vector<64x128xf32>
    %21 = tpu.matmul %20, %1, %cst_19 {dimension_numbers = #tpu.dot_dimension_numbers<[1], [0], [0], [1], [0, 0, 1, 1], [], []>} : vector<64x256xbf16>, vector<256x128xbf16>, vector<64x128xf32> -> vector<64x128xf32>
    %22 = arith.truncf %21 : vector<64x128xf32> to vector<64x128xbf16>
    %c2_20 = arith.constant 2 : index
    %c0_21 = arith.constant 0 : index
    %c0_22 = arith.constant 0 : index
    %23 = vector.load %arg3[%c2_20, %c0_21, %c0_22] : memref<9x128x128xbf16, #tpu.memory_space<vmem>>, vector<1x128x128xbf16>
    %24 = vector.shape_cast %23 : vector<1x128x128xbf16> to vector<128x128xbf16>
    %cst_23 = arith.constant dense<0.000000e+00> : vector<64x128xf32>
    %25 = tpu.matmul %22, %24, %cst_23 {dimension_numbers = #tpu.dot_dimension_numbers<[1], [0], [0], [1], [0, 0, 1, 1], [], []>} : vector<64x128xbf16>, vector<128x128xbf16>, vector<64x128xf32> -> vector<64x128xf32>
    %26 = arith.addf %18, %25 : vector<64x128xf32>
    %c3 = arith.constant 3 : index
    %c0_24 = arith.constant 0 : index
    %c0_25 = arith.constant 0 : index
    %27 = vector.load %arg2[%c3, %c0_24, %c0_25] : memref<9x64x256xbf16, #tpu.memory_space<vmem>>, vector<1x64x256xbf16>
    %28 = vector.shape_cast %27 : vector<1x64x256xbf16> to vector<64x256xbf16>
    %cst_26 = arith.constant dense<0.000000e+00> : vector<64x128xf32>
    %29 = tpu.matmul %28, %1, %cst_26 {dimension_numbers = #tpu.dot_dimension_numbers<[1], [0], [0], [1], [0, 0, 1, 1], [], []>} : vector<64x256xbf16>, vector<256x128xbf16>, vector<64x128xf32> -> vector<64x128xf32>
    %30 = arith.truncf %29 : vector<64x128xf32> to vector<64x128xbf16>
    %c3_27 = arith.constant 3 : index
    %c0_28 = arith.constant 0 : index
    %c0_29 = arith.constant 0 : index
    %31 = vector.load %arg3[%c3_27, %c0_28, %c0_29] : memref<9x128x128xbf16, #tpu.memory_space<vmem>>, vector<1x128x128xbf16>
    %32 = vector.shape_cast %31 : vector<1x128x128xbf16> to vector<128x128xbf16>
    %cst_30 = arith.constant dense<0.000000e+00> : vector<64x128xf32>
    %33 = tpu.matmul %30, %32, %cst_30 {dimension_numbers = #tpu.dot_dimension_numbers<[1], [0], [0], [1], [0, 0, 1, 1], [], []>} : vector<64x128xbf16>, vector<128x128xbf16>, vector<64x128xf32> -> vector<64x128xf32>
    %34 = arith.addf %26, %33 : vector<64x128xf32>
    %c4 = arith.constant 4 : index
    %c0_31 = arith.constant 0 : index
    %c0_32 = arith.constant 0 : index
    %35 = vector.load %arg2[%c4, %c0_31, %c0_32] : memref<9x64x256xbf16, #tpu.memory_space<vmem>>, vector<1x64x256xbf16>
    %36 = vector.shape_cast %35 : vector<1x64x256xbf16> to vector<64x256xbf16>
    %cst_33 = arith.constant dense<0.000000e+00> : vector<64x128xf32>
    %37 = tpu.matmul %36, %1, %cst_33 {dimension_numbers = #tpu.dot_dimension_numbers<[1], [0], [0], [1], [0, 0, 1, 1], [], []>} : vector<64x256xbf16>, vector<256x128xbf16>, vector<64x128xf32> -> vector<64x128xf32>
    %38 = arith.truncf %37 : vector<64x128xf32> to vector<64x128xbf16>
    %c4_34 = arith.constant 4 : index
    %c0_35 = arith.constant 0 : index
    %c0_36 = arith.constant 0 : index
    %39 = vector.load %arg3[%c4_34, %c0_35, %c0_36] : memref<9x128x128xbf16, #tpu.memory_space<vmem>>, vector<1x128x128xbf16>
    %40 = vector.shape_cast %39 : vector<1x128x128xbf16> to vector<128x128xbf16>
    %cst_37 = arith.constant dense<0.000000e+00> : vector<64x128xf32>
    %41 = tpu.matmul %38, %40, %cst_37 {dimension_numbers = #tpu.dot_dimension_numbers<[1], [0], [0], [1], [0, 0, 1, 1], [], []>} : vector<64x128xbf16>, vector<128x128xbf16>, vector<64x128xf32> -> vector<64x128xf32>
    %42 = arith.addf %34, %41 : vector<64x128xf32>
    %c5 = arith.constant 5 : index
    %c0_38 = arith.constant 0 : index
    %c0_39 = arith.constant 0 : index
    %43 = vector.load %arg2[%c5, %c0_38, %c0_39] : memref<9x64x256xbf16, #tpu.memory_space<vmem>>, vector<1x64x256xbf16>
    %44 = vector.shape_cast %43 : vector<1x64x256xbf16> to vector<64x256xbf16>
    %cst_40 = arith.constant dense<0.000000e+00> : vector<64x128xf32>
    %45 = tpu.matmul %44, %1, %cst_40 {dimension_numbers = #tpu.dot_dimension_numbers<[1], [0], [0], [1], [0, 0, 1, 1], [], []>} : vector<64x256xbf16>, vector<256x128xbf16>, vector<64x128xf32> -> vector<64x128xf32>
    %46 = arith.truncf %45 : vector<64x128xf32> to vector<64x128xbf16>
    %c5_41 = arith.constant 5 : index
    %c0_42 = arith.constant 0 : index
    %c0_43 = arith.constant 0 : index
    %47 = vector.load %arg3[%c5_41, %c0_42, %c0_43] : memref<9x128x128xbf16, #tpu.memory_space<vmem>>, vector<1x128x128xbf16>
    %48 = vector.shape_cast %47 : vector<1x128x128xbf16> to vector<128x128xbf16>
    %cst_44 = arith.constant dense<0.000000e+00> : vector<64x128xf32>
    %49 = tpu.matmul %46, %48, %cst_44 {dimension_numbers = #tpu.dot_dimension_numbers<[1], [0], [0], [1], [0, 0, 1, 1], [], []>} : vector<64x128xbf16>, vector<128x128xbf16>, vector<64x128xf32> -> vector<64x128xf32>
    %50 = arith.addf %42, %49 : vector<64x128xf32>
    %c6 = arith.constant 6 : index
    %c0_45 = arith.constant 0 : index
    %c0_46 = arith.constant 0 : index
    %51 = vector.load %arg2[%c6, %c0_45, %c0_46] : memref<9x64x256xbf16, #tpu.memory_space<vmem>>, vector<1x64x256xbf16>
    %52 = vector.shape_cast %51 : vector<1x64x256xbf16> to vector<64x256xbf16>
    %cst_47 = arith.constant dense<0.000000e+00> : vector<64x128xf32>
    %53 = tpu.matmul %52, %1, %cst_47 {dimension_numbers = #tpu.dot_dimension_numbers<[1], [0], [0], [1], [0, 0, 1, 1], [], []>} : vector<64x256xbf16>, vector<256x128xbf16>, vector<64x128xf32> -> vector<64x128xf32>
    %54 = arith.truncf %53 : vector<64x128xf32> to vector<64x128xbf16>
    %c6_48 = arith.constant 6 : index
    %c0_49 = arith.constant 0 : index
    %c0_50 = arith.constant 0 : index
    %55 = vector.load %arg3[%c6_48, %c0_49, %c0_50] : memref<9x128x128xbf16, #tpu.memory_space<vmem>>, vector<1x128x128xbf16>
    %56 = vector.shape_cast %55 : vector<1x128x128xbf16> to vector<128x128xbf16>
    %cst_51 = arith.constant dense<0.000000e+00> : vector<64x128xf32>
    %57 = tpu.matmul %54, %56, %cst_51 {dimension_numbers = #tpu.dot_dimension_numbers<[1], [0], [0], [1], [0, 0, 1, 1], [], []>} : vector<64x128xbf16>, vector<128x128xbf16>, vector<64x128xf32> -> vector<64x128xf32>
    %58 = arith.addf %50, %57 : vector<64x128xf32>
    %c7 = arith.constant 7 : index
    %c0_52 = arith.constant 0 : index
    %c0_53 = arith.constant 0 : index
    %59 = vector.load %arg2[%c7, %c0_52, %c0_53] : memref<9x64x256xbf16, #tpu.memory_space<vmem>>, vector<1x64x256xbf16>
    %60 = vector.shape_cast %59 : vector<1x64x256xbf16> to vector<64x256xbf16>
    %cst_54 = arith.constant dense<0.000000e+00> : vector<64x128xf32>
    %61 = tpu.matmul %60, %1, %cst_54 {dimension_numbers = #tpu.dot_dimension_numbers<[1], [0], [0], [1], [0, 0, 1, 1], [], []>} : vector<64x256xbf16>, vector<256x128xbf16>, vector<64x128xf32> -> vector<64x128xf32>
    %62 = arith.truncf %61 : vector<64x128xf32> to vector<64x128xbf16>
    %c7_55 = arith.constant 7 : index
    %c0_56 = arith.constant 0 : index
    %c0_57 = arith.constant 0 : index
    %63 = vector.load %arg3[%c7_55, %c0_56, %c0_57] : memref<9x128x128xbf16, #tpu.memory_space<vmem>>, vector<1x128x128xbf16>
    %64 = vector.shape_cast %63 : vector<1x128x128xbf16> to vector<128x128xbf16>
    %cst_58 = arith.constant dense<0.000000e+00> : vector<64x128xf32>
    %65 = tpu.matmul %62, %64, %cst_58 {dimension_numbers = #tpu.dot_dimension_numbers<[1], [0], [0], [1], [0, 0, 1, 1], [], []>} : vector<64x128xbf16>, vector<128x128xbf16>, vector<64x128xf32> -> vector<64x128xf32>
    %66 = arith.addf %58, %65 : vector<64x128xf32>
    %c8 = arith.constant 8 : index
    %c0_59 = arith.constant 0 : index
    %c0_60 = arith.constant 0 : index
    %67 = vector.load %arg2[%c8, %c0_59, %c0_60] : memref<9x64x256xbf16, #tpu.memory_space<vmem>>, vector<1x64x256xbf16>
    %68 = vector.shape_cast %67 : vector<1x64x256xbf16> to vector<64x256xbf16>
    %cst_61 = arith.constant dense<0.000000e+00> : vector<64x128xf32>
    %69 = tpu.matmul %68, %1, %cst_61 {dimension_numbers = #tpu.dot_dimension_numbers<[1], [0], [0], [1], [0, 0, 1, 1], [], []>} : vector<64x256xbf16>, vector<256x128xbf16>, vector<64x128xf32> -> vector<64x128xf32>
    %70 = arith.truncf %69 : vector<64x128xf32> to vector<64x128xbf16>
    %c8_62 = arith.constant 8 : index
    %c0_63 = arith.constant 0 : index
    %c0_64 = arith.constant 0 : index
    %71 = vector.load %arg3[%c8_62, %c0_63, %c0_64] : memref<9x128x128xbf16, #tpu.memory_space<vmem>>, vector<1x128x128xbf16>
    %72 = vector.shape_cast %71 : vector<1x128x128xbf16> to vector<128x128xbf16>
    %cst_65 = arith.constant dense<0.000000e+00> : vector<64x128xf32>
    %73 = tpu.matmul %70, %72, %cst_65 {dimension_numbers = #tpu.dot_dimension_numbers<[1], [0], [0], [1], [0, 0, 1, 1], [], []>} : vector<64x128xbf16>, vector<128x128xbf16>, vector<64x128xf32> -> vector<64x128xf32>
    %74 = arith.addf %66, %73 : vector<64x128xf32>
    %c0_66 = arith.constant 0 : index
    %c0_67 = arith.constant 0 : index
    %75 = vector.load %arg6[%c0_66, %c0_67] : memref<10x128xf32, #tpu.memory_space<vmem>>, vector<1x128xf32>
    %76 = vector.broadcast %75 : vector<1x128xf32> to vector<64x128xf32>
    %77 = arith.addf %74, %76 : vector<64x128xf32>
    %cst_68 = arith.constant 0.000000e+00 : f32
    %cst_69 = arith.constant 6.000000e+00 : f32
    %78 = vector.broadcast %cst_68 : f32 to vector<64x128xf32>
    %79 = arith.maximumf %78, %77 : vector<64x128xf32>
    %80 = vector.broadcast %cst_69 : f32 to vector<64x128xf32>
    %81 = arith.minimumf %80, %79 : vector<64x128xf32>
    %c0_70 = arith.constant 0 : index
    %c0_71 = arith.constant 0 : index
    %c0_72 = arith.constant 0 : index
    %82 = vector.load %arg5[%c0_70, %c0_71, %c0_72] : memref<3x9x128xf32, #tpu.memory_space<vmem>>, vector<1x9x128xf32>
    %83 = vector.shape_cast %82 : vector<1x9x128xf32> to vector<9x128xf32>
    %84 = tpu.iota {dimensions = array<i32: 0>} : vector<64x1xi32>
    %c3_i32 = arith.constant 3 : i32
    %85 = vector.broadcast %c3_i32 : i32 to vector<64x1xi32>
    %86 = arith.shrsi %84, %85 : vector<64x1xi32>
    %c7_i32 = arith.constant 7 : i32
    %87 = vector.broadcast %c7_i32 : i32 to vector<64x1xi32>
    %88 = arith.andi %84, %87 : vector<64x1xi32>
    %cst_73 = arith.constant 0.000000e+00 : f32
    %89 = vector.broadcast %cst_73 : f32 to vector<64x128xf32>
    %c-1_i32 = arith.constant -1 : i32
    %90 = vector.broadcast %c-1_i32 : i32 to vector<64x1xi32>
    %91 = arith.addi %86, %90 : vector<64x1xi32>
    %c0_i32 = arith.constant 0 : i32
    %92 = vector.broadcast %c0_i32 : i32 to vector<64x1xi32>
    %93 = arith.cmpi sge, %91, %92 : vector<64x1xi32>
    %c-1_i32_74 = arith.constant -1 : i32
    %94 = vector.broadcast %c-1_i32_74 : i32 to vector<64x1xi32>
    %95 = arith.addi %86, %94 : vector<64x1xi32>
    %c8_i32 = arith.constant 8 : i32
    %96 = vector.broadcast %c8_i32 : i32 to vector<64x1xi32>
    %97 = arith.cmpi slt, %95, %96 : vector<64x1xi32>
    %98 = arith.andi %93, %97 : vector<64x1xi1>
    %c9_i32 = arith.constant 9 : i32
    %99 = tpu.dynamic_rotate %81 by %c9_i32 dim 0 : vector<64x128xf32>, i32 -> vector<64x128xf32>
    %c-1_i32_75 = arith.constant -1 : i32
    %100 = vector.broadcast %c-1_i32_75 : i32 to vector<64x1xi32>
    %101 = arith.addi %88, %100 : vector<64x1xi32>
    %c0_i32_76 = arith.constant 0 : i32
    %102 = vector.broadcast %c0_i32_76 : i32 to vector<64x1xi32>
    %103 = arith.cmpi sge, %101, %102 : vector<64x1xi32>
    %104 = arith.andi %98, %103 : vector<64x1xi1>
    %c-1_i32_77 = arith.constant -1 : i32
    %105 = vector.broadcast %c-1_i32_77 : i32 to vector<64x1xi32>
    %106 = arith.addi %88, %105 : vector<64x1xi32>
    %c8_i32_78 = arith.constant 8 : i32
    %107 = vector.broadcast %c8_i32_78 : i32 to vector<64x1xi32>
    %108 = arith.cmpi slt, %106, %107 : vector<64x1xi32>
    %109 = arith.andi %104, %108 : vector<64x1xi1>
    %cst_79 = arith.constant 0.000000e+00 : f32
    %110 = vector.shape_cast %109 : vector<64x1xi1> to vector<64x1xi1>
    %111 = vector.broadcast %110 : vector<64x1xi1> to vector<64x128xi1>
    %112 = vector.broadcast %cst_79 : f32 to vector<64x128xf32>
    %113 = arith.select %111, %99, %112 : vector<64x128xi1>, vector<64x128xf32>
    %114 = vector.extract_strided_slice %83 {offsets = [0, 0], sizes = [1, 128], strides = [1, 1]} : vector<9x128xf32> to vector<1x128xf32>
    %115 = vector.broadcast %114 : vector<1x128xf32> to vector<64x128xf32>
    %116 = arith.mulf %113, %115 : vector<64x128xf32>
    %117 = arith.addf %89, %116 : vector<64x128xf32>
    %c8_i32_80 = arith.constant 8 : i32
    %118 = tpu.dynamic_rotate %81 by %c8_i32_80 dim 0 : vector<64x128xf32>, i32 -> vector<64x128xf32>
    %c0_i32_81 = arith.constant 0 : i32
    %119 = vector.broadcast %c0_i32_81 : i32 to vector<64x1xi32>
    %120 = arith.addi %88, %119 : vector<64x1xi32>
    %c0_i32_82 = arith.constant 0 : i32
    %121 = vector.broadcast %c0_i32_82 : i32 to vector<64x1xi32>
    %122 = arith.cmpi sge, %120, %121 : vector<64x1xi32>
    %123 = arith.andi %98, %122 : vector<64x1xi1>
    %c0_i32_83 = arith.constant 0 : i32
    %124 = vector.broadcast %c0_i32_83 : i32 to vector<64x1xi32>
    %125 = arith.addi %88, %124 : vector<64x1xi32>
    %c8_i32_84 = arith.constant 8 : i32
    %126 = vector.broadcast %c8_i32_84 : i32 to vector<64x1xi32>
    %127 = arith.cmpi slt, %125, %126 : vector<64x1xi32>
    %128 = arith.andi %123, %127 : vector<64x1xi1>
    %cst_85 = arith.constant 0.000000e+00 : f32
    %129 = vector.shape_cast %128 : vector<64x1xi1> to vector<64x1xi1>
    %130 = vector.broadcast %129 : vector<64x1xi1> to vector<64x128xi1>
    %131 = vector.broadcast %cst_85 : f32 to vector<64x128xf32>
    %132 = arith.select %130, %118, %131 : vector<64x128xi1>, vector<64x128xf32>
    %133 = vector.extract_strided_slice %83 {offsets = [1, 0], sizes = [1, 128], strides = [1, 1]} : vector<9x128xf32> to vector<1x128xf32>
    %134 = vector.broadcast %133 : vector<1x128xf32> to vector<64x128xf32>
    %135 = arith.mulf %132, %134 : vector<64x128xf32>
    %136 = arith.addf %117, %135 : vector<64x128xf32>
    %c7_i32_86 = arith.constant 7 : i32
    %137 = tpu.dynamic_rotate %81 by %c7_i32_86 dim 0 : vector<64x128xf32>, i32 -> vector<64x128xf32>
    %c1_i32 = arith.constant 1 : i32
    %138 = vector.broadcast %c1_i32 : i32 to vector<64x1xi32>
    %139 = arith.addi %88, %138 : vector<64x1xi32>
    %c0_i32_87 = arith.constant 0 : i32
    %140 = vector.broadcast %c0_i32_87 : i32 to vector<64x1xi32>
    %141 = arith.cmpi sge, %139, %140 : vector<64x1xi32>
    %142 = arith.andi %98, %141 : vector<64x1xi1>
    %c1_i32_88 = arith.constant 1 : i32
    %143 = vector.broadcast %c1_i32_88 : i32 to vector<64x1xi32>
    %144 = arith.addi %88, %143 : vector<64x1xi32>
    %c8_i32_89 = arith.constant 8 : i32
    %145 = vector.broadcast %c8_i32_89 : i32 to vector<64x1xi32>
    %146 = arith.cmpi slt, %144, %145 : vector<64x1xi32>
    %147 = arith.andi %142, %146 : vector<64x1xi1>
    %cst_90 = arith.constant 0.000000e+00 : f32
    %148 = vector.shape_cast %147 : vector<64x1xi1> to vector<64x1xi1>
    %149 = vector.broadcast %148 : vector<64x1xi1> to vector<64x128xi1>
    %150 = vector.broadcast %cst_90 : f32 to vector<64x128xf32>
    %151 = arith.select %149, %137, %150 : vector<64x128xi1>, vector<64x128xf32>
    %152 = vector.extract_strided_slice %83 {offsets = [2, 0], sizes = [1, 128], strides = [1, 1]} : vector<9x128xf32> to vector<1x128xf32>
    %153 = vector.broadcast %152 : vector<1x128xf32> to vector<64x128xf32>
    %154 = arith.mulf %151, %153 : vector<64x128xf32>
    %155 = arith.addf %136, %154 : vector<64x128xf32>
    %c0_i32_91 = arith.constant 0 : i32
    %156 = vector.broadcast %c0_i32_91 : i32 to vector<64x1xi32>
    %157 = arith.addi %86, %156 : vector<64x1xi32>
    %c0_i32_92 = arith.constant 0 : i32
    %158 = vector.broadcast %c0_i32_92 : i32 to vector<64x1xi32>
    %159 = arith.cmpi sge, %157, %158 : vector<64x1xi32>
    %c0_i32_93 = arith.constant 0 : i32
    %160 = vector.broadcast %c0_i32_93 : i32 to vector<64x1xi32>
    %161 = arith.addi %86, %160 : vector<64x1xi32>
    %c8_i32_94 = arith.constant 8 : i32
    %162 = vector.broadcast %c8_i32_94 : i32 to vector<64x1xi32>
    %163 = arith.cmpi slt, %161, %162 : vector<64x1xi32>
    %164 = arith.andi %159, %163 : vector<64x1xi1>
    %c1_i32_95 = arith.constant 1 : i32
    %165 = tpu.dynamic_rotate %81 by %c1_i32_95 dim 0 : vector<64x128xf32>, i32 -> vector<64x128xf32>
    %c-1_i32_96 = arith.constant -1 : i32
    %166 = vector.broadcast %c-1_i32_96 : i32 to vector<64x1xi32>
    %167 = arith.addi %88, %166 : vector<64x1xi32>
    %c0_i32_97 = arith.constant 0 : i32
    %168 = vector.broadcast %c0_i32_97 : i32 to vector<64x1xi32>
    %169 = arith.cmpi sge, %167, %168 : vector<64x1xi32>
    %170 = arith.andi %164, %169 : vector<64x1xi1>
    %c-1_i32_98 = arith.constant -1 : i32
    %171 = vector.broadcast %c-1_i32_98 : i32 to vector<64x1xi32>
    %172 = arith.addi %88, %171 : vector<64x1xi32>
    %c8_i32_99 = arith.constant 8 : i32
    %173 = vector.broadcast %c8_i32_99 : i32 to vector<64x1xi32>
    %174 = arith.cmpi slt, %172, %173 : vector<64x1xi32>
    %175 = arith.andi %170, %174 : vector<64x1xi1>
    %cst_100 = arith.constant 0.000000e+00 : f32
    %176 = vector.shape_cast %175 : vector<64x1xi1> to vector<64x1xi1>
    %177 = vector.broadcast %176 : vector<64x1xi1> to vector<64x128xi1>
    %178 = vector.broadcast %cst_100 : f32 to vector<64x128xf32>
    %179 = arith.select %177, %165, %178 : vector<64x128xi1>, vector<64x128xf32>
    %180 = vector.extract_strided_slice %83 {offsets = [3, 0], sizes = [1, 128], strides = [1, 1]} : vector<9x128xf32> to vector<1x128xf32>
    %181 = vector.broadcast %180 : vector<1x128xf32> to vector<64x128xf32>
    %182 = arith.mulf %179, %181 : vector<64x128xf32>
    %183 = arith.addf %155, %182 : vector<64x128xf32>
    %c0_i32_101 = arith.constant 0 : i32
    %184 = vector.broadcast %c0_i32_101 : i32 to vector<64x1xi32>
    %185 = arith.addi %88, %184 : vector<64x1xi32>
    %c0_i32_102 = arith.constant 0 : i32
    %186 = vector.broadcast %c0_i32_102 : i32 to vector<64x1xi32>
    %187 = arith.cmpi sge, %185, %186 : vector<64x1xi32>
    %188 = arith.andi %164, %187 : vector<64x1xi1>
    %c0_i32_103 = arith.constant 0 : i32
    %189 = vector.broadcast %c0_i32_103 : i32 to vector<64x1xi32>
    %190 = arith.addi %88, %189 : vector<64x1xi32>
    %c8_i32_104 = arith.constant 8 : i32
    %191 = vector.broadcast %c8_i32_104 : i32 to vector<64x1xi32>
    %192 = arith.cmpi slt, %190, %191 : vector<64x1xi32>
    %193 = arith.andi %188, %192 : vector<64x1xi1>
    %cst_105 = arith.constant 0.000000e+00 : f32
    %194 = vector.shape_cast %193 : vector<64x1xi1> to vector<64x1xi1>
    %195 = vector.broadcast %194 : vector<64x1xi1> to vector<64x128xi1>
    %196 = vector.broadcast %cst_105 : f32 to vector<64x128xf32>
    %197 = arith.select %195, %81, %196 : vector<64x128xi1>, vector<64x128xf32>
    %198 = vector.extract_strided_slice %83 {offsets = [4, 0], sizes = [1, 128], strides = [1, 1]} : vector<9x128xf32> to vector<1x128xf32>
    %199 = vector.broadcast %198 : vector<1x128xf32> to vector<64x128xf32>
    %200 = arith.mulf %197, %199 : vector<64x128xf32>
    %201 = arith.addf %183, %200 : vector<64x128xf32>
    %c63_i32 = arith.constant 63 : i32
    %202 = tpu.dynamic_rotate %81 by %c63_i32 dim 0 : vector<64x128xf32>, i32 -> vector<64x128xf32>
    %c1_i32_106 = arith.constant 1 : i32
    %203 = vector.broadcast %c1_i32_106 : i32 to vector<64x1xi32>
    %204 = arith.addi %88, %203 : vector<64x1xi32>
    %c0_i32_107 = arith.constant 0 : i32
    %205 = vector.broadcast %c0_i32_107 : i32 to vector<64x1xi32>
    %206 = arith.cmpi sge, %204, %205 : vector<64x1xi32>
    %207 = arith.andi %164, %206 : vector<64x1xi1>
    %c1_i32_108 = arith.constant 1 : i32
    %208 = vector.broadcast %c1_i32_108 : i32 to vector<64x1xi32>
    %209 = arith.addi %88, %208 : vector<64x1xi32>
    %c8_i32_109 = arith.constant 8 : i32
    %210 = vector.broadcast %c8_i32_109 : i32 to vector<64x1xi32>
    %211 = arith.cmpi slt, %209, %210 : vector<64x1xi32>
    %212 = arith.andi %207, %211 : vector<64x1xi1>
    %cst_110 = arith.constant 0.000000e+00 : f32
    %213 = vector.shape_cast %212 : vector<64x1xi1> to vector<64x1xi1>
    %214 = vector.broadcast %213 : vector<64x1xi1> to vector<64x128xi1>
    %215 = vector.broadcast %cst_110 : f32 to vector<64x128xf32>
    %216 = arith.select %214, %202, %215 : vector<64x128xi1>, vector<64x128xf32>
    %217 = vector.extract_strided_slice %83 {offsets = [5, 0], sizes = [1, 128], strides = [1, 1]} : vector<9x128xf32> to vector<1x128xf32>
    %218 = vector.broadcast %217 : vector<1x128xf32> to vector<64x128xf32>
    %219 = arith.mulf %216, %218 : vector<64x128xf32>
    %220 = arith.addf %201, %219 : vector<64x128xf32>
    %c1_i32_111 = arith.constant 1 : i32
    %221 = vector.broadcast %c1_i32_111 : i32 to vector<64x1xi32>
    %222 = arith.addi %86, %221 : vector<64x1xi32>
    %c0_i32_112 = arith.constant 0 : i32
    %223 = vector.broadcast %c0_i32_112 : i32 to vector<64x1xi32>
    %224 = arith.cmpi sge, %222, %223 : vector<64x1xi32>
    %c1_i32_113 = arith.constant 1 : i32
    %225 = vector.broadcast %c1_i32_113 : i32 to vector<64x1xi32>
    %226 = arith.addi %86, %225 : vector<64x1xi32>
    %c8_i32_114 = arith.constant 8 : i32
    %227 = vector.broadcast %c8_i32_114 : i32 to vector<64x1xi32>
    %228 = arith.cmpi slt, %226, %227 : vector<64x1xi32>
    %229 = arith.andi %224, %228 : vector<64x1xi1>
    %c57_i32 = arith.constant 57 : i32
    %230 = tpu.dynamic_rotate %81 by %c57_i32 dim 0 : vector<64x128xf32>, i32 -> vector<64x128xf32>
    %c-1_i32_115 = arith.constant -1 : i32
    %231 = vector.broadcast %c-1_i32_115 : i32 to vector<64x1xi32>
    %232 = arith.addi %88, %231 : vector<64x1xi32>
    %c0_i32_116 = arith.constant 0 : i32
    %233 = vector.broadcast %c0_i32_116 : i32 to vector<64x1xi32>
    %234 = arith.cmpi sge, %232, %233 : vector<64x1xi32>
    %235 = arith.andi %229, %234 : vector<64x1xi1>
    %c-1_i32_117 = arith.constant -1 : i32
    %236 = vector.broadcast %c-1_i32_117 : i32 to vector<64x1xi32>
    %237 = arith.addi %88, %236 : vector<64x1xi32>
    %c8_i32_118 = arith.constant 8 : i32
    %238 = vector.broadcast %c8_i32_118 : i32 to vector<64x1xi32>
    %239 = arith.cmpi slt, %237, %238 : vector<64x1xi32>
    %240 = arith.andi %235, %239 : vector<64x1xi1>
    %cst_119 = arith.constant 0.000000e+00 : f32
    %241 = vector.shape_cast %240 : vector<64x1xi1> to vector<64x1xi1>
    %242 = vector.broadcast %241 : vector<64x1xi1> to vector<64x128xi1>
    %243 = vector.broadcast %cst_119 : f32 to vector<64x128xf32>
    %244 = arith.select %242, %230, %243 : vector<64x128xi1>, vector<64x128xf32>
    %245 = vector.extract_strided_slice %83 {offsets = [6, 0], sizes = [1, 128], strides = [1, 1]} : vector<9x128xf32> to vector<1x128xf32>
    %246 = vector.broadcast %245 : vector<1x128xf32> to vector<64x128xf32>
    %247 = arith.mulf %244, %246 : vector<64x128xf32>
    %248 = arith.addf %220, %247 : vector<64x128xf32>
    %c56_i32 = arith.constant 56 : i32
    %249 = tpu.dynamic_rotate %81 by %c56_i32 dim 0 : vector<64x128xf32>, i32 -> vector<64x128xf32>
    %c0_i32_120 = arith.constant 0 : i32
    %250 = vector.broadcast %c0_i32_120 : i32 to vector<64x1xi32>
    %251 = arith.addi %88, %250 : vector<64x1xi32>
    %c0_i32_121 = arith.constant 0 : i32
    %252 = vector.broadcast %c0_i32_121 : i32 to vector<64x1xi32>
    %253 = arith.cmpi sge, %251, %252 : vector<64x1xi32>
    %254 = arith.andi %229, %253 : vector<64x1xi1>
    %c0_i32_122 = arith.constant 0 : i32
    %255 = vector.broadcast %c0_i32_122 : i32 to vector<64x1xi32>
    %256 = arith.addi %88, %255 : vector<64x1xi32>
    %c8_i32_123 = arith.constant 8 : i32
    %257 = vector.broadcast %c8_i32_123 : i32 to vector<64x1xi32>
    %258 = arith.cmpi slt, %256, %257 : vector<64x1xi32>
    %259 = arith.andi %254, %258 : vector<64x1xi1>
    %cst_124 = arith.constant 0.000000e+00 : f32
    %260 = vector.shape_cast %259 : vector<64x1xi1> to vector<64x1xi1>
    %261 = vector.broadcast %260 : vector<64x1xi1> to vector<64x128xi1>
    %262 = vector.broadcast %cst_124 : f32 to vector<64x128xf32>
    %263 = arith.select %261, %249, %262 : vector<64x128xi1>, vector<64x128xf32>
    %264 = vector.extract_strided_slice %83 {offsets = [7, 0], sizes = [1, 128], strides = [1, 1]} : vector<9x128xf32> to vector<1x128xf32>
    %265 = vector.broadcast %264 : vector<1x128xf32> to vector<64x128xf32>
    %266 = arith.mulf %263, %265 : vector<64x128xf32>
    %267 = arith.addf %248, %266 : vector<64x128xf32>
    %c55_i32 = arith.constant 55 : i32
    %268 = tpu.dynamic_rotate %81 by %c55_i32 dim 0 : vector<64x128xf32>, i32 -> vector<64x128xf32>
    %c1_i32_125 = arith.constant 1 : i32
    %269 = vector.broadcast %c1_i32_125 : i32 to vector<64x1xi32>
    %270 = arith.addi %88, %269 : vector<64x1xi32>
    %c0_i32_126 = arith.constant 0 : i32
    %271 = vector.broadcast %c0_i32_126 : i32 to vector<64x1xi32>
    %272 = arith.cmpi sge, %270, %271 : vector<64x1xi32>
    %273 = arith.andi %229, %272 : vector<64x1xi1>
    %c1_i32_127 = arith.constant 1 : i32
    %274 = vector.broadcast %c1_i32_127 : i32 to vector<64x1xi32>
    %275 = arith.addi %88, %274 : vector<64x1xi32>
    %c8_i32_128 = arith.constant 8 : i32
    %276 = vector.broadcast %c8_i32_128 : i32 to vector<64x1xi32>
    %277 = arith.cmpi slt, %275, %276 : vector<64x1xi32>
    %278 = arith.andi %273, %277 : vector<64x1xi1>
    %cst_129 = arith.constant 0.000000e+00 : f32
    %279 = vector.shape_cast %278 : vector<64x1xi1> to vector<64x1xi1>
    %280 = vector.broadcast %279 : vector<64x1xi1> to vector<64x128xi1>
    %281 = vector.broadcast %cst_129 : f32 to vector<64x128xf32>
    %282 = arith.select %280, %268, %281 : vector<64x128xi1>, vector<64x128xf32>
    %283 = vector.extract_strided_slice %83 {offsets = [8, 0], sizes = [1, 128], strides = [1, 1]} : vector<9x128xf32> to vector<1x128xf32>
    %284 = vector.broadcast %283 : vector<1x128xf32> to vector<64x128xf32>
    %285 = arith.mulf %282, %284 : vector<64x128xf32>
    %286 = arith.addf %267, %285 : vector<64x128xf32>
    %c1_130 = arith.constant 1 : index
    %c0_131 = arith.constant 0 : index
    %287 = vector.load %arg6[%c1_130, %c0_131] : memref<10x128xf32, #tpu.memory_space<vmem>>, vector<1x128xf32>
    %288 = vector.broadcast %287 : vector<1x128xf32> to vector<64x128xf32>
    %289 = arith.addf %286, %288 : vector<64x128xf32>
    %cst_132 = arith.constant 0.000000e+00 : f32
    %cst_133 = arith.constant 6.000000e+00 : f32
    %290 = vector.broadcast %cst_132 : f32 to vector<64x128xf32>
    %291 = arith.maximumf %290, %289 : vector<64x128xf32>
    %292 = vector.broadcast %cst_133 : f32 to vector<64x128xf32>
    %293 = arith.minimumf %292, %291 : vector<64x128xf32>
    %294 = arith.truncf %293 : vector<64x128xf32> to vector<64x128xbf16>
    %c0_134 = arith.constant 0 : index
    %c0_135 = arith.constant 0 : index
    %c0_136 = arith.constant 0 : index
    %295 = vector.load %arg4[%c0_134, %c0_135, %c0_136] : memref<6x128x128xbf16, #tpu.memory_space<vmem>>, vector<1x128x128xbf16>
    %296 = vector.shape_cast %295 : vector<1x128x128xbf16> to vector<128x128xbf16>
    %cst_137 = arith.constant dense<0.000000e+00> : vector<64x128xf32>
    %297 = tpu.matmul %294, %296, %cst_137 {dimension_numbers = #tpu.dot_dimension_numbers<[1], [0], [0], [1], [0, 0, 1, 1], [], []>} : vector<64x128xbf16>, vector<128x128xbf16>, vector<64x128xf32> -> vector<64x128xf32>
    %c2_138 = arith.constant 2 : index
    %c0_139 = arith.constant 0 : index
    %298 = vector.load %arg6[%c2_138, %c0_139] : memref<10x128xf32, #tpu.memory_space<vmem>>, vector<1x128xf32>
    %299 = vector.broadcast %298 : vector<1x128xf32> to vector<64x128xf32>
    %300 = arith.addf %297, %299 : vector<64x128xf32>
    %301 = arith.addf %300, %81 : vector<64x128xf32>
    %302 = arith.truncf %301 : vector<64x128xf32> to vector<64x128xbf16>
    %c1_140 = arith.constant 1 : index
    %c0_141 = arith.constant 0 : index
    %c0_142 = arith.constant 0 : index
    %303 = vector.load %arg4[%c1_140, %c0_141, %c0_142] : memref<6x128x128xbf16, #tpu.memory_space<vmem>>, vector<1x128x128xbf16>
    %304 = vector.shape_cast %303 : vector<1x128x128xbf16> to vector<128x128xbf16>
    %cst_143 = arith.constant dense<0.000000e+00> : vector<64x128xf32>
    %305 = tpu.matmul %302, %304, %cst_143 {dimension_numbers = #tpu.dot_dimension_numbers<[1], [0], [0], [1], [0, 0, 1, 1], [], []>} : vector<64x128xbf16>, vector<128x128xbf16>, vector<64x128xf32> -> vector<64x128xf32>
    %c3_144 = arith.constant 3 : index
    %c0_145 = arith.constant 0 : index
    %306 = vector.load %arg6[%c3_144, %c0_145] : memref<10x128xf32, #tpu.memory_space<vmem>>, vector<1x128xf32>
    %307 = vector.broadcast %306 : vector<1x128xf32> to vector<64x128xf32>
    %308 = arith.addf %305, %307 : vector<64x128xf32>
    %cst_146 = arith.constant 0.000000e+00 : f32
    %cst_147 = arith.constant 6.000000e+00 : f32
    %309 = vector.broadcast %cst_146 : f32 to vector<64x128xf32>
    %310 = arith.maximumf %309, %308 : vector<64x128xf32>
    %311 = vector.broadcast %cst_147 : f32 to vector<64x128xf32>
    %312 = arith.minimumf %311, %310 : vector<64x128xf32>
    %c1_148 = arith.constant 1 : index
    %c0_149 = arith.constant 0 : index
    %c0_150 = arith.constant 0 : index
    %313 = vector.load %arg5[%c1_148, %c0_149, %c0_150] : memref<3x9x128xf32, #tpu.memory_space<vmem>>, vector<1x9x128xf32>
    %314 = vector.shape_cast %313 : vector<1x9x128xf32> to vector<9x128xf32>
    %315 = tpu.iota {dimensions = array<i32: 0>} : vector<64x1xi32>
    %c3_i32_151 = arith.constant 3 : i32
    %316 = vector.broadcast %c3_i32_151 : i32 to vector<64x1xi32>
    %317 = arith.shrsi %315, %316 : vector<64x1xi32>
    %c7_i32_152 = arith.constant 7 : i32
    %318 = vector.broadcast %c7_i32_152 : i32 to vector<64x1xi32>
    %319 = arith.andi %315, %318 : vector<64x1xi32>
    %cst_153 = arith.constant 0.000000e+00 : f32
    %320 = vector.broadcast %cst_153 : f32 to vector<64x128xf32>
    %c-1_i32_154 = arith.constant -1 : i32
    %321 = vector.broadcast %c-1_i32_154 : i32 to vector<64x1xi32>
    %322 = arith.addi %317, %321 : vector<64x1xi32>
    %c0_i32_155 = arith.constant 0 : i32
    %323 = vector.broadcast %c0_i32_155 : i32 to vector<64x1xi32>
    %324 = arith.cmpi sge, %322, %323 : vector<64x1xi32>
    %c-1_i32_156 = arith.constant -1 : i32
    %325 = vector.broadcast %c-1_i32_156 : i32 to vector<64x1xi32>
    %326 = arith.addi %317, %325 : vector<64x1xi32>
    %c8_i32_157 = arith.constant 8 : i32
    %327 = vector.broadcast %c8_i32_157 : i32 to vector<64x1xi32>
    %328 = arith.cmpi slt, %326, %327 : vector<64x1xi32>
    %329 = arith.andi %324, %328 : vector<64x1xi1>
    %c9_i32_158 = arith.constant 9 : i32
    %330 = tpu.dynamic_rotate %312 by %c9_i32_158 dim 0 : vector<64x128xf32>, i32 -> vector<64x128xf32>
    %c-1_i32_159 = arith.constant -1 : i32
    %331 = vector.broadcast %c-1_i32_159 : i32 to vector<64x1xi32>
    %332 = arith.addi %319, %331 : vector<64x1xi32>
    %c0_i32_160 = arith.constant 0 : i32
    %333 = vector.broadcast %c0_i32_160 : i32 to vector<64x1xi32>
    %334 = arith.cmpi sge, %332, %333 : vector<64x1xi32>
    %335 = arith.andi %329, %334 : vector<64x1xi1>
    %c-1_i32_161 = arith.constant -1 : i32
    %336 = vector.broadcast %c-1_i32_161 : i32 to vector<64x1xi32>
    %337 = arith.addi %319, %336 : vector<64x1xi32>
    %c8_i32_162 = arith.constant 8 : i32
    %338 = vector.broadcast %c8_i32_162 : i32 to vector<64x1xi32>
    %339 = arith.cmpi slt, %337, %338 : vector<64x1xi32>
    %340 = arith.andi %335, %339 : vector<64x1xi1>
    %cst_163 = arith.constant 0.000000e+00 : f32
    %341 = vector.shape_cast %340 : vector<64x1xi1> to vector<64x1xi1>
    %342 = vector.broadcast %341 : vector<64x1xi1> to vector<64x128xi1>
    %343 = vector.broadcast %cst_163 : f32 to vector<64x128xf32>
    %344 = arith.select %342, %330, %343 : vector<64x128xi1>, vector<64x128xf32>
    %345 = vector.extract_strided_slice %314 {offsets = [0, 0], sizes = [1, 128], strides = [1, 1]} : vector<9x128xf32> to vector<1x128xf32>
    %346 = vector.broadcast %345 : vector<1x128xf32> to vector<64x128xf32>
    %347 = arith.mulf %344, %346 : vector<64x128xf32>
    %348 = arith.addf %320, %347 : vector<64x128xf32>
    %c8_i32_164 = arith.constant 8 : i32
    %349 = tpu.dynamic_rotate %312 by %c8_i32_164 dim 0 : vector<64x128xf32>, i32 -> vector<64x128xf32>
    %c0_i32_165 = arith.constant 0 : i32
    %350 = vector.broadcast %c0_i32_165 : i32 to vector<64x1xi32>
    %351 = arith.addi %319, %350 : vector<64x1xi32>
    %c0_i32_166 = arith.constant 0 : i32
    %352 = vector.broadcast %c0_i32_166 : i32 to vector<64x1xi32>
    %353 = arith.cmpi sge, %351, %352 : vector<64x1xi32>
    %354 = arith.andi %329, %353 : vector<64x1xi1>
    %c0_i32_167 = arith.constant 0 : i32
    %355 = vector.broadcast %c0_i32_167 : i32 to vector<64x1xi32>
    %356 = arith.addi %319, %355 : vector<64x1xi32>
    %c8_i32_168 = arith.constant 8 : i32
    %357 = vector.broadcast %c8_i32_168 : i32 to vector<64x1xi32>
    %358 = arith.cmpi slt, %356, %357 : vector<64x1xi32>
    %359 = arith.andi %354, %358 : vector<64x1xi1>
    %cst_169 = arith.constant 0.000000e+00 : f32
    %360 = vector.shape_cast %359 : vector<64x1xi1> to vector<64x1xi1>
    %361 = vector.broadcast %360 : vector<64x1xi1> to vector<64x128xi1>
    %362 = vector.broadcast %cst_169 : f32 to vector<64x128xf32>
    %363 = arith.select %361, %349, %362 : vector<64x128xi1>, vector<64x128xf32>
    %364 = vector.extract_strided_slice %314 {offsets = [1, 0], sizes = [1, 128], strides = [1, 1]} : vector<9x128xf32> to vector<1x128xf32>
    %365 = vector.broadcast %364 : vector<1x128xf32> to vector<64x128xf32>
    %366 = arith.mulf %363, %365 : vector<64x128xf32>
    %367 = arith.addf %348, %366 : vector<64x128xf32>
    %c7_i32_170 = arith.constant 7 : i32
    %368 = tpu.dynamic_rotate %312 by %c7_i32_170 dim 0 : vector<64x128xf32>, i32 -> vector<64x128xf32>
    %c1_i32_171 = arith.constant 1 : i32
    %369 = vector.broadcast %c1_i32_171 : i32 to vector<64x1xi32>
    %370 = arith.addi %319, %369 : vector<64x1xi32>
    %c0_i32_172 = arith.constant 0 : i32
    %371 = vector.broadcast %c0_i32_172 : i32 to vector<64x1xi32>
    %372 = arith.cmpi sge, %370, %371 : vector<64x1xi32>
    %373 = arith.andi %329, %372 : vector<64x1xi1>
    %c1_i32_173 = arith.constant 1 : i32
    %374 = vector.broadcast %c1_i32_173 : i32 to vector<64x1xi32>
    %375 = arith.addi %319, %374 : vector<64x1xi32>
    %c8_i32_174 = arith.constant 8 : i32
    %376 = vector.broadcast %c8_i32_174 : i32 to vector<64x1xi32>
    %377 = arith.cmpi slt, %375, %376 : vector<64x1xi32>
    %378 = arith.andi %373, %377 : vector<64x1xi1>
    %cst_175 = arith.constant 0.000000e+00 : f32
    %379 = vector.shape_cast %378 : vector<64x1xi1> to vector<64x1xi1>
    %380 = vector.broadcast %379 : vector<64x1xi1> to vector<64x128xi1>
    %381 = vector.broadcast %cst_175 : f32 to vector<64x128xf32>
    %382 = arith.select %380, %368, %381 : vector<64x128xi1>, vector<64x128xf32>
    %383 = vector.extract_strided_slice %314 {offsets = [2, 0], sizes = [1, 128], strides = [1, 1]} : vector<9x128xf32> to vector<1x128xf32>
    %384 = vector.broadcast %383 : vector<1x128xf32> to vector<64x128xf32>
    %385 = arith.mulf %382, %384 : vector<64x128xf32>
    %386 = arith.addf %367, %385 : vector<64x128xf32>
    %c0_i32_176 = arith.constant 0 : i32
    %387 = vector.broadcast %c0_i32_176 : i32 to vector<64x1xi32>
    %388 = arith.addi %317, %387 : vector<64x1xi32>
    %c0_i32_177 = arith.constant 0 : i32
    %389 = vector.broadcast %c0_i32_177 : i32 to vector<64x1xi32>
    %390 = arith.cmpi sge, %388, %389 : vector<64x1xi32>
    %c0_i32_178 = arith.constant 0 : i32
    %391 = vector.broadcast %c0_i32_178 : i32 to vector<64x1xi32>
    %392 = arith.addi %317, %391 : vector<64x1xi32>
    %c8_i32_179 = arith.constant 8 : i32
    %393 = vector.broadcast %c8_i32_179 : i32 to vector<64x1xi32>
    %394 = arith.cmpi slt, %392, %393 : vector<64x1xi32>
    %395 = arith.andi %390, %394 : vector<64x1xi1>
    %c1_i32_180 = arith.constant 1 : i32
    %396 = tpu.dynamic_rotate %312 by %c1_i32_180 dim 0 : vector<64x128xf32>, i32 -> vector<64x128xf32>
    %c-1_i32_181 = arith.constant -1 : i32
    %397 = vector.broadcast %c-1_i32_181 : i32 to vector<64x1xi32>
    %398 = arith.addi %319, %397 : vector<64x1xi32>
    %c0_i32_182 = arith.constant 0 : i32
    %399 = vector.broadcast %c0_i32_182 : i32 to vector<64x1xi32>
    %400 = arith.cmpi sge, %398, %399 : vector<64x1xi32>
    %401 = arith.andi %395, %400 : vector<64x1xi1>
    %c-1_i32_183 = arith.constant -1 : i32
    %402 = vector.broadcast %c-1_i32_183 : i32 to vector<64x1xi32>
    %403 = arith.addi %319, %402 : vector<64x1xi32>
    %c8_i32_184 = arith.constant 8 : i32
    %404 = vector.broadcast %c8_i32_184 : i32 to vector<64x1xi32>
    %405 = arith.cmpi slt, %403, %404 : vector<64x1xi32>
    %406 = arith.andi %401, %405 : vector<64x1xi1>
    %cst_185 = arith.constant 0.000000e+00 : f32
    %407 = vector.shape_cast %406 : vector<64x1xi1> to vector<64x1xi1>
    %408 = vector.broadcast %407 : vector<64x1xi1> to vector<64x128xi1>
    %409 = vector.broadcast %cst_185 : f32 to vector<64x128xf32>
    %410 = arith.select %408, %396, %409 : vector<64x128xi1>, vector<64x128xf32>
    %411 = vector.extract_strided_slice %314 {offsets = [3, 0], sizes = [1, 128], strides = [1, 1]} : vector<9x128xf32> to vector<1x128xf32>
    %412 = vector.broadcast %411 : vector<1x128xf32> to vector<64x128xf32>
    %413 = arith.mulf %410, %412 : vector<64x128xf32>
    %414 = arith.addf %386, %413 : vector<64x128xf32>
    %c0_i32_186 = arith.constant 0 : i32
    %415 = vector.broadcast %c0_i32_186 : i32 to vector<64x1xi32>
    %416 = arith.addi %319, %415 : vector<64x1xi32>
    %c0_i32_187 = arith.constant 0 : i32
    %417 = vector.broadcast %c0_i32_187 : i32 to vector<64x1xi32>
    %418 = arith.cmpi sge, %416, %417 : vector<64x1xi32>
    %419 = arith.andi %395, %418 : vector<64x1xi1>
    %c0_i32_188 = arith.constant 0 : i32
    %420 = vector.broadcast %c0_i32_188 : i32 to vector<64x1xi32>
    %421 = arith.addi %319, %420 : vector<64x1xi32>
    %c8_i32_189 = arith.constant 8 : i32
    %422 = vector.broadcast %c8_i32_189 : i32 to vector<64x1xi32>
    %423 = arith.cmpi slt, %421, %422 : vector<64x1xi32>
    %424 = arith.andi %419, %423 : vector<64x1xi1>
    %cst_190 = arith.constant 0.000000e+00 : f32
    %425 = vector.shape_cast %424 : vector<64x1xi1> to vector<64x1xi1>
    %426 = vector.broadcast %425 : vector<64x1xi1> to vector<64x128xi1>
    %427 = vector.broadcast %cst_190 : f32 to vector<64x128xf32>
    %428 = arith.select %426, %312, %427 : vector<64x128xi1>, vector<64x128xf32>
    %429 = vector.extract_strided_slice %314 {offsets = [4, 0], sizes = [1, 128], strides = [1, 1]} : vector<9x128xf32> to vector<1x128xf32>
    %430 = vector.broadcast %429 : vector<1x128xf32> to vector<64x128xf32>
    %431 = arith.mulf %428, %430 : vector<64x128xf32>
    %432 = arith.addf %414, %431 : vector<64x128xf32>
    %c63_i32_191 = arith.constant 63 : i32
    %433 = tpu.dynamic_rotate %312 by %c63_i32_191 dim 0 : vector<64x128xf32>, i32 -> vector<64x128xf32>
    %c1_i32_192 = arith.constant 1 : i32
    %434 = vector.broadcast %c1_i32_192 : i32 to vector<64x1xi32>
    %435 = arith.addi %319, %434 : vector<64x1xi32>
    %c0_i32_193 = arith.constant 0 : i32
    %436 = vector.broadcast %c0_i32_193 : i32 to vector<64x1xi32>
    %437 = arith.cmpi sge, %435, %436 : vector<64x1xi32>
    %438 = arith.andi %395, %437 : vector<64x1xi1>
    %c1_i32_194 = arith.constant 1 : i32
    %439 = vector.broadcast %c1_i32_194 : i32 to vector<64x1xi32>
    %440 = arith.addi %319, %439 : vector<64x1xi32>
    %c8_i32_195 = arith.constant 8 : i32
    %441 = vector.broadcast %c8_i32_195 : i32 to vector<64x1xi32>
    %442 = arith.cmpi slt, %440, %441 : vector<64x1xi32>
    %443 = arith.andi %438, %442 : vector<64x1xi1>
    %cst_196 = arith.constant 0.000000e+00 : f32
    %444 = vector.shape_cast %443 : vector<64x1xi1> to vector<64x1xi1>
    %445 = vector.broadcast %444 : vector<64x1xi1> to vector<64x128xi1>
    %446 = vector.broadcast %cst_196 : f32 to vector<64x128xf32>
    %447 = arith.select %445, %433, %446 : vector<64x128xi1>, vector<64x128xf32>
    %448 = vector.extract_strided_slice %314 {offsets = [5, 0], sizes = [1, 128], strides = [1, 1]} : vector<9x128xf32> to vector<1x128xf32>
    %449 = vector.broadcast %448 : vector<1x128xf32> to vector<64x128xf32>
    %450 = arith.mulf %447, %449 : vector<64x128xf32>
    %451 = arith.addf %432, %450 : vector<64x128xf32>
    %c1_i32_197 = arith.constant 1 : i32
    %452 = vector.broadcast %c1_i32_197 : i32 to vector<64x1xi32>
    %453 = arith.addi %317, %452 : vector<64x1xi32>
    %c0_i32_198 = arith.constant 0 : i32
    %454 = vector.broadcast %c0_i32_198 : i32 to vector<64x1xi32>
    %455 = arith.cmpi sge, %453, %454 : vector<64x1xi32>
    %c1_i32_199 = arith.constant 1 : i32
    %456 = vector.broadcast %c1_i32_199 : i32 to vector<64x1xi32>
    %457 = arith.addi %317, %456 : vector<64x1xi32>
    %c8_i32_200 = arith.constant 8 : i32
    %458 = vector.broadcast %c8_i32_200 : i32 to vector<64x1xi32>
    %459 = arith.cmpi slt, %457, %458 : vector<64x1xi32>
    %460 = arith.andi %455, %459 : vector<64x1xi1>
    %c57_i32_201 = arith.constant 57 : i32
    %461 = tpu.dynamic_rotate %312 by %c57_i32_201 dim 0 : vector<64x128xf32>, i32 -> vector<64x128xf32>
    %c-1_i32_202 = arith.constant -1 : i32
    %462 = vector.broadcast %c-1_i32_202 : i32 to vector<64x1xi32>
    %463 = arith.addi %319, %462 : vector<64x1xi32>
    %c0_i32_203 = arith.constant 0 : i32
    %464 = vector.broadcast %c0_i32_203 : i32 to vector<64x1xi32>
    %465 = arith.cmpi sge, %463, %464 : vector<64x1xi32>
    %466 = arith.andi %460, %465 : vector<64x1xi1>
    %c-1_i32_204 = arith.constant -1 : i32
    %467 = vector.broadcast %c-1_i32_204 : i32 to vector<64x1xi32>
    %468 = arith.addi %319, %467 : vector<64x1xi32>
    %c8_i32_205 = arith.constant 8 : i32
    %469 = vector.broadcast %c8_i32_205 : i32 to vector<64x1xi32>
    %470 = arith.cmpi slt, %468, %469 : vector<64x1xi32>
    %471 = arith.andi %466, %470 : vector<64x1xi1>
    %cst_206 = arith.constant 0.000000e+00 : f32
    %472 = vector.shape_cast %471 : vector<64x1xi1> to vector<64x1xi1>
    %473 = vector.broadcast %472 : vector<64x1xi1> to vector<64x128xi1>
    %474 = vector.broadcast %cst_206 : f32 to vector<64x128xf32>
    %475 = arith.select %473, %461, %474 : vector<64x128xi1>, vector<64x128xf32>
    %476 = vector.extract_strided_slice %314 {offsets = [6, 0], sizes = [1, 128], strides = [1, 1]} : vector<9x128xf32> to vector<1x128xf32>
    %477 = vector.broadcast %476 : vector<1x128xf32> to vector<64x128xf32>
    %478 = arith.mulf %475, %477 : vector<64x128xf32>
    %479 = arith.addf %451, %478 : vector<64x128xf32>
    %c56_i32_207 = arith.constant 56 : i32
    %480 = tpu.dynamic_rotate %312 by %c56_i32_207 dim 0 : vector<64x128xf32>, i32 -> vector<64x128xf32>
    %c0_i32_208 = arith.constant 0 : i32
    %481 = vector.broadcast %c0_i32_208 : i32 to vector<64x1xi32>
    %482 = arith.addi %319, %481 : vector<64x1xi32>
    %c0_i32_209 = arith.constant 0 : i32
    %483 = vector.broadcast %c0_i32_209 : i32 to vector<64x1xi32>
    %484 = arith.cmpi sge, %482, %483 : vector<64x1xi32>
    %485 = arith.andi %460, %484 : vector<64x1xi1>
    %c0_i32_210 = arith.constant 0 : i32
    %486 = vector.broadcast %c0_i32_210 : i32 to vector<64x1xi32>
    %487 = arith.addi %319, %486 : vector<64x1xi32>
    %c8_i32_211 = arith.constant 8 : i32
    %488 = vector.broadcast %c8_i32_211 : i32 to vector<64x1xi32>
    %489 = arith.cmpi slt, %487, %488 : vector<64x1xi32>
    %490 = arith.andi %485, %489 : vector<64x1xi1>
    %cst_212 = arith.constant 0.000000e+00 : f32
    %491 = vector.shape_cast %490 : vector<64x1xi1> to vector<64x1xi1>
    %492 = vector.broadcast %491 : vector<64x1xi1> to vector<64x128xi1>
    %493 = vector.broadcast %cst_212 : f32 to vector<64x128xf32>
    %494 = arith.select %492, %480, %493 : vector<64x128xi1>, vector<64x128xf32>
    %495 = vector.extract_strided_slice %314 {offsets = [7, 0], sizes = [1, 128], strides = [1, 1]} : vector<9x128xf32> to vector<1x128xf32>
    %496 = vector.broadcast %495 : vector<1x128xf32> to vector<64x128xf32>
    %497 = arith.mulf %494, %496 : vector<64x128xf32>
    %498 = arith.addf %479, %497 : vector<64x128xf32>
    %c55_i32_213 = arith.constant 55 : i32
    %499 = tpu.dynamic_rotate %312 by %c55_i32_213 dim 0 : vector<64x128xf32>, i32 -> vector<64x128xf32>
    %c1_i32_214 = arith.constant 1 : i32
    %500 = vector.broadcast %c1_i32_214 : i32 to vector<64x1xi32>
    %501 = arith.addi %319, %500 : vector<64x1xi32>
    %c0_i32_215 = arith.constant 0 : i32
    %502 = vector.broadcast %c0_i32_215 : i32 to vector<64x1xi32>
    %503 = arith.cmpi sge, %501, %502 : vector<64x1xi32>
    %504 = arith.andi %460, %503 : vector<64x1xi1>
    %c1_i32_216 = arith.constant 1 : i32
    %505 = vector.broadcast %c1_i32_216 : i32 to vector<64x1xi32>
    %506 = arith.addi %319, %505 : vector<64x1xi32>
    %c8_i32_217 = arith.constant 8 : i32
    %507 = vector.broadcast %c8_i32_217 : i32 to vector<64x1xi32>
    %508 = arith.cmpi slt, %506, %507 : vector<64x1xi32>
    %509 = arith.andi %504, %508 : vector<64x1xi1>
    %cst_218 = arith.constant 0.000000e+00 : f32
    %510 = vector.shape_cast %509 : vector<64x1xi1> to vector<64x1xi1>
    %511 = vector.broadcast %510 : vector<64x1xi1> to vector<64x128xi1>
    %512 = vector.broadcast %cst_218 : f32 to vector<64x128xf32>
    %513 = arith.select %511, %499, %512 : vector<64x128xi1>, vector<64x128xf32>
    %514 = vector.extract_strided_slice %314 {offsets = [8, 0], sizes = [1, 128], strides = [1, 1]} : vector<9x128xf32> to vector<1x128xf32>
    %515 = vector.broadcast %514 : vector<1x128xf32> to vector<64x128xf32>
    %516 = arith.mulf %513, %515 : vector<64x128xf32>
    %517 = arith.addf %498, %516 : vector<64x128xf32>
    %c4_219 = arith.constant 4 : index
    %c0_220 = arith.constant 0 : index
    %518 = vector.load %arg6[%c4_219, %c0_220] : memref<10x128xf32, #tpu.memory_space<vmem>>, vector<1x128xf32>
    %519 = vector.broadcast %518 : vector<1x128xf32> to vector<64x128xf32>
    %520 = arith.addf %517, %519 : vector<64x128xf32>
    %cst_221 = arith.constant 0.000000e+00 : f32
    %cst_222 = arith.constant 6.000000e+00 : f32
    %521 = vector.broadcast %cst_221 : f32 to vector<64x128xf32>
    %522 = arith.maximumf %521, %520 : vector<64x128xf32>
    %523 = vector.broadcast %cst_222 : f32 to vector<64x128xf32>
    %524 = arith.minimumf %523, %522 : vector<64x128xf32>
    %c0_223 = arith.constant 0 : index
    %c0_224 = arith.constant 0 : index
    %525 = vector.load %arg7[%c0_223, %c0_224] : memref<16x64xbf16, #tpu.memory_space<vmem>>, vector<16x64xbf16>
    %526 = arith.truncf %524 : vector<64x128xf32> to vector<64x128xbf16>
    %cst_225 = arith.constant dense<0.000000e+00> : vector<16x128xf32>
    %527 = tpu.matmul %525, %526, %cst_225 {dimension_numbers = #tpu.dot_dimension_numbers<[1], [0], [0], [1], [0, 0, 1, 1], [], []>} : vector<16x64xbf16>, vector<64x128xbf16>, vector<16x128xf32> -> vector<16x128xf32>
    %528 = arith.truncf %527 : vector<16x128xf32> to vector<16x128xbf16>
    %c2_226 = arith.constant 2 : index
    %c0_227 = arith.constant 0 : index
    %c0_228 = arith.constant 0 : index
    %529 = vector.load %arg4[%c2_226, %c0_227, %c0_228] : memref<6x128x128xbf16, #tpu.memory_space<vmem>>, vector<1x128x128xbf16>
    %530 = vector.shape_cast %529 : vector<1x128x128xbf16> to vector<128x128xbf16>
    %cst_229 = arith.constant dense<0.000000e+00> : vector<16x128xf32>
    %531 = tpu.matmul %528, %530, %cst_229 {dimension_numbers = #tpu.dot_dimension_numbers<[1], [0], [0], [1], [0, 0, 1, 1], [], []>} : vector<16x128xbf16>, vector<128x128xbf16>, vector<16x128xf32> -> vector<16x128xf32>
    %c5_230 = arith.constant 5 : index
    %c0_231 = arith.constant 0 : index
    %532 = vector.load %arg6[%c5_230, %c0_231] : memref<10x128xf32, #tpu.memory_space<vmem>>, vector<1x128xf32>
    %533 = vector.broadcast %532 : vector<1x128xf32> to vector<16x128xf32>
    %534 = arith.addf %531, %533 : vector<16x128xf32>
    %535 = arith.truncf %534 : vector<16x128xf32> to vector<16x128xbf16>
    %c3_232 = arith.constant 3 : index
    %c0_233 = arith.constant 0 : index
    %c0_234 = arith.constant 0 : index
    %536 = vector.load %arg4[%c3_232, %c0_233, %c0_234] : memref<6x128x128xbf16, #tpu.memory_space<vmem>>, vector<1x128x128xbf16>
    %537 = vector.shape_cast %536 : vector<1x128x128xbf16> to vector<128x128xbf16>
    %cst_235 = arith.constant dense<0.000000e+00> : vector<16x128xf32>
    %538 = tpu.matmul %535, %537, %cst_235 {dimension_numbers = #tpu.dot_dimension_numbers<[1], [0], [0], [1], [0, 0, 1, 1], [], []>} : vector<16x128xbf16>, vector<128x128xbf16>, vector<16x128xf32> -> vector<16x128xf32>
    %c6_236 = arith.constant 6 : index
    %c0_237 = arith.constant 0 : index
    %539 = vector.load %arg6[%c6_236, %c0_237] : memref<10x128xf32, #tpu.memory_space<vmem>>, vector<1x128xf32>
    %540 = vector.broadcast %539 : vector<1x128xf32> to vector<16x128xf32>
    %541 = arith.addf %538, %540 : vector<16x128xf32>
    %cst_238 = arith.constant 0.000000e+00 : f32
    %cst_239 = arith.constant 6.000000e+00 : f32
    %542 = vector.broadcast %cst_238 : f32 to vector<16x128xf32>
    %543 = arith.maximumf %542, %541 : vector<16x128xf32>
    %544 = vector.broadcast %cst_239 : f32 to vector<16x128xf32>
    %545 = arith.minimumf %544, %543 : vector<16x128xf32>
    %c2_240 = arith.constant 2 : index
    %c0_241 = arith.constant 0 : index
    %c0_242 = arith.constant 0 : index
    %546 = vector.load %arg5[%c2_240, %c0_241, %c0_242] : memref<3x9x128xf32, #tpu.memory_space<vmem>>, vector<1x9x128xf32>
    %547 = vector.shape_cast %546 : vector<1x9x128xf32> to vector<9x128xf32>
    %548 = tpu.iota {dimensions = array<i32: 0>} : vector<16x1xi32>
    %c2_i32 = arith.constant 2 : i32
    %549 = vector.broadcast %c2_i32 : i32 to vector<16x1xi32>
    %550 = arith.shrsi %548, %549 : vector<16x1xi32>
    %c3_i32_243 = arith.constant 3 : i32
    %551 = vector.broadcast %c3_i32_243 : i32 to vector<16x1xi32>
    %552 = arith.andi %548, %551 : vector<16x1xi32>
    %cst_244 = arith.constant 0.000000e+00 : f32
    %553 = vector.broadcast %cst_244 : f32 to vector<16x128xf32>
    %c-1_i32_245 = arith.constant -1 : i32
    %554 = vector.broadcast %c-1_i32_245 : i32 to vector<16x1xi32>
    %555 = arith.addi %550, %554 : vector<16x1xi32>
    %c0_i32_246 = arith.constant 0 : i32
    %556 = vector.broadcast %c0_i32_246 : i32 to vector<16x1xi32>
    %557 = arith.cmpi sge, %555, %556 : vector<16x1xi32>
    %c-1_i32_247 = arith.constant -1 : i32
    %558 = vector.broadcast %c-1_i32_247 : i32 to vector<16x1xi32>
    %559 = arith.addi %550, %558 : vector<16x1xi32>
    %c4_i32 = arith.constant 4 : i32
    %560 = vector.broadcast %c4_i32 : i32 to vector<16x1xi32>
    %561 = arith.cmpi slt, %559, %560 : vector<16x1xi32>
    %562 = arith.andi %557, %561 : vector<16x1xi1>
    %c5_i32 = arith.constant 5 : i32
    %563 = tpu.dynamic_rotate %545 by %c5_i32 dim 0 : vector<16x128xf32>, i32 -> vector<16x128xf32>
    %c-1_i32_248 = arith.constant -1 : i32
    %564 = vector.broadcast %c-1_i32_248 : i32 to vector<16x1xi32>
    %565 = arith.addi %552, %564 : vector<16x1xi32>
    %c0_i32_249 = arith.constant 0 : i32
    %566 = vector.broadcast %c0_i32_249 : i32 to vector<16x1xi32>
    %567 = arith.cmpi sge, %565, %566 : vector<16x1xi32>
    %568 = arith.andi %562, %567 : vector<16x1xi1>
    %c-1_i32_250 = arith.constant -1 : i32
    %569 = vector.broadcast %c-1_i32_250 : i32 to vector<16x1xi32>
    %570 = arith.addi %552, %569 : vector<16x1xi32>
    %c4_i32_251 = arith.constant 4 : i32
    %571 = vector.broadcast %c4_i32_251 : i32 to vector<16x1xi32>
    %572 = arith.cmpi slt, %570, %571 : vector<16x1xi32>
    %573 = arith.andi %568, %572 : vector<16x1xi1>
    %cst_252 = arith.constant 0.000000e+00 : f32
    %574 = vector.shape_cast %573 : vector<16x1xi1> to vector<16x1xi1>
    %575 = vector.broadcast %574 : vector<16x1xi1> to vector<16x128xi1>
    %576 = vector.broadcast %cst_252 : f32 to vector<16x128xf32>
    %577 = arith.select %575, %563, %576 : vector<16x128xi1>, vector<16x128xf32>
    %578 = vector.extract_strided_slice %547 {offsets = [0, 0], sizes = [1, 128], strides = [1, 1]} : vector<9x128xf32> to vector<1x128xf32>
    %579 = vector.broadcast %578 : vector<1x128xf32> to vector<16x128xf32>
    %580 = arith.mulf %577, %579 : vector<16x128xf32>
    %581 = arith.addf %553, %580 : vector<16x128xf32>
    %c4_i32_253 = arith.constant 4 : i32
    %582 = tpu.dynamic_rotate %545 by %c4_i32_253 dim 0 : vector<16x128xf32>, i32 -> vector<16x128xf32>
    %c0_i32_254 = arith.constant 0 : i32
    %583 = vector.broadcast %c0_i32_254 : i32 to vector<16x1xi32>
    %584 = arith.addi %552, %583 : vector<16x1xi32>
    %c0_i32_255 = arith.constant 0 : i32
    %585 = vector.broadcast %c0_i32_255 : i32 to vector<16x1xi32>
    %586 = arith.cmpi sge, %584, %585 : vector<16x1xi32>
    %587 = arith.andi %562, %586 : vector<16x1xi1>
    %c0_i32_256 = arith.constant 0 : i32
    %588 = vector.broadcast %c0_i32_256 : i32 to vector<16x1xi32>
    %589 = arith.addi %552, %588 : vector<16x1xi32>
    %c4_i32_257 = arith.constant 4 : i32
    %590 = vector.broadcast %c4_i32_257 : i32 to vector<16x1xi32>
    %591 = arith.cmpi slt, %589, %590 : vector<16x1xi32>
    %592 = arith.andi %587, %591 : vector<16x1xi1>
    %cst_258 = arith.constant 0.000000e+00 : f32
    %593 = vector.shape_cast %592 : vector<16x1xi1> to vector<16x1xi1>
    %594 = vector.broadcast %593 : vector<16x1xi1> to vector<16x128xi1>
    %595 = vector.broadcast %cst_258 : f32 to vector<16x128xf32>
    %596 = arith.select %594, %582, %595 : vector<16x128xi1>, vector<16x128xf32>
    %597 = vector.extract_strided_slice %547 {offsets = [1, 0], sizes = [1, 128], strides = [1, 1]} : vector<9x128xf32> to vector<1x128xf32>
    %598 = vector.broadcast %597 : vector<1x128xf32> to vector<16x128xf32>
    %599 = arith.mulf %596, %598 : vector<16x128xf32>
    %600 = arith.addf %581, %599 : vector<16x128xf32>
    %c3_i32_259 = arith.constant 3 : i32
    %601 = tpu.dynamic_rotate %545 by %c3_i32_259 dim 0 : vector<16x128xf32>, i32 -> vector<16x128xf32>
    %c1_i32_260 = arith.constant 1 : i32
    %602 = vector.broadcast %c1_i32_260 : i32 to vector<16x1xi32>
    %603 = arith.addi %552, %602 : vector<16x1xi32>
    %c0_i32_261 = arith.constant 0 : i32
    %604 = vector.broadcast %c0_i32_261 : i32 to vector<16x1xi32>
    %605 = arith.cmpi sge, %603, %604 : vector<16x1xi32>
    %606 = arith.andi %562, %605 : vector<16x1xi1>
    %c1_i32_262 = arith.constant 1 : i32
    %607 = vector.broadcast %c1_i32_262 : i32 to vector<16x1xi32>
    %608 = arith.addi %552, %607 : vector<16x1xi32>
    %c4_i32_263 = arith.constant 4 : i32
    %609 = vector.broadcast %c4_i32_263 : i32 to vector<16x1xi32>
    %610 = arith.cmpi slt, %608, %609 : vector<16x1xi32>
    %611 = arith.andi %606, %610 : vector<16x1xi1>
    %cst_264 = arith.constant 0.000000e+00 : f32
    %612 = vector.shape_cast %611 : vector<16x1xi1> to vector<16x1xi1>
    %613 = vector.broadcast %612 : vector<16x1xi1> to vector<16x128xi1>
    %614 = vector.broadcast %cst_264 : f32 to vector<16x128xf32>
    %615 = arith.select %613, %601, %614 : vector<16x128xi1>, vector<16x128xf32>
    %616 = vector.extract_strided_slice %547 {offsets = [2, 0], sizes = [1, 128], strides = [1, 1]} : vector<9x128xf32> to vector<1x128xf32>
    %617 = vector.broadcast %616 : vector<1x128xf32> to vector<16x128xf32>
    %618 = arith.mulf %615, %617 : vector<16x128xf32>
    %619 = arith.addf %600, %618 : vector<16x128xf32>
    %c0_i32_265 = arith.constant 0 : i32
    %620 = vector.broadcast %c0_i32_265 : i32 to vector<16x1xi32>
    %621 = arith.addi %550, %620 : vector<16x1xi32>
    %c0_i32_266 = arith.constant 0 : i32
    %622 = vector.broadcast %c0_i32_266 : i32 to vector<16x1xi32>
    %623 = arith.cmpi sge, %621, %622 : vector<16x1xi32>
    %c0_i32_267 = arith.constant 0 : i32
    %624 = vector.broadcast %c0_i32_267 : i32 to vector<16x1xi32>
    %625 = arith.addi %550, %624 : vector<16x1xi32>
    %c4_i32_268 = arith.constant 4 : i32
    %626 = vector.broadcast %c4_i32_268 : i32 to vector<16x1xi32>
    %627 = arith.cmpi slt, %625, %626 : vector<16x1xi32>
    %628 = arith.andi %623, %627 : vector<16x1xi1>
    %c1_i32_269 = arith.constant 1 : i32
    %629 = tpu.dynamic_rotate %545 by %c1_i32_269 dim 0 : vector<16x128xf32>, i32 -> vector<16x128xf32>
    %c-1_i32_270 = arith.constant -1 : i32
    %630 = vector.broadcast %c-1_i32_270 : i32 to vector<16x1xi32>
    %631 = arith.addi %552, %630 : vector<16x1xi32>
    %c0_i32_271 = arith.constant 0 : i32
    %632 = vector.broadcast %c0_i32_271 : i32 to vector<16x1xi32>
    %633 = arith.cmpi sge, %631, %632 : vector<16x1xi32>
    %634 = arith.andi %628, %633 : vector<16x1xi1>
    %c-1_i32_272 = arith.constant -1 : i32
    %635 = vector.broadcast %c-1_i32_272 : i32 to vector<16x1xi32>
    %636 = arith.addi %552, %635 : vector<16x1xi32>
    %c4_i32_273 = arith.constant 4 : i32
    %637 = vector.broadcast %c4_i32_273 : i32 to vector<16x1xi32>
    %638 = arith.cmpi slt, %636, %637 : vector<16x1xi32>
    %639 = arith.andi %634, %638 : vector<16x1xi1>
    %cst_274 = arith.constant 0.000000e+00 : f32
    %640 = vector.shape_cast %639 : vector<16x1xi1> to vector<16x1xi1>
    %641 = vector.broadcast %640 : vector<16x1xi1> to vector<16x128xi1>
    %642 = vector.broadcast %cst_274 : f32 to vector<16x128xf32>
    %643 = arith.select %641, %629, %642 : vector<16x128xi1>, vector<16x128xf32>
    %644 = vector.extract_strided_slice %547 {offsets = [3, 0], sizes = [1, 128], strides = [1, 1]} : vector<9x128xf32> to vector<1x128xf32>
    %645 = vector.broadcast %644 : vector<1x128xf32> to vector<16x128xf32>
    %646 = arith.mulf %643, %645 : vector<16x128xf32>
    %647 = arith.addf %619, %646 : vector<16x128xf32>
    %c0_i32_275 = arith.constant 0 : i32
    %648 = vector.broadcast %c0_i32_275 : i32 to vector<16x1xi32>
    %649 = arith.addi %552, %648 : vector<16x1xi32>
    %c0_i32_276 = arith.constant 0 : i32
    %650 = vector.broadcast %c0_i32_276 : i32 to vector<16x1xi32>
    %651 = arith.cmpi sge, %649, %650 : vector<16x1xi32>
    %652 = arith.andi %628, %651 : vector<16x1xi1>
    %c0_i32_277 = arith.constant 0 : i32
    %653 = vector.broadcast %c0_i32_277 : i32 to vector<16x1xi32>
    %654 = arith.addi %552, %653 : vector<16x1xi32>
    %c4_i32_278 = arith.constant 4 : i32
    %655 = vector.broadcast %c4_i32_278 : i32 to vector<16x1xi32>
    %656 = arith.cmpi slt, %654, %655 : vector<16x1xi32>
    %657 = arith.andi %652, %656 : vector<16x1xi1>
    %cst_279 = arith.constant 0.000000e+00 : f32
    %658 = vector.shape_cast %657 : vector<16x1xi1> to vector<16x1xi1>
    %659 = vector.broadcast %658 : vector<16x1xi1> to vector<16x128xi1>
    %660 = vector.broadcast %cst_279 : f32 to vector<16x128xf32>
    %661 = arith.select %659, %545, %660 : vector<16x128xi1>, vector<16x128xf32>
    %662 = vector.extract_strided_slice %547 {offsets = [4, 0], sizes = [1, 128], strides = [1, 1]} : vector<9x128xf32> to vector<1x128xf32>
    %663 = vector.broadcast %662 : vector<1x128xf32> to vector<16x128xf32>
    %664 = arith.mulf %661, %663 : vector<16x128xf32>
    %665 = arith.addf %647, %664 : vector<16x128xf32>
    %c15_i32 = arith.constant 15 : i32
    %666 = tpu.dynamic_rotate %545 by %c15_i32 dim 0 : vector<16x128xf32>, i32 -> vector<16x128xf32>
    %c1_i32_280 = arith.constant 1 : i32
    %667 = vector.broadcast %c1_i32_280 : i32 to vector<16x1xi32>
    %668 = arith.addi %552, %667 : vector<16x1xi32>
    %c0_i32_281 = arith.constant 0 : i32
    %669 = vector.broadcast %c0_i32_281 : i32 to vector<16x1xi32>
    %670 = arith.cmpi sge, %668, %669 : vector<16x1xi32>
    %671 = arith.andi %628, %670 : vector<16x1xi1>
    %c1_i32_282 = arith.constant 1 : i32
    %672 = vector.broadcast %c1_i32_282 : i32 to vector<16x1xi32>
    %673 = arith.addi %552, %672 : vector<16x1xi32>
    %c4_i32_283 = arith.constant 4 : i32
    %674 = vector.broadcast %c4_i32_283 : i32 to vector<16x1xi32>
    %675 = arith.cmpi slt, %673, %674 : vector<16x1xi32>
    %676 = arith.andi %671, %675 : vector<16x1xi1>
    %cst_284 = arith.constant 0.000000e+00 : f32
    %677 = vector.shape_cast %676 : vector<16x1xi1> to vector<16x1xi1>
    %678 = vector.broadcast %677 : vector<16x1xi1> to vector<16x128xi1>
    %679 = vector.broadcast %cst_284 : f32 to vector<16x128xf32>
    %680 = arith.select %678, %666, %679 : vector<16x128xi1>, vector<16x128xf32>
    %681 = vector.extract_strided_slice %547 {offsets = [5, 0], sizes = [1, 128], strides = [1, 1]} : vector<9x128xf32> to vector<1x128xf32>
    %682 = vector.broadcast %681 : vector<1x128xf32> to vector<16x128xf32>
    %683 = arith.mulf %680, %682 : vector<16x128xf32>
    %684 = arith.addf %665, %683 : vector<16x128xf32>
    %c1_i32_285 = arith.constant 1 : i32
    %685 = vector.broadcast %c1_i32_285 : i32 to vector<16x1xi32>
    %686 = arith.addi %550, %685 : vector<16x1xi32>
    %c0_i32_286 = arith.constant 0 : i32
    %687 = vector.broadcast %c0_i32_286 : i32 to vector<16x1xi32>
    %688 = arith.cmpi sge, %686, %687 : vector<16x1xi32>
    %c1_i32_287 = arith.constant 1 : i32
    %689 = vector.broadcast %c1_i32_287 : i32 to vector<16x1xi32>
    %690 = arith.addi %550, %689 : vector<16x1xi32>
    %c4_i32_288 = arith.constant 4 : i32
    %691 = vector.broadcast %c4_i32_288 : i32 to vector<16x1xi32>
    %692 = arith.cmpi slt, %690, %691 : vector<16x1xi32>
    %693 = arith.andi %688, %692 : vector<16x1xi1>
    %c13_i32 = arith.constant 13 : i32
    %694 = tpu.dynamic_rotate %545 by %c13_i32 dim 0 : vector<16x128xf32>, i32 -> vector<16x128xf32>
    %c-1_i32_289 = arith.constant -1 : i32
    %695 = vector.broadcast %c-1_i32_289 : i32 to vector<16x1xi32>
    %696 = arith.addi %552, %695 : vector<16x1xi32>
    %c0_i32_290 = arith.constant 0 : i32
    %697 = vector.broadcast %c0_i32_290 : i32 to vector<16x1xi32>
    %698 = arith.cmpi sge, %696, %697 : vector<16x1xi32>
    %699 = arith.andi %693, %698 : vector<16x1xi1>
    %c-1_i32_291 = arith.constant -1 : i32
    %700 = vector.broadcast %c-1_i32_291 : i32 to vector<16x1xi32>
    %701 = arith.addi %552, %700 : vector<16x1xi32>
    %c4_i32_292 = arith.constant 4 : i32
    %702 = vector.broadcast %c4_i32_292 : i32 to vector<16x1xi32>
    %703 = arith.cmpi slt, %701, %702 : vector<16x1xi32>
    %704 = arith.andi %699, %703 : vector<16x1xi1>
    %cst_293 = arith.constant 0.000000e+00 : f32
    %705 = vector.shape_cast %704 : vector<16x1xi1> to vector<16x1xi1>
    %706 = vector.broadcast %705 : vector<16x1xi1> to vector<16x128xi1>
    %707 = vector.broadcast %cst_293 : f32 to vector<16x128xf32>
    %708 = arith.select %706, %694, %707 : vector<16x128xi1>, vector<16x128xf32>
    %709 = vector.extract_strided_slice %547 {offsets = [6, 0], sizes = [1, 128], strides = [1, 1]} : vector<9x128xf32> to vector<1x128xf32>
    %710 = vector.broadcast %709 : vector<1x128xf32> to vector<16x128xf32>
    %711 = arith.mulf %708, %710 : vector<16x128xf32>
    %712 = arith.addf %684, %711 : vector<16x128xf32>
    %c12_i32 = arith.constant 12 : i32
    %713 = tpu.dynamic_rotate %545 by %c12_i32 dim 0 : vector<16x128xf32>, i32 -> vector<16x128xf32>
    %c0_i32_294 = arith.constant 0 : i32
    %714 = vector.broadcast %c0_i32_294 : i32 to vector<16x1xi32>
    %715 = arith.addi %552, %714 : vector<16x1xi32>
    %c0_i32_295 = arith.constant 0 : i32
    %716 = vector.broadcast %c0_i32_295 : i32 to vector<16x1xi32>
    %717 = arith.cmpi sge, %715, %716 : vector<16x1xi32>
    %718 = arith.andi %693, %717 : vector<16x1xi1>
    %c0_i32_296 = arith.constant 0 : i32
    %719 = vector.broadcast %c0_i32_296 : i32 to vector<16x1xi32>
    %720 = arith.addi %552, %719 : vector<16x1xi32>
    %c4_i32_297 = arith.constant 4 : i32
    %721 = vector.broadcast %c4_i32_297 : i32 to vector<16x1xi32>
    %722 = arith.cmpi slt, %720, %721 : vector<16x1xi32>
    %723 = arith.andi %718, %722 : vector<16x1xi1>
    %cst_298 = arith.constant 0.000000e+00 : f32
    %724 = vector.shape_cast %723 : vector<16x1xi1> to vector<16x1xi1>
    %725 = vector.broadcast %724 : vector<16x1xi1> to vector<16x128xi1>
    %726 = vector.broadcast %cst_298 : f32 to vector<16x128xf32>
    %727 = arith.select %725, %713, %726 : vector<16x128xi1>, vector<16x128xf32>
    %728 = vector.extract_strided_slice %547 {offsets = [7, 0], sizes = [1, 128], strides = [1, 1]} : vector<9x128xf32> to vector<1x128xf32>
    %729 = vector.broadcast %728 : vector<1x128xf32> to vector<16x128xf32>
    %730 = arith.mulf %727, %729 : vector<16x128xf32>
    %731 = arith.addf %712, %730 : vector<16x128xf32>
    %c11_i32 = arith.constant 11 : i32
    %732 = tpu.dynamic_rotate %545 by %c11_i32 dim 0 : vector<16x128xf32>, i32 -> vector<16x128xf32>
    %c1_i32_299 = arith.constant 1 : i32
    %733 = vector.broadcast %c1_i32_299 : i32 to vector<16x1xi32>
    %734 = arith.addi %552, %733 : vector<16x1xi32>
    %c0_i32_300 = arith.constant 0 : i32
    %735 = vector.broadcast %c0_i32_300 : i32 to vector<16x1xi32>
    %736 = arith.cmpi sge, %734, %735 : vector<16x1xi32>
    %737 = arith.andi %693, %736 : vector<16x1xi1>
    %c1_i32_301 = arith.constant 1 : i32
    %738 = vector.broadcast %c1_i32_301 : i32 to vector<16x1xi32>
    %739 = arith.addi %552, %738 : vector<16x1xi32>
    %c4_i32_302 = arith.constant 4 : i32
    %740 = vector.broadcast %c4_i32_302 : i32 to vector<16x1xi32>
    %741 = arith.cmpi slt, %739, %740 : vector<16x1xi32>
    %742 = arith.andi %737, %741 : vector<16x1xi1>
    %cst_303 = arith.constant 0.000000e+00 : f32
    %743 = vector.shape_cast %742 : vector<16x1xi1> to vector<16x1xi1>
    %744 = vector.broadcast %743 : vector<16x1xi1> to vector<16x128xi1>
    %745 = vector.broadcast %cst_303 : f32 to vector<16x128xf32>
    %746 = arith.select %744, %732, %745 : vector<16x128xi1>, vector<16x128xf32>
    %747 = vector.extract_strided_slice %547 {offsets = [8, 0], sizes = [1, 128], strides = [1, 1]} : vector<9x128xf32> to vector<1x128xf32>
    %748 = vector.broadcast %747 : vector<1x128xf32> to vector<16x128xf32>
    %749 = arith.mulf %746, %748 : vector<16x128xf32>
    %750 = arith.addf %731, %749 : vector<16x128xf32>
    %c7_304 = arith.constant 7 : index
    %c0_305 = arith.constant 0 : index
    %751 = vector.load %arg6[%c7_304, %c0_305] : memref<10x128xf32, #tpu.memory_space<vmem>>, vector<1x128xf32>
    %752 = vector.broadcast %751 : vector<1x128xf32> to vector<16x128xf32>
    %753 = arith.addf %750, %752 : vector<16x128xf32>
    %cst_306 = arith.constant 0.000000e+00 : f32
    %cst_307 = arith.constant 6.000000e+00 : f32
    %754 = vector.broadcast %cst_306 : f32 to vector<16x128xf32>
    %755 = arith.maximumf %754, %753 : vector<16x128xf32>
    %756 = vector.broadcast %cst_307 : f32 to vector<16x128xf32>
    %757 = arith.minimumf %756, %755 : vector<16x128xf32>
    %758 = arith.truncf %757 : vector<16x128xf32> to vector<16x128xbf16>
    %c4_308 = arith.constant 4 : index
    %c0_309 = arith.constant 0 : index
    %c0_310 = arith.constant 0 : index
    %759 = vector.load %arg4[%c4_308, %c0_309, %c0_310] : memref<6x128x128xbf16, #tpu.memory_space<vmem>>, vector<1x128x128xbf16>
    %760 = vector.shape_cast %759 : vector<1x128x128xbf16> to vector<128x128xbf16>
    %cst_311 = arith.constant dense<0.000000e+00> : vector<16x128xf32>
    %761 = tpu.matmul %758, %760, %cst_311 {dimension_numbers = #tpu.dot_dimension_numbers<[1], [0], [0], [1], [0, 0, 1, 1], [], []>} : vector<16x128xbf16>, vector<128x128xbf16>, vector<16x128xf32> -> vector<16x128xf32>
    %c8_312 = arith.constant 8 : index
    %c0_313 = arith.constant 0 : index
    %762 = vector.load %arg6[%c8_312, %c0_313] : memref<10x128xf32, #tpu.memory_space<vmem>>, vector<1x128xf32>
    %763 = vector.broadcast %762 : vector<1x128xf32> to vector<16x128xf32>
    %764 = arith.addf %761, %763 : vector<16x128xf32>
    %765 = arith.addf %764, %534 : vector<16x128xf32>
    %766 = arith.truncf %765 : vector<16x128xf32> to vector<16x128xbf16>
    %c5_314 = arith.constant 5 : index
    %c0_315 = arith.constant 0 : index
    %c0_316 = arith.constant 0 : index
    %767 = vector.load %arg4[%c5_314, %c0_315, %c0_316] : memref<6x128x128xbf16, #tpu.memory_space<vmem>>, vector<1x128x128xbf16>
    %768 = vector.shape_cast %767 : vector<1x128x128xbf16> to vector<128x128xbf16>
    %cst_317 = arith.constant dense<0.000000e+00> : vector<16x128xf32>
    %769 = tpu.matmul %766, %768, %cst_317 {dimension_numbers = #tpu.dot_dimension_numbers<[1], [0], [0], [1], [0, 0, 1, 1], [], []>} : vector<16x128xbf16>, vector<128x128xbf16>, vector<16x128xf32> -> vector<16x128xf32>
    %c9 = arith.constant 9 : index
    %c0_318 = arith.constant 0 : index
    %770 = vector.load %arg6[%c9, %c0_318] : memref<10x128xf32, #tpu.memory_space<vmem>>, vector<1x128xf32>
    %771 = vector.broadcast %770 : vector<1x128xf32> to vector<16x128xf32>
    %772 = arith.addf %769, %771 : vector<16x128xf32>
    %cst_319 = arith.constant 0.000000e+00 : f32
    %cst_320 = arith.constant 6.000000e+00 : f32
    %773 = vector.broadcast %cst_319 : f32 to vector<16x128xf32>
    %774 = arith.maximumf %773, %772 : vector<16x128xf32>
    %775 = vector.broadcast %cst_320 : f32 to vector<16x128xf32>
    %776 = arith.minimumf %775, %774 : vector<16x128xf32>
    %c0_321 = arith.constant 0 : index
    %c0_322 = arith.constant 0 : index
    %c0_323 = arith.constant 0 : index
    %777 = vector.load %arg8[%c0_321, %c0_322, %c0_323] : memref<1x16x128xf32, #tpu.memory_space<vmem>>, vector<1x16x128xf32>
    %778 = vector.shape_cast %777 : vector<1x16x128xf32> to vector<16x128xf32>
    %779 = vector.shape_cast %776 : vector<16x128xf32> to vector<1x16x128xf32>
    tpu.vector_store %arg8[%c0_321, %c0_322, %c0_323], %779 {strides = array<i32>} : memref<1x16x128xf32, #tpu.memory_space<vmem>>, vector<1x16x128xf32>,
    return
  }
  func.func @transform_0(%arg0: i32) -> (i32, i32, i32) {
    %c0_i32 = arith.constant 0 : i32
    %c0_i32_0 = arith.constant 0 : i32
    %c0_i32_1 = arith.constant 0 : i32
    return %arg0, %c0_i32, %c0_i32_0 : i32, i32, i32
  }
  func.func @transform_1(%arg0: i32) -> (i32, i32, i32) {
    %c0_i32 = arith.constant 0 : i32
    %c0_i32_0 = arith.constant 0 : i32
    %c0_i32_1 = arith.constant 0 : i32
    %c0_i32_2 = arith.constant 0 : i32
    return %c0_i32, %c0_i32_0, %c0_i32_1 : i32, i32, i32
  }
  func.func @transform_2(%arg0: i32) -> (i32, i32, i32) {
    %c0_i32 = arith.constant 0 : i32
    %c0_i32_0 = arith.constant 0 : i32
    %c0_i32_1 = arith.constant 0 : i32
    %c0_i32_2 = arith.constant 0 : i32
    return %c0_i32, %c0_i32_0, %c0_i32_1 : i32, i32, i32
  }
  func.func @transform_3(%arg0: i32) -> (i32, i32, i32) {
    %c0_i32 = arith.constant 0 : i32
    %c0_i32_0 = arith.constant 0 : i32
    %c0_i32_1 = arith.constant 0 : i32
    %c0_i32_2 = arith.constant 0 : i32
    return %c0_i32, %c0_i32_0, %c0_i32_1 : i32, i32, i32
  }
  func.func @transform_4(%arg0: i32) -> (i32, i32, i32) {
    %c0_i32 = arith.constant 0 : i32
    %c0_i32_0 = arith.constant 0 : i32
    %c0_i32_1 = arith.constant 0 : i32
    %c0_i32_2 = arith.constant 0 : i32
    return %c0_i32, %c0_i32_0, %c0_i32_1 : i32, i32, i32
  }
  func.func @transform_5(%arg0: i32) -> (i32, i32) {
    %c0_i32 = arith.constant 0 : i32
    %c0_i32_0 = arith.constant 0 : i32
    %c0_i32_1 = arith.constant 0 : i32
    return %c0_i32, %c0_i32_0 : i32, i32
  }
  func.func @transform_6(%arg0: i32) -> (i32, i32) {
    %c0_i32 = arith.constant 0 : i32
    %c0_i32_0 = arith.constant 0 : i32
    %c0_i32_1 = arith.constant 0 : i32
    return %c0_i32, %c0_i32_0 : i32, i32
  }
  func.func @transform_7(%arg0: i32) -> (i32, i32, i32) {
    %c0_i32 = arith.constant 0 : i32
    %c0_i32_0 = arith.constant 0 : i32
    %c0_i32_1 = arith.constant 0 : i32
    return %arg0, %c0_i32, %c0_i32_0 : i32, i32, i32
  }
}

</mosaic_0001>

<bundles_post_ra>
// kernel: resnet_backbone_forward.1
= control target key start
LH: loop header
LB: loop body
LE: loop exit
PB: predicated region body
PF: predicated region fallthrough
CT: control target
= control target key end

     0   :  { %s6656_s24 = smov 0   ;;  %s9793_s0 = inlined_call_operand.vmem [shape: bf16[2,256,128], index: 0, kind: input, shape index: {}]   ;;  %s9794_s1 = inlined_call_operand.vmem [shape: bf16[9,64,256], index: 1, kind: input, shape index: {}]   ;;  %s9795_s2 = inlined_call_operand.vmem [shape: bf16[9,128,128], index: 2, kind: input, shape index: {}]   ;;  %s9796_s3 = inlined_call_operand.vmem [shape: bf16[6,128,128], index: 3, kind: input, shape index: {}]   ;;  %s9797_s4 = inlined_call_operand.vmem [shape: f32[3,9,128], index: 4, kind: input, shape index: {}]   ;;  %s9798_s5 = inlined_call_operand.vmem [shape: f32[10,128], index: 5, kind: input, shape index: {}]   ;;  %s9799_s6 = inlined_call_operand.vmem [shape: bf16[16,64], index: 6, kind: input, shape index: {}]   ;;  %s9800_s7 = inlined_call_operand.vmem [shape: f32[2,16,128], index: 7, kind: output, shape index: {}]  }
   0x1 LB: > { %s4934_s25 = sadd.s32 4294967295, %s6612_s24   ;;  %p4938_p0 = scmp.ge.s32.totalorder %s6612_s24, 1  ;;  %s6612_s24 = sphi %s6656_s24, %s17_s24  }
   0x2   : > { %p237_p1 = scmp.lt.s32.totalorder %s6612_s24, 3 }
   0x4   : > { %p238_p2 = pnand %p4938_p0, %p237_p1 }
   0x6   : > { %241 = sbr.rel (%p238_p2) target bundleno = 2545 (0x9f1), region = 48 }
   0xb   : > { %p269_p3 = scmp.lt.s32.totalorder %s4934_s25, 1  ;;  %v6363_v0 = vld [vmem:[%s9794_s1 + $0x4] ss:$8 sps:$4 sm:$0xff]   ;;  %v6385_v18 = vld [vmem:[%s9795_s2 + $0x78] sm:$0xff]   ;;  %v6361_v19 = vld [vmem:[%s9794_s1] ss:$8 sps:$4 sm:$0xff]  }
   0xc   : > { %v6366_v1 = vld [vmem:[%s9794_s1 + $0x44] ss:$8 sps:$4 sm:$0xff]   ;;  %488 = vmatprep.mubr.bf16.mxu0 %v6363_v0  ;;  %v6364_v20 = vld [vmem:[%s9794_s1 + $0x40] ss:$8 sps:$4 sm:$0xff]   ;;  %v6386_v21 = vld [vmem:[%s9795_s2 + $0x38] sm:$0xff]  }
   0xd   : > { %s10639_s25 = smov (!%p269_p3, %s4934_s25), 1  ;;  %622 = vmatprep.mubr.bf16.mxu1 %v6366_v1  ;;  %v6367_v22 = vld [vmem:[%s9794_s1 + $0x14] ss:$8 sps:$4 sm:$0xff]   ;;  %v6389_v26 = vld [vmem:[%s9795_s2 + $0x68] sm:$0xff]   ;;  %v6371_v28 = vld [vmem:[%s9794_s1 + $0x10] ss:$8 sps:$4 sm:$0xff]  }
   0xe   : > { %s5444_s30 = sshll.u32 %s10639_s25, 7  ;;  %v6369_v23 = vld [vmem:[%s9794_s1 + $0x54] ss:$8 sps:$4 sm:$0xff]   ;;  %v6390_v27 = vld [vmem:[%s9795_s2 + $0x28] sm:$0xff]   ;;  %v6372_v29 = vld [vmem:[%s9794_s1 + $0x50] ss:$8 sps:$4 sm:$0xff]  }
   0xf   : > { %s6676_s10 = scalar_lea.vmem %s9793_s0, %s5444_s30  ;;  %v6387_v24 = vld [vmem:[%s9795_s2 + $0x70] sm:$0xff]   ;;  %v6373_v30 = vld [vmem:[%s9794_s1 + $0x24] ss:$8 sps:$4 sm:$0xff]   ;;  %v6377_v34 = vld [vmem:[%s9794_s1 + $0x20] ss:$8 sps:$4 sm:$0xff]   ;;  %s5445_s9 = sshll.u32 %s10639_s25, 4 }
  0x10   : > { %v6679_v2 = vld [vmem:[%s6676_s10 + $0x78] sm:$0xff]   ;;  %v6687_v4 = vld [vmem:[%s6676_s10 + $0x70] sm:$0xff]   ;;  %v6697_v6 = vld [vmem:[%s6676_s10 + $0x68] sm:$0xff]   ;;  %s278_s13 = scalar_lea.vmem %s9800_s7, %s5445_s9 }
  0x11   : > { %v6682_v3 = vld [vmem:[%s6676_s10 + $0x38] sm:$0xff]   ;;  %5446 = vmatprep.subr.bf16.mxu0 %v6679_v2  ;;  %5486 = vmatprep.subr.bf16.mxu1 %v6679_v2  ;;  %v6692_v5 = vld [vmem:[%s6676_s10 + $0x30] sm:$0xff]   ;;  %v6702_v7 = vld [vmem:[%s6676_s10 + $0x28] sm:$0xff]  }
  0x12   : > { %5447 = vmatpush3.bf16.msra.mxu0 %v6682_v3  ;;  %5487 = vmatpush3.bf16.msra.mxu1 %v6682_v3  ;;  %v6707_v8 = vld [vmem:[%s6676_s10 + $0x60] sm:$0xff]   ;;  %v6717_v10 = vld [vmem:[%s6676_s10 + $0x58] sm:$0xff]   ;;  %v6727_v12 = vld [vmem:[%s6676_s10 + $0x50] sm:$0xff]  }
  0x13   : > { %5448 = vmatprep.subr.bf16.mxu0 %v6687_v4  ;;  %5488 = vmatprep.subr.bf16.mxu1 %v6687_v4  ;;  %v6712_v9 = vld [vmem:[%s6676_s10 + $0x20] sm:$0xff]   ;;  %v6722_v11 = vld [vmem:[%s6676_s10 + $0x18] sm:$0xff]   ;;  %v6732_v13 = vld [vmem:[%s6676_s10 + $0x10] sm:$0xff]  }
  0x14   : > { %v6737_v14 = vld [vmem:[%s6676_s10 + $0x48] sm:$0xff]   ;;  %v6747_v16 = vld [vmem:[%s6676_s10 + $0x40] sm:$0xff]   ;;  %v6388_v25 = vld [vmem:[%s9795_s2 + $0x30] sm:$0xff]  }
  0x15   : > { %v6742_v15 = vld [vmem:[%s6676_s10 + $0x8] sm:$0xff]   ;;  %v6750_v17 = vld [vmem:[%s6676_s10] sm:$0xff]   ;;  %v6379_v36 = vld [vmem:[%s9794_s1 + $0x34] ss:$8 sps:$4 sm:$0xff]  }
  0x16   : > { %5449 = vmatpush3.bf16.msra.mxu0 %v6692_v5  ;;  %5489 = vmatpush3.bf16.msra.mxu1 %v6692_v5  ;;  %v6375_v31 = vld [vmem:[%s9794_s1 + $0x64] ss:$8 sps:$4 sm:$0xff]   ;;  %v6378_v35 = vld [vmem:[%s9794_s1 + $0x60] ss:$8 sps:$4 sm:$0xff]   ;;  %v6381_v37 = vld [vmem:[%s9794_s1 + $0x74] ss:$8 sps:$4 sm:$0xff]  }
  0x17   : > { %5450 = vmatprep.subr.bf16.mxu0 %v6697_v6  ;;  %5490 = vmatprep.subr.bf16.mxu1 %v6697_v6  ;;  %v6391_v32 = vld [vmem:[%s9795_s2 + $0x60] sm:$0xff]   ;;  %v6383_v38 = vld [vmem:[%s9794_s1 + $0x30] ss:$8 sps:$4 sm:$0xff]   ;;  %v6397_v44 = vld [vmem:[%s9795_s2 + $0x48] sm:$0xff]  }
  0x18   : > { %v6392_v33 = vld [vmem:[%s9795_s2 + $0x20] sm:$0xff]   ;;  %v6384_v39 = vld [vmem:[%s9794_s1 + $0x70] ss:$8 sps:$4 sm:$0xff]   ;;  %v6398_v45 = vld [vmem:[%s9795_s2 + $0x8] sm:$0xff]  }
  0x19   : > { %v6393_v40 = vld [vmem:[%s9795_s2 + $0x58] sm:$0xff]   ;;  %v6395_v42 = vld [vmem:[%s9795_s2 + $0x50] sm:$0xff]   ;;  %v6399_v46 = vld [vmem:[%s9795_s2 + $0x40] sm:$0xff]  }
  0x1a   : > { %5451 = vmatpush3.bf16.msra.mxu0 %v6702_v7  ;;  %5491 = vmatpush3.bf16.msra.mxu1 %v6702_v7  ;;  %v6394_v41 = vld [vmem:[%s9795_s2 + $0x18] sm:$0xff]   ;;  %v6396_v43 = vld [vmem:[%s9795_s2 + $0x10] sm:$0xff]   ;;  %v6400_v47 = vld [vmem:[%s9795_s2] sm:$0xff]  }
  0x1b   : > { %5452 = vmatprep.subr.bf16.mxu0 %v6707_v8  ;;  %5492 = vmatprep.subr.bf16.mxu1 %v6707_v8 }
  0x1e   : > { %5453 = vmatpush3.bf16.msra.mxu0 %v6712_v9  ;;  %5493 = vmatpush3.bf16.msra.mxu1 %v6712_v9 }
  0x1f   : > { %5454 = vmatprep.subr.bf16.mxu0 %v6717_v10  ;;  %5494 = vmatprep.subr.bf16.mxu1 %v6717_v10 }
  0x22   : > { %5455 = vmatpush3.bf16.msra.mxu0 %v6722_v11  ;;  %5495 = vmatpush3.bf16.msra.mxu1 %v6722_v11 }
  0x23   : > { %5456 = vmatprep.subr.bf16.mxu0 %v6727_v12  ;;  %5496 = vmatprep.subr.bf16.mxu1 %v6727_v12 }
  0x26   : > { %5457 = vmatpush3.bf16.msra.mxu0 %v6732_v13  ;;  %5497 = vmatpush3.bf16.msra.mxu1 %v6732_v13 }
  0x27   : > { %5458 = vmatprep.subr.bf16.mxu0 %v6737_v14  ;;  %5498 = vmatprep.subr.bf16.mxu1 %v6737_v14 }
  0x2a   : > { %5459 = vmatpush3.bf16.msra.mxu0 %v6742_v15  ;;  %5499 = vmatpush3.bf16.msra.mxu1 %v6742_v15 }
  0x2b   : > { %5460 = vmatprep.subr.bf16.mxu0 %v6747_v16  ;;  %5500 = vmatprep.subr.bf16.mxu1 %v6747_v16 }
  0x2e   : > { %5461 = vmatpush3.bf16.msra.mxu0 %v6750_v17  ;;  %5501 = vmatpush3.bf16.msra.mxu1 %v6750_v17 }
  0x2f   : > { %5979 = vmatprep.subr.bf16.mxu0 %v6385_v18  ;;  %6003 = vmatprep.subr.bf16.mxu1 %v6386_v21 }
  0x31   : > { %489 = vmatmul.mubr.bf16.vlgmr.msra.gmra.mxu0 %v6361_v19  ;;  %623 = vmatmul.mubr.bf16.vlgmr.msra.gmra.mxu1 %v6364_v20 }
  0x32   : > { %496 = vmatprep.mubr.bf16.mxu0 %v6367_v22  ;;  %630 = vmatprep.mubr.bf16.mxu1 %v6369_v23 }
  0x33   : > { %5980 = vmatpush3.bf16.msra.mxu0 %v6385_v18  ;;  %6004 = vmatpush3.bf16.msra.mxu1 %v6386_v21 }
  0x34   : > { %5981 = vmatprep.subr.bf16.mxu0 %v6387_v24  ;;  %6005 = vmatprep.subr.bf16.mxu1 %v6388_v25 }
  0x37   : > { %5982 = vmatpush3.bf16.msra.mxu0 %v6387_v24  ;;  %6006 = vmatpush3.bf16.msra.mxu1 %v6388_v25 }
  0x38   : > { %5983 = vmatprep.subr.bf16.mxu0 %v6389_v26  ;;  %6007 = vmatprep.subr.bf16.mxu1 %v6390_v27 }
  0x39   : > { %497 = vmatmul.mubr.bf16.gmra.mxu0 %v6371_v28  ;;  %631 = vmatmul.mubr.bf16.gmra.mxu1 %v6372_v29 }
  0x3a   : > { %504 = vmatprep.mubr.bf16.mxu0 %v6373_v30  ;;  %638 = vmatprep.mubr.bf16.mxu1 %v6375_v31 }
  0x3b   : > { %5984 = vmatpush3.bf16.msra.mxu0 %v6389_v26  ;;  %6008 = vmatpush3.bf16.msra.mxu1 %v6390_v27 }
  0x3c   : > { %5985 = vmatprep.subr.bf16.mxu0 %v6391_v32  ;;  %6009 = vmatprep.subr.bf16.mxu1 %v6392_v33 }
  0x3f   : > { %5986 = vmatpush3.bf16.msra.mxu0 %v6391_v32  ;;  %6010 = vmatpush3.bf16.msra.mxu1 %v6392_v33 }
  0x40   : > { %5987 = vmatprep.subr.bf16.mxu0 %v6393_v40  ;;  %6011 = vmatprep.subr.bf16.mxu1 %v6394_v41 }
  0x41   : > { %505 = vmatmul.mubr.bf16.gmra.mxu0 %v6377_v34  ;;  %639 = vmatmul.mubr.bf16.gmra.mxu1 %v6378_v35 }
  0x42   : > { %512 = vmatprep.mubr.bf16.mxu0 %v6379_v36  ;;  %646 = vmatprep.mubr.bf16.mxu1 %v6381_v37 }
  0x43   : > { %5988 = vmatpush3.bf16.msra.mxu0 %v6393_v40  ;;  %6012 = vmatpush3.bf16.msra.mxu1 %v6394_v41 }
  0x44   : > { %5989 = vmatprep.subr.bf16.mxu0 %v6395_v42  ;;  %6013 = vmatprep.subr.bf16.mxu1 %v6396_v43 }
  0x47   : > { %5990 = vmatpush3.bf16.msra.mxu0 %v6395_v42  ;;  %6014 = vmatpush3.bf16.msra.mxu1 %v6396_v43 }
  0x48   : > { %5991 = vmatprep.subr.bf16.mxu0 %v6397_v44  ;;  %6015 = vmatprep.subr.bf16.mxu1 %v6398_v45 }
  0x49   : > { %513 = vmatmul.mubr.bf16.gmra.mxu0 %v6383_v38  ;;  %647 = vmatmul.mubr.bf16.gmra.mxu1 %v6384_v39 }
  0x4b   : > { %5992 = vmatpush3.bf16.msra.mxu0 %v6397_v44  ;;  %6016 = vmatpush3.bf16.msra.mxu1 %v6398_v45 }
  0x4c   : > { %5993 = vmatprep.subr.bf16.mxu0 %v6399_v46  ;;  %6017 = vmatprep.subr.bf16.mxu1 %v6400_v47 }
  0x4f   : > { %5994 = vmatpush3.bf16.msra.mxu0 %v6399_v46  ;;  %6018 = vmatpush3.bf16.msra.mxu1 %v6400_v47 }
  0x50   : > { %5550 = vmatprep.subr.bf16.mxu0 %v6679_v2 }
  0xf1   : > { %v5462_v48 = vpop.f32.mrf.mxu0  ;;  %v5502_v49 = vpop.f32.mrf.mxu1 }
  0xf3   : > { %v5463_v50 = vpop.f32.mrf.mxu0  ;;  %v5503_v51 = vpop.f32.mrf.mxu1 }
  0xf4   : > { %v5464_v54 = vadd.f32 %v5463_v50, %v5462_v48  ;;  %v5504_v57 = vadd.f32 %v5503_v51, %v5502_v49 }
  0xf5   : > { %v5465_v52 = vpop.f32.mrf.mxu0  ;;  %v5505_v53 = vpop.f32.mrf.mxu1 }
  0xf7   : > { %v5466_v55 = vpop.f32.mrf.mxu0  ;;  %v5506_v56 = vpop.f32.mrf.mxu1 }
  0xf8   : > { %v5467_v58 = vadd.f32 %v5466_v55, %v5465_v52  ;;  %v5507_v59 = vadd.f32 %v5506_v56, %v5505_v53  ;;  %v6882_v52 = vld [vmem:[%s6676_s10 + $0x70] sm:$0xff]   ;;  %v6407_v55 = vld [vmem:[%s9794_s1 + $0xa4] ss:$8 sps:$4 sm:$0xff]  }
  0xf9   : > { %v5468_v60 = vpop.f32.mrf.mxu0  ;;  %v5508_v61 = vpop.f32.mrf.mxu1  ;;  %v6406_v53 = vld [vmem:[%s9794_s1 + $0x90] ss:$8 sps:$4 sm:$0xff]   ;;  %v6896_v56 = vld [vmem:[%s6676_s10 + $0x68] sm:$0xff]  }
  0xfa   : > { %v521_v62 = vpack.c.bf16 %v5467_v58, %v5464_v54  ;;  %v655_v63 = vpack.c.bf16 %v5507_v59, %v5504_v57  ;;  %v6889_v54 = vld [vmem:[%s6676_s10 + $0x30] sm:$0xff]   ;;  %v6900_v57 = vld [vmem:[%s6676_s10 + $0x28] sm:$0xff]   ;;  %v6904_v58 = vld [vmem:[%s6676_s10 + $0x60] sm:$0xff]  }
  0xfb   : > { %v5469_v0 = vpop.f32.mrf.mxu0  ;;  %v5509_v1 = vpop.f32.mrf.mxu1  ;;  %v6409_v59 = vld [vmem:[%s9794_s1 + $0xa0] ss:$8 sps:$4 sm:$0xff]  }
  0xfc   : > { %5995 = vmatprep.mubr.bf16.mxu0 %v655_v63  ;;  %6019 = vmatprep.mubr.bf16.mxu1 %v521_v62  ;;  %v5470_v19 = vadd.f32 %v5469_v0, %v5468_v60  ;;  %v5510_v22 = vadd.f32 %v5509_v1, %v5508_v61  ;;  %v6911_v60 = vld [vmem:[%s6676_s10 + $0x20] sm:$0xff]   ;;  %v6410_v61 = vld [vmem:[%s9794_s1 + $0xb4] ss:$8 sps:$4 sm:$0xff]   ;;  %v6412_v63 = vld [vmem:[%s9794_s1 + $0xb0] ss:$8 sps:$4 sm:$0xff]  }
  0xfd   : > { %v5471_v2 = vpop.f32.mrf.mxu0  ;;  %v5511_v18 = vpop.f32.mrf.mxu1  ;;  %v6918_v62 = vld [vmem:[%s6676_s10 + $0x58] sm:$0xff]   ;;  %v6415_v0 = vld [vmem:[%s9794_s1 + $0xc4] ss:$8 sps:$4 sm:$0xff]  }
  0xfe   : > { %v6470_v1 = vld [vmem:[%s9795_s2 + $0xb8] sm:$0xff]  }
  0xff   : > { %v5472_v20 = vpop.f32.mrf.mxu0  ;;  %v5512_v21 = vpop.f32.mrf.mxu1  ;;  %6027 = vmatprep.subr.bf16.mxu1 %v6470_v1 }
 0x100   : > { %v5473_v23 = vadd.f32 %v5472_v20, %v5471_v2  ;;  %v5513_v24 = vadd.f32 %v5512_v21, %v5511_v18  ;;  %v6969_v2 = vld [vmem:[%s6676_s10 + $0x50] sm:$0xff]   ;;  %v6427_v20 = vld [vmem:[%s9794_s1 + $0x104] ss:$8 sps:$4 sm:$0xff]  }
 0x101   : > { %v5474_v25 = vpop.f32.mrf.mxu0  ;;  %v5514_v26 = vpop.f32.mrf.mxu1  ;;  %v6424_v18 = vld [vmem:[%s9794_s1 + $0xf0] ss:$8 sps:$4 sm:$0xff]  }
 0x102   : > { %v522_v27 = vpack.c.bf16 %v5473_v23, %v5470_v19  ;;  %v656_v28 = vpack.c.bf16 %v5513_v24, %v5510_v22  ;;  %v6976_v19 = vld [vmem:[%s6676_s10 + $0x10] sm:$0xff]   ;;  %v6986_v22 = vld [vmem:[%s6676_s10 + $0x48] sm:$0xff]  }
 0x103   : > { %v5475_v29 = vpop.f32.mrf.mxu0  ;;  %v5515_v30 = vpop.f32.mrf.mxu1  ;;  %v6471_v21 = vld [vmem:[%s9795_s2 + $0xb0] sm:$0xff]   ;;  %v6990_v23 = vld [vmem:[%s6676_s10 + $0x8] sm:$0xff]  }
 0x104   : > { %5996 = vmatmul.mubr.bf16.vlgmr.msra.gmra.mxu0 %v656_v28  ;;  %6020 = vmatmul.mubr.bf16.vlgmr.msra.gmra.mxu1 %v522_v27  ;;  %v5476_v33 = vadd.f32 %v5475_v29, %v5474_v25  ;;  %v5516_v34 = vadd.f32 %v5515_v30, %v5514_v26  ;;  %v6475_v24 = vld [vmem:[%s9795_s2 + $0xa8] sm:$0xff]   ;;  %v6997_v25 = vld [vmem:[%s6676_s10 + $0x40] sm:$0xff]   ;;  %v6428_v28 = vld [vmem:[%s9794_s1 + $0x114] ss:$8 sps:$4 sm:$0xff]  }
 0x105   : > { %5551 = vmatpush3.bf16.msra.mxu0 %v6682_v3  ;;  %v5477_v31 = vpop.f32.mrf.mxu0  ;;  %v5517_v32 = vpop.f32.mrf.mxu1  ;;  %6028 = vmatpush3.bf16.msra.mxu1 %v6470_v1  ;;  %v6425_v26 = vld [vmem:[%s9794_s1 + $0x100] ss:$8 sps:$4 sm:$0xff]   ;;  %v6480_v30 = vld [vmem:[%s9795_s2 + $0x98] sm:$0xff]  }
 0x106   : > { %5552 = vmatprep.subr.bf16.mxu0 %v6687_v4  ;;  %6029 = vmatprep.subr.bf16.mxu1 %v6471_v21  ;;  %v7004_v27 = vld [vmem:[%s6676_s10] sm:$0xff]   ;;  %v6474_v1 = vld [vmem:[%s9794_s1 + $0x1f4] ss:$8 sps:$4 sm:$0xff]  }
 0x107   : > { %v5478_v35 = vpop.f32.mrf.mxu0  ;;  %v5518_v36 = vpop.f32.mrf.mxu1  ;;  %v6476_v29 = vld [vmem:[%s9795_s2 + $0xa0] sm:$0xff]  }
 0x108   : > { %v5479_v37 = vadd.f32 %v5478_v35, %v5477_v31  ;;  %v5519_v38 = vadd.f32 %v5518_v36, %v5517_v32  ;;  %v6430_v31 = vld [vmem:[%s9794_s1 + $0x110] ss:$8 sps:$4 sm:$0xff]   ;;  %v6431_v32 = vld [vmem:[%s9794_s1 + $0x124] ss:$8 sps:$4 sm:$0xff]   ;;  %v6433_v35 = vld [vmem:[%s9794_s1 + $0x120] ss:$8 sps:$4 sm:$0xff]  }
 0x109   : > { %5553 = vmatpush3.bf16.msra.mxu0 %v6692_v5  ;;  %v5480_v39 = vpop.f32.mrf.mxu0  ;;  %v5520_v40 = vpop.f32.mrf.mxu1  ;;  %6030 = vmatpush3.bf16.msra.mxu1 %v6471_v21  ;;  %v6434_v36 = vld [vmem:[%s9794_s1 + $0x134] ss:$8 sps:$4 sm:$0xff]  }
 0x10a   : > { %v523_v41 = vpack.c.bf16 %v5479_v37, %v5476_v33  ;;  %v657_v42 = vpack.c.bf16 %v5519_v38, %v5516_v34  ;;  %5554 = vmatprep.subr.bf16.mxu0 %v6697_v6  ;;  %v6403_v6 = vld [vmem:[%s9794_s1 + $0x84] ss:$8 sps:$4 sm:$0xff]   ;;  %6031 = vmatprep.subr.bf16.mxu1 %v6475_v24  ;;  %v6481_v33 = vld [vmem:[%s9795_s2 + $0x90] sm:$0xff]   ;;  %v7050_v38 = vld [vmem:[%s9795_s2 + $0xf8] sm:$0xff]  }
 0x10b   : > { %v5481_v43 = vpop.f32.mrf.mxu0  ;;  %v5521_v3 = vpop.f32.mrf.mxu1  ;;  %v6485_v34 = vld [vmem:[%s9795_s2 + $0x88] sm:$0xff]   ;;  %v6486_v37 = vld [vmem:[%s9795_s2 + $0x80] sm:$0xff]  }
 0x10c   : > { %5999 = vmatprep.mubr.bf16.mxu0 %v657_v42  ;;  %6023 = vmatprep.mubr.bf16.mxu1 %v523_v41  ;;  %v5482_v45 = vadd.f32 %v5481_v43, %v5480_v39  ;;  %v5522_v46 = vadd.f32 %v5521_v3, %v5520_v40  ;;  %v6436_v39 = vld [vmem:[%s9794_s1 + $0x130] ss:$8 sps:$4 sm:$0xff]   ;;  %v6439_v40 = vld [vmem:[%s9794_s1 + $0x144] ss:$8 sps:$4 sm:$0xff]   ;;  %v6437_v41 = vld [vmem:[%s9794_s1 + $0x140] ss:$8 sps:$4 sm:$0xff]  }
 0x10d   : > { %5555 = vmatpush3.bf16.msra.mxu0 %v6702_v7  ;;  %v5483_v44 = vpop.f32.mrf.mxu0  ;;  %v5523_v4 = vpop.f32.mrf.mxu1  ;;  %v6401_v7 = vld [vmem:[%s9794_s1 + $0x80] ss:$8 sps:$4 sm:$0xff]   ;;  %6032 = vmatpush3.bf16.msra.mxu1 %v6475_v24  ;;  %v6440_v42 = vld [vmem:[%s9794_s1 + $0x154] ss:$8 sps:$4 sm:$0xff]   ;;  %v6442_v43 = vld [vmem:[%s9794_s1 + $0x150] ss:$8 sps:$4 sm:$0xff]  }
 0x10e   : > { %5556 = vmatprep.subr.bf16.mxu0 %v6707_v8  ;;  %v6404_v8 = vld [vmem:[%s9794_s1 + $0x94] ss:$8 sps:$4 sm:$0xff]   ;;  %6033 = vmatprep.subr.bf16.mxu1 %v6476_v29  ;;  %v6443_v3 = vld [vmem:[%s9794_s1 + $0x164] ss:$8 sps:$4 sm:$0xff]  }
 0x10f   : > { %v5484_v47 = vpop.f32.mrf.mxu0  ;;  %v5524_v5 = vpop.f32.mrf.mxu1 }
 0x110   : > { %v5485_v48 = vadd.f32 %v5484_v47, %v5483_v44  ;;  %v5525_v49 = vadd.f32 %v5524_v5, %v5523_v4  ;;  %v6445_v44 = vld [vmem:[%s9794_s1 + $0x160] ss:$8 sps:$4 sm:$0xff]   ;;  %v6446_v4 = vld [vmem:[%s9794_s1 + $0x174] ss:$8 sps:$4 sm:$0xff]  }
 0x111   : > { %5557 = vmatpush3.bf16.msra.mxu0 %v6712_v9  ;;  %v6874_v9 = vld [vmem:[%s6676_s10 + $0x78] sm:$0xff]   ;;  %6034 = vmatpush3.bf16.msra.mxu1 %v6476_v29  ;;  %v6449_v47 = vld [vmem:[%s9794_s1 + $0x180] ss:$8 sps:$4 sm:$0xff]  }
 0x112   : > { %v524_v50 = vpack.c.bf16 %v5485_v48, %v5482_v45  ;;  %v658_v51 = vpack.c.bf16 %v5525_v49, %v5522_v46  ;;  %5558 = vmatprep.subr.bf16.mxu0 %v6717_v10  ;;  %v6878_v10 = vld [vmem:[%s6676_s10 + $0x38] sm:$0xff]   ;;  %6035 = vmatprep.subr.bf16.mxu1 %v6480_v30  ;;  %v6451_v46 = vld [vmem:[%s9794_s1 + $0x184] ss:$8 sps:$4 sm:$0xff]  }
 0x113   : > { %v6448_v45 = vld [vmem:[%s9794_s1 + $0x170] ss:$8 sps:$4 sm:$0xff]   ;;  %v6452_v5 = vld [vmem:[%s9794_s1 + $0x194] ss:$8 sps:$4 sm:$0xff]   ;;  %v6455_v49 = vld [vmem:[%s9794_s1 + $0x1a4] ss:$8 sps:$4 sm:$0xff]  }
 0x114   : > { %6000 = vmatmul.mubr.bf16.gmra.mxu0 %v658_v51  ;;  %6024 = vmatmul.mubr.bf16.gmra.mxu1 %v524_v50  ;;  %v6454_v48 = vld [vmem:[%s9794_s1 + $0x190] ss:$8 sps:$4 sm:$0xff]   ;;  %v6458_v50 = vld [vmem:[%s9794_s1 + $0x1b4] ss:$8 sps:$4 sm:$0xff]  }
 0x115   : > { %5559 = vmatpush3.bf16.msra.mxu0 %v6722_v11  ;;  %983 = vmatprep.mubr.bf16.mxu0 %v6403_v6  ;;  %v6457_v6 = vld [vmem:[%s9794_s1 + $0x1a0] ss:$8 sps:$4 sm:$0xff]   ;;  %v6460_v51 = vld [vmem:[%s9794_s1 + $0x1b0] ss:$8 sps:$4 sm:$0xff]  }
 0x116   : > { %5560 = vmatprep.subr.bf16.mxu0 %v6727_v12  ;;  %6036 = vmatpush3.bf16.msra.mxu1 %v6480_v30  ;;  %v6489_v30 = vld [vmem:[%s9794_s1 + $0x224] ss:$8 sps:$4 sm:$0xff]  }
 0x117   : > { %6037 = vmatprep.subr.bf16.mxu1 %v6481_v33 }
 0x119   : > { %5561 = vmatpush3.bf16.msra.mxu0 %v6732_v13 }
 0x11a   : > { %5562 = vmatprep.subr.bf16.mxu0 %v6737_v14  ;;  %6038 = vmatpush3.bf16.msra.mxu1 %v6481_v33 }
 0x11b   : > { %6039 = vmatprep.subr.bf16.mxu1 %v6485_v34 }
 0x11d   : > { %5563 = vmatpush3.bf16.msra.mxu0 %v6742_v15 }
 0x11e   : > { %5564 = vmatprep.subr.bf16.mxu0 %v6747_v16  ;;  %6040 = vmatpush3.bf16.msra.mxu1 %v6485_v34 }
 0x11f   : > { %6041 = vmatprep.subr.bf16.mxu1 %v6486_v37 }
 0x121   : > { %5565 = vmatpush3.bf16.msra.mxu0 %v6750_v17 }
 0x122   : > { %5602 = vmatprep.subr.bf16.mxu0 %v6874_v9  ;;  %6042 = vmatpush3.bf16.msra.mxu1 %v6486_v37  ;;  %v6487_v37 = vld [vmem:[%s9794_s1 + $0x220] ss:$8 sps:$4 sm:$0xff]  }
 0x123   : > { %6051 = vmatprep.subr.bf16.mxu1 %v7050_v38 }
 0x124   : > { %984 = vmatmul.mubr.bf16.vlgmr.msra.gmra.mxu0 %v6401_v7  ;;  %v6463_v7 = vld [vmem:[%s9794_s1 + $0x1c4] ss:$8 sps:$4 sm:$0xff]  }
 0x125   : > { %5603 = vmatpush3.bf16.msra.mxu0 %v6878_v10  ;;  %991 = vmatprep.mubr.bf16.mxu0 %v6404_v8  ;;  %v6461_v8 = vld [vmem:[%s9794_s1 + $0x1c0] ss:$8 sps:$4 sm:$0xff]  }
 0x126   : > { %5604 = vmatprep.subr.bf16.mxu0 %v6882_v52 }
 0x129   : > { %5605 = vmatpush3.bf16.msra.mxu0 %v6889_v54 }
 0x12a   : > { %5606 = vmatprep.subr.bf16.mxu0 %v6896_v56 }
 0x12c   : > { %992 = vmatmul.mubr.bf16.gmra.mxu0 %v6406_v53  ;;  %v6464_v53 = vld [vmem:[%s9794_s1 + $0x1d4] ss:$8 sps:$4 sm:$0xff]  }
 0x12d   : > { %5607 = vmatpush3.bf16.msra.mxu0 %v6900_v57  ;;  %999 = vmatprep.mubr.bf16.mxu0 %v6407_v55 }
 0x12e   : > { %5608 = vmatprep.subr.bf16.mxu0 %v6904_v58 }
 0x131   : > { %5609 = vmatpush3.bf16.msra.mxu0 %v6911_v60 }
 0x132   : > { %5610 = vmatprep.subr.bf16.mxu0 %v6918_v62 }
 0x134   : > { %1000 = vmatmul.mubr.bf16.gmra.mxu0 %v6409_v59 }
 0x135   : > { %5611 = vmatpush3.bf16.msra.mxu0 %v6722_v11  ;;  %1007 = vmatprep.mubr.bf16.mxu0 %v6410_v61  ;;  %v6413_v11 = vld [vmem:[%s9794_s1 + $0xc0] ss:$8 sps:$4 sm:$0xff]  }
 0x136   : > { %5612 = vmatprep.subr.bf16.mxu0 %v6727_v12  ;;  %v6416_v12 = vld [vmem:[%s9794_s1 + $0xd4] ss:$8 sps:$4 sm:$0xff]  }
 0x139   : > { %5613 = vmatpush3.bf16.msra.mxu0 %v6732_v13  ;;  %v6418_v13 = vld [vmem:[%s9794_s1 + $0xd0] ss:$8 sps:$4 sm:$0xff]  }
 0x13a   : > { %5614 = vmatprep.subr.bf16.mxu0 %v6737_v14  ;;  %v6419_v14 = vld [vmem:[%s9794_s1 + $0xe4] ss:$8 sps:$4 sm:$0xff]  }
 0x13c   : > { %1008 = vmatmul.mubr.bf16.gmra.mxu0 %v6412_v63 }
 0x13d   : > { %5615 = vmatpush3.bf16.msra.mxu0 %v6742_v15  ;;  %1239 = vmatprep.mubr.bf16.mxu0 %v6415_v0  ;;  %v6421_v15 = vld [vmem:[%s9794_s1 + $0xe0] ss:$8 sps:$4 sm:$0xff]  }
 0x13e   : > { %5616 = vmatprep.subr.bf16.mxu0 %v6747_v16  ;;  %v6422_v16 = vld [vmem:[%s9794_s1 + $0xf4] ss:$8 sps:$4 sm:$0xff]  }
 0x141   : > { %5617 = vmatpush3.bf16.msra.mxu0 %v6750_v17  ;;  %v6962_v17 = vld [vmem:[%s6676_s10 + $0x18] sm:$0xff]  }
 0x142   : > { %5654 = vmatprep.subr.bf16.mxu0 %v6874_v9 }
 0x144   : > { %1240 = vmatmul.mubr.bf16.vlgmr.msra.gmra.mxu0 %v6413_v11 }
 0x145   : > { %5655 = vmatpush3.bf16.msra.mxu0 %v6878_v10  ;;  %1247 = vmatprep.mubr.bf16.mxu0 %v6416_v12 }
 0x146   : > { %5656 = vmatprep.subr.bf16.mxu0 %v6882_v52 }
 0x149   : > { %5657 = vmatpush3.bf16.msra.mxu0 %v6889_v54 }
 0x14a   : > { %5658 = vmatprep.subr.bf16.mxu0 %v6896_v56 }
 0x14c   : > { %1248 = vmatmul.mubr.bf16.gmra.mxu0 %v6418_v13 }
 0x14d   : > { %5659 = vmatpush3.bf16.msra.mxu0 %v6900_v57  ;;  %1255 = vmatprep.mubr.bf16.mxu0 %v6419_v14 }
 0x14e   : > { %5660 = vmatprep.subr.bf16.mxu0 %v6904_v58 }
 0x151   : > { %5661 = vmatpush3.bf16.msra.mxu0 %v6911_v60 }
 0x152   : > { %5662 = vmatprep.subr.bf16.mxu0 %v6918_v62 }
 0x154   : > { %1256 = vmatmul.mubr.bf16.gmra.mxu0 %v6421_v15 }
 0x155   : > { %5663 = vmatpush3.bf16.msra.mxu0 %v6962_v17  ;;  %1263 = vmatprep.mubr.bf16.mxu0 %v6422_v16 }
 0x156   : > { %5664 = vmatprep.subr.bf16.mxu0 %v6969_v2 }
 0x159   : > { %5665 = vmatpush3.bf16.msra.mxu0 %v6976_v19 }
 0x15a   : > { %5666 = vmatprep.subr.bf16.mxu0 %v6986_v22 }
 0x15c   : > { %1264 = vmatmul.mubr.bf16.gmra.mxu0 %v6424_v18 }
 0x15d   : > { %5667 = vmatpush3.bf16.msra.mxu0 %v6990_v23  ;;  %1495 = vmatprep.mubr.bf16.mxu0 %v6427_v20 }
 0x15e   : > { %5668 = vmatprep.subr.bf16.mxu0 %v6997_v25 }
 0x161   : > { %5669 = vmatpush3.bf16.msra.mxu0 %v7004_v27 }
 0x162   : > { %5706 = vmatprep.subr.bf16.mxu0 %v6874_v9 }
 0x164   : > { %1496 = vmatmul.mubr.bf16.vlgmr.msra.gmra.mxu0 %v6425_v26 }
 0x165   : > { %5707 = vmatpush3.bf16.msra.mxu0 %v6878_v10  ;;  %1503 = vmatprep.mubr.bf16.mxu0 %v6428_v28 }
 0x166   : > { %5708 = vmatprep.subr.bf16.mxu0 %v6882_v52 }
 0x169   : > { %5709 = vmatpush3.bf16.msra.mxu0 %v6889_v54 }
 0x16a   : > { %5710 = vmatprep.subr.bf16.mxu0 %v6896_v56 }
 0x16c   : > { %1504 = vmatmul.mubr.bf16.gmra.mxu0 %v6430_v31 }
 0x16d   : > { %5711 = vmatpush3.bf16.msra.mxu0 %v6900_v57  ;;  %1511 = vmatprep.mubr.bf16.mxu0 %v6431_v32 }
 0x16e   : > { %5712 = vmatprep.subr.bf16.mxu0 %v6904_v58 }
 0x171   : > { %5713 = vmatpush3.bf16.msra.mxu0 %v6911_v60 }
 0x172   : > { %5714 = vmatprep.subr.bf16.mxu0 %v6918_v62 }
 0x174   : > { %1512 = vmatmul.mubr.bf16.gmra.mxu0 %v6433_v35 }
 0x175   : > { %5715 = vmatpush3.bf16.msra.mxu0 %v6962_v17  ;;  %1519 = vmatprep.mubr.bf16.mxu0 %v6434_v36 }
 0x176   : > { %5716 = vmatprep.subr.bf16.mxu0 %v6969_v2 }
 0x179   : > { %5717 = vmatpush3.bf16.msra.mxu0 %v6976_v19 }
 0x17a   : > { %5718 = vmatprep.subr.bf16.mxu0 %v6986_v22 }
 0x17c   : > { %1520 = vmatmul.mubr.bf16.gmra.mxu0 %v6436_v39  ;;  %v6494_v39 = vld [vmem:[%s9794_s1 + $0x234] ss:$8 sps:$4 sm:$0xff]  }
 0x17d   : > { %5719 = vmatpush3.bf16.msra.mxu0 %v6990_v23  ;;  %1751 = vmatprep.mubr.bf16.mxu0 %v6439_v40 }
 0x17e   : > { %5720 = vmatprep.subr.bf16.mxu0 %v6997_v25 }
 0x181   : > { %5721 = vmatpush3.bf16.msra.mxu0 %v7004_v27 }
 0x182   : > { %5758 = vmatprep.subr.bf16.mxu0 %v6874_v9 }
 0x184   : > { %1752 = vmatmul.mubr.bf16.vlgmr.msra.gmra.mxu0 %v6437_v41 }
 0x185   : > { %5759 = vmatpush3.bf16.msra.mxu0 %v6878_v10  ;;  %1759 = vmatprep.mubr.bf16.mxu0 %v6440_v42 }
 0x186   : > { %5760 = vmatprep.subr.bf16.mxu0 %v6882_v52 }
 0x189   : > { %5761 = vmatpush3.bf16.msra.mxu0 %v6889_v54 }
 0x18a   : > { %5762 = vmatprep.subr.bf16.mxu0 %v6896_v56 }
 0x18c   : > { %1760 = vmatmul.mubr.bf16.gmra.mxu0 %v6442_v43 }
 0x18d   : > { %5763 = vmatpush3.bf16.msra.mxu0 %v6900_v57  ;;  %1767 = vmatprep.mubr.bf16.mxu0 %v6443_v3 }
 0x18e   : > { %5764 = vmatprep.subr.bf16.mxu0 %v6904_v58 }
 0x191   : > { %5765 = vmatpush3.bf16.msra.mxu0 %v6911_v60 }
 0x192   : > { %5766 = vmatprep.subr.bf16.mxu0 %v6918_v62 }
 0x194   : > { %1768 = vmatmul.mubr.bf16.gmra.mxu0 %v6445_v44  ;;  %v6491_v44 = vld [vmem:[%s9795_s2 + $0xf0] sm:$0xff]  }
 0x195   : > { %5767 = vmatpush3.bf16.msra.mxu0 %v6962_v17  ;;  %1775 = vmatprep.mubr.bf16.mxu0 %v6446_v4 }
 0x196   : > { %5768 = vmatprep.subr.bf16.mxu0 %v6969_v2 }
 0x199   : > { %5769 = vmatpush3.bf16.msra.mxu0 %v6976_v19 }
 0x19a   : > { %5770 = vmatprep.subr.bf16.mxu0 %v6986_v22 }
 0x19c   : > { %1776 = vmatmul.mubr.bf16.gmra.mxu0 %v6448_v45 }
 0x19d   : > { %5771 = vmatpush3.bf16.msra.mxu0 %v6990_v23  ;;  %2007 = vmatprep.mubr.bf16.mxu0 %v6451_v46  ;;  %v6492_v46 = vld [vmem:[%s9794_s1 + $0x230] ss:$8 sps:$4 sm:$0xff]  }
 0x19e   : > { %5772 = vmatprep.subr.bf16.mxu0 %v6997_v25 }
 0x1a1   : > { %5773 = vmatpush3.bf16.msra.mxu0 %v7004_v27 }
 0x1a2   : > { %5810 = vmatprep.subr.bf16.mxu0 %v6874_v9 }
 0x1a4   : > { %2008 = vmatmul.mubr.bf16.vlgmr.msra.gmra.mxu0 %v6449_v47  ;;  %v6495_v47 = vld [vmem:[%s9795_s2 + $0xe8] sm:$0xff]  }
 0x1a5   : > { %5811 = vmatpush3.bf16.msra.mxu0 %v6878_v10  ;;  %2015 = vmatprep.mubr.bf16.mxu0 %v6452_v5 }
 0x1a6   : > { %5812 = vmatprep.subr.bf16.mxu0 %v6882_v52 }
 0x1a9   : > { %5813 = vmatpush3.bf16.msra.mxu0 %v6889_v54 }
 0x1aa   : > { %5814 = vmatprep.subr.bf16.mxu0 %v6896_v56 }
 0x1ac   : > { %2016 = vmatmul.mubr.bf16.gmra.mxu0 %v6454_v48 }
 0x1ad   : > { %5815 = vmatpush3.bf16.msra.mxu0 %v6900_v57  ;;  %2023 = vmatprep.mubr.bf16.mxu0 %v6455_v49 }
 0x1ae   : > { %5816 = vmatprep.subr.bf16.mxu0 %v6904_v58 }
 0x1b1   : > { %5817 = vmatpush3.bf16.msra.mxu0 %v6911_v60 }
 0x1b2   : > { %5818 = vmatprep.subr.bf16.mxu0 %v6918_v62 }
 0x1b4   : > { %2024 = vmatmul.mubr.bf16.gmra.mxu0 %v6457_v6 }
 0x1b5   : > { %5819 = vmatpush3.bf16.msra.mxu0 %v6962_v17  ;;  %2031 = vmatprep.mubr.bf16.mxu0 %v6458_v50 }
 0x1b6   : > { %5820 = vmatprep.subr.bf16.mxu0 %v6969_v2 }
 0x1b9   : > { %5821 = vmatpush3.bf16.msra.mxu0 %v6976_v19 }
 0x1ba   : > { %5822 = vmatprep.subr.bf16.mxu0 %v6986_v22 }
 0x1bc   : > { %2032 = vmatmul.mubr.bf16.gmra.mxu0 %v6460_v51 }
 0x1bd   : > { %5823 = vmatpush3.bf16.msra.mxu0 %v6990_v23  ;;  %2263 = vmatprep.mubr.bf16.mxu0 %v6463_v7 }
 0x1be   : > { %5824 = vmatprep.subr.bf16.mxu0 %v6997_v25 }
 0x1c1   : > { %5825 = vmatpush3.bf16.msra.mxu0 %v7004_v27 }
 0x1c2   : > { %5862 = vmatprep.subr.bf16.mxu0 %v6874_v9  ;;  %v6466_v9 = vld [vmem:[%s9794_s1 + $0x1d0] ss:$8 sps:$4 sm:$0xff]  }
 0x1c4   : > { %2264 = vmatmul.mubr.bf16.vlgmr.msra.gmra.mxu0 %v6461_v8  ;;  %v5997_v55 = vpop.f32.mrf.mxu0  ;;  %v6021_v59 = vpop.f32.mrf.mxu1  ;;  %v6497_v8 = vld [vmem:[%s9795_s2 + $0xd8] sm:$0xff]  }
 0x1c5   : > { %v7152_v61 = vadd.f32 %v6021_v59, %v5997_v55  ;;  %5863 = vmatpush3.bf16.msra.mxu0 %v6878_v10  ;;  %2271 = vmatprep.mubr.bf16.mxu0 %v6464_v53  ;;  %v6469_v10 = vld [vmem:[%s9794_s1 + $0x1e4] ss:$8 sps:$4 sm:$0xff]  }
 0x1c6   : > { %v758_v63 = vpop.f32.mrf.mxu0  ;;  %v871_v0 = vpop.f32.mrf.mxu1  ;;  %5864 = vmatprep.subr.bf16.mxu0 %v6882_v52 }
 0x1c7   : > { %v7156_v11 = vadd.f32 %v871_v0, %v758_v63 }
 0x1c8   : > { %v5998_v12 = vpop.f32.mrf.mxu0  ;;  %v6022_v13 = vpop.f32.mrf.mxu1 }
 0x1c9   : > { %v7161_v14 = vadd.f32 %v6022_v13, %v5998_v12  ;;  %5865 = vmatpush3.bf16.msra.mxu0 %v6889_v54  ;;  %v6467_v54 = vld [vmem:[%s9794_s1 + $0x1e0] ss:$8 sps:$4 sm:$0xff]   ;;  %v6498_v12 = vld [vmem:[%s9795_s2 + $0xd0] sm:$0xff]  }
 0x1ca   : > { %v761_v15 = vpop.f32.mrf.mxu0  ;;  %v874_v16 = vpop.f32.mrf.mxu1  ;;  %5866 = vmatprep.subr.bf16.mxu0 %v6896_v56 }
 0x1cb   : > { %v7168_v52 = vadd.f32 %v874_v16, %v761_v15 }
 0x1cc   : > { %2272 = vmatmul.mubr.bf16.gmra.mxu0 %v6466_v9 }
 0x1cd   : > { %5867 = vmatpush3.bf16.msra.mxu0 %v6900_v57  ;;  %2279 = vmatprep.mubr.bf16.mxu0 %v6469_v10  ;;  %v6499_v10 = vld [vmem:[%s9795_s2 + $0xc8] sm:$0xff]  }
 0x1ce   : > { %5868 = vmatprep.subr.bf16.mxu0 %v6904_v58 }
 0x1d1   : > { %5869 = vmatpush3.bf16.msra.mxu0 %v6911_v60 }
 0x1d2   : > { %5870 = vmatprep.subr.bf16.mxu0 %v6918_v62  ;;  %v6472_v62 = vld [vmem:[%s9794_s1 + $0x1f0] ss:$8 sps:$4 sm:$0xff]  }
 0x1d4   : > { %2280 = vmatmul.mubr.bf16.gmra.mxu0 %v6467_v54  ;;  %v6001_v56 = vpop.f32.mrf.mxu0  ;;  %v6025_v18 = vpop.f32.mrf.mxu1 }
 0x1d5   : > { %v7180_v20 = vadd.f32 %v6025_v18, %v6001_v56  ;;  %5871 = vmatpush3.bf16.msra.mxu0 %v6962_v17  ;;  %2287 = vmatprep.mubr.bf16.mxu0 %v6474_v1  ;;  %v6479_v17 = vld [vmem:[%s9794_s1 + $0x204] ss:$8 sps:$4 sm:$0xff]  }
 0x1d6   : > { %v774_v57 = vpop.f32.mrf.mxu0  ;;  %v887_v58 = vpop.f32.mrf.mxu1  ;;  %5872 = vmatprep.subr.bf16.mxu0 %v6969_v2  ;;  %v6477_v2 = vld [vmem:[%s9794_s1 + $0x200] ss:$8 sps:$4 sm:$0xff]  }
 0x1d7   : > { %v7184_v21 = vadd.f32 %v887_v58, %v774_v57  ;;  %v6500_v18 = vld [vmem:[%s9795_s2 + $0xc0] sm:$0xff]  }
 0x1d8   : > { %v6002_v60 = vpop.f32.mrf.mxu0  ;;  %v6026_v24 = vpop.f32.mrf.mxu1 }
 0x1d9   : > { %v7189_v26 = vadd.f32 %v6026_v24, %v6002_v60  ;;  %5873 = vmatpush3.bf16.msra.mxu0 %v6976_v19  ;;  %v6484_v19 = vld [vmem:[%s9794_s1 + $0x214] ss:$8 sps:$4 sm:$0xff]  }
 0x1da   : > { %5874 = vmatprep.subr.bf16.mxu0 %v6986_v22  ;;  %v7205_v28 = vpop.f32.mrf.mxu0  ;;  %v6501_v60 = vld [vmem:[%s9795_s2 + $0x138] sm:$0xff]  }
 0x1dc   : > { %2288 = vmatmul.mubr.bf16.gmra.mxu0 %v6472_v62 }
 0x1dd   : > { %5875 = vmatpush3.bf16.msra.mxu0 %v6990_v23  ;;  %2519 = vmatprep.mubr.bf16.mxu0 %v6479_v17 }
 0x1de   : > { %5876 = vmatprep.subr.bf16.mxu0 %v6997_v25  ;;  %v6482_v25 = vld [vmem:[%s9794_s1 + $0x210] ss:$8 sps:$4 sm:$0xff]  }
 0x1e1   : > { %5877 = vmatpush3.bf16.msra.mxu0 %v7004_v27 }
 0x1e4   : > { %v5566_v29 = vpop.f32.mrf.mxu0  ;;  %2520 = vmatmul.mubr.bf16.vlgmr.msra.gmra.mxu0 %v6477_v2 }
 0x1e5   : > { %2527 = vmatprep.mubr.bf16.mxu0 %v6484_v19 }
 0x1e6   : > { %v5567_v22 = vpop.f32.mrf.mxu0 }
 0x1e7   : > { %v5568_v31 = vadd.f32 %v5567_v22, %v5566_v29  ;;  %v6502_v29 = vld [vmem:[%s9795_s2 + $0x130] sm:$0xff]  }
 0x1e8   : > { %v5569_v23 = vpop.f32.mrf.mxu0 }
 0x1ea   : > { %v5570_v27 = vpop.f32.mrf.mxu0 }
 0x1eb   : > { %v5571_v32 = vadd.f32 %v5570_v27, %v5569_v23 }
 0x1ec   : > { %v5572_v33 = vpop.f32.mrf.mxu0  ;;  %2528 = vmatmul.mubr.bf16.gmra.mxu0 %v6482_v25  ;;  %v6503_v25 = vld [vmem:[%s9795_s2 + $0x128] sm:$0xff]  }
 0x1ed   : > { %v1016_v34 = vpack.c.bf16 %v5571_v32, %v5568_v31  ;;  %2535 = vmatprep.mubr.bf16.mxu0 %v6489_v30 }
 0x1ee   : > { %v5573_v35 = vpop.f32.mrf.mxu0 }
 0x1ef   : > { %6043 = vmatprep.mubr.bf16.mxu1 %v1016_v34  ;;  %v5574_v41 = vadd.f32 %v5573_v35, %v5572_v33  ;;  %v6504_v34 = vld [vmem:[%s9795_s2 + $0x120] sm:$0xff]  }
 0x1f0   : > { %v5575_v36 = vpop.f32.mrf.mxu0 }
 0x1f2   : > { %v5576_v40 = vpop.f32.mrf.mxu0 }
 0x1f3   : > { %v5577_v42 = vadd.f32 %v5576_v40, %v5575_v36 }
 0x1f4   : > { %v5578_v43 = vpop.f32.mrf.mxu0  ;;  %2536 = vmatmul.mubr.bf16.gmra.mxu0 %v6487_v37  ;;  %v6505_v37 = vld [vmem:[%s9795_s2 + $0x118] sm:$0xff]  }
 0x1f5   : > { %v1017_v3 = vpack.c.bf16 %v5577_v42, %v5574_v41  ;;  %2543 = vmatprep.mubr.bf16.mxu0 %v6494_v39 }
 0x1f6   : > { %v5579_v4 = vpop.f32.mrf.mxu0 }
 0x1f7   : > { %6044 = vmatmul.mubr.bf16.vlgmr.msra.gmra.mxu1 %v1017_v3  ;;  %v5580_v48 = vadd.f32 %v5579_v4, %v5578_v43  ;;  %v6506_v3 = vld [vmem:[%s9795_s2 + $0x110] sm:$0xff]  }
 0x1f8   : > { %v5581_v45 = vpop.f32.mrf.mxu0  ;;  %6052 = vmatpush3.bf16.msra.mxu1 %v7050_v38  ;;  %v6496_v38 = vld [vmem:[%s9795_s2 + $0xe0] sm:$0xff]  }
 0x1f9   : > { %6053 = vmatprep.subr.bf16.mxu1 %v6491_v44 }
 0x1fa   : > { %v5582_v5 = vpop.f32.mrf.mxu0 }
 0x1fb   : > { %v5583_v49 = vadd.f32 %v5582_v5, %v5581_v45  ;;  %v6507_v45 = vld [vmem:[%s9795_s2 + $0x108] sm:$0xff]  }
 0x1fc   : > { %v5584_v6 = vpop.f32.mrf.mxu0  ;;  %6054 = vmatpush3.bf16.msra.mxu1 %v6491_v44  ;;  %2544 = vmatmul.mubr.bf16.gmra.mxu0 %v6492_v46 }
 0x1fd   : > { %v1018_v50 = vpack.c.bf16 %v5583_v49, %v5580_v48  ;;  %6055 = vmatprep.subr.bf16.mxu1 %v6495_v47 }
 0x1fe   : > { %v5585_v51 = vpop.f32.mrf.mxu0 }
 0x1ff   : > { %6047 = vmatprep.mubr.bf16.mxu1 %v1018_v50  ;;  %v5586_v55 = vadd.f32 %v5585_v51, %v5584_v6  ;;  %v6508_v6 = vld [vmem:[%s9795_s2 + $0x100] sm:$0xff]   ;;  %v6509_v51 = vld [vmem:[%s9795_s2 + $0x178] sm:$0xff]  }
 0x200   : > { %v5587_v7 = vpop.f32.mrf.mxu0  ;;  %6056 = vmatpush3.bf16.msra.mxu1 %v6495_v47 }
 0x201   : > { %6057 = vmatprep.subr.bf16.mxu1 %v6496_v38 }
 0x202   : > { %v5588_v53 = vpop.f32.mrf.mxu0 }
 0x203   : > { %v5589_v59 = vadd.f32 %v5588_v53, %v5587_v7 }
 0x204   : > { %v5618_v63 = vpop.f32.mrf.mxu0  ;;  %6058 = vmatpush3.bf16.msra.mxu1 %v6496_v38 }
 0x205   : > { %v1019_v0 = vpack.c.bf16 %v5589_v59, %v5586_v55  ;;  %6059 = vmatprep.subr.bf16.mxu1 %v6497_v8 }
 0x206   : > { %v5619_v13 = vpop.f32.mrf.mxu0 }
 0x207   : > { %6048 = vmatmul.mubr.bf16.gmra.mxu1 %v1019_v0  ;;  %v5620_v16 = vadd.f32 %v5619_v13, %v5618_v63  ;;  %v6510_v63 = vld [vmem:[%s9795_s2 + $0x170] sm:$0xff]   ;;  %v6511_v13 = vld [vmem:[%s9795_s2 + $0x168] sm:$0xff]  }
 0x208   : > { %v5621_v9 = vpop.f32.mrf.mxu0  ;;  %6060 = vmatpush3.bf16.msra.mxu1 %v6497_v8 }
 0x209   : > { %6061 = vmatprep.subr.bf16.mxu1 %v6498_v12 }
 0x20a   : > { %v5622_v15 = vpop.f32.mrf.mxu0 }
 0x20b   : > { %v5623_v54 = vadd.f32 %v5622_v15, %v5621_v9 }
 0x20c   : > { %v5624_v1 = vpop.f32.mrf.mxu0  ;;  %6062 = vmatpush3.bf16.msra.mxu1 %v6498_v12 }
 0x20d   : > { %v1272_v56 = vpack.c.bf16 %v5623_v54, %v5620_v16  ;;  %6063 = vmatprep.subr.bf16.mxu1 %v6499_v10 }
 0x20e   : > { %v5625_v57 = vpop.f32.mrf.mxu0 }
 0x20f   : > { %6067 = vmatprep.mubr.bf16.mxu1 %v1272_v56  ;;  %v5626_v62 = vadd.f32 %v5625_v57, %v5624_v1  ;;  %v6512_v1 = vld [vmem:[%s9795_s2 + $0x160] sm:$0xff]   ;;  %v6513_v57 = vld [vmem:[%s9795_s2 + $0x158] sm:$0xff]  }
 0x210   : > { %v5627_v58 = vpop.f32.mrf.mxu0  ;;  %6064 = vmatpush3.bf16.msra.mxu1 %v6499_v10 }
 0x211   : > { %6065 = vmatprep.subr.bf16.mxu1 %v6500_v18 }
 0x212   : > { %v5628_v24 = vpop.f32.mrf.mxu0 }
 0x213   : > { %v5629_v17 = vadd.f32 %v5628_v24, %v5627_v58 }
 0x214   : > { %v5630_v2 = vpop.f32.mrf.mxu0  ;;  %6066 = vmatpush3.bf16.msra.mxu1 %v6500_v18 }
 0x215   : > { %v1273_v19 = vpack.c.bf16 %v5629_v17, %v5626_v62  ;;  %6075 = vmatprep.subr.bf16.mxu1 %v6501_v60 }
 0x216   : > { %v5631_v22 = vpop.f32.mrf.mxu0 }
 0x217   : > { %6068 = vmatmul.mubr.bf16.vlgmr.msra.gmra.mxu1 %v1273_v19  ;;  %v5632_v27 = vadd.f32 %v5631_v22, %v5630_v2  ;;  %v6514_v2 = vld [vmem:[%s9795_s2 + $0x150] sm:$0xff]   ;;  %v6515_v22 = vld [vmem:[%s9795_s2 + $0x148] sm:$0xff]  }
 0x218   : > { %v5633_v23 = vpop.f32.mrf.mxu0  ;;  %6076 = vmatpush3.bf16.msra.mxu1 %v6501_v60 }
 0x219   : > { %6077 = vmatprep.subr.bf16.mxu1 %v6502_v29 }
 0x21a   : > { %v5634_v30 = vpop.f32.mrf.mxu0 }
 0x21b   : > { %v5635_v31 = vadd.f32 %v5634_v30, %v5633_v23 }
 0x21c   : > { %v5636_v32 = vpop.f32.mrf.mxu0  ;;  %6078 = vmatpush3.bf16.msra.mxu1 %v6502_v29 }
 0x21d   : > { %v1274_v33 = vpack.c.bf16 %v5635_v31, %v5632_v27  ;;  %6079 = vmatprep.subr.bf16.mxu1 %v6503_v25 }
 0x21e   : > { %v5637_v35 = vpop.f32.mrf.mxu0 }
 0x21f   : > { %6071 = vmatprep.mubr.bf16.mxu1 %v1274_v33  ;;  %v5638_v40 = vadd.f32 %v5637_v35, %v5636_v32  ;;  %v6516_v32 = vld [vmem:[%s9795_s2 + $0x140] sm:$0xff]   ;;  %v6517_v35 = vld [vmem:[%s9795_s2 + $0x1b8] sm:$0xff]  }
 0x220   : > { %v5639_v36 = vpop.f32.mrf.mxu0  ;;  %6080 = vmatpush3.bf16.msra.mxu1 %v6503_v25 }
 0x221   : > { %6081 = vmatprep.subr.bf16.mxu1 %v6504_v34 }
 0x222   : > { %v5640_v39 = vpop.f32.mrf.mxu0 }
 0x223   : > { %v5641_v41 = vadd.f32 %v5640_v39, %v5639_v36 }
 0x224   : > { %v5670_v42 = vpop.f32.mrf.mxu0  ;;  %6082 = vmatpush3.bf16.msra.mxu1 %v6504_v34 }
 0x225   : > { %v1275_v43 = vpack.c.bf16 %v5641_v41, %v5638_v40  ;;  %6083 = vmatprep.subr.bf16.mxu1 %v6505_v37 }
 0x226   : > { %v5671_v44 = vpop.f32.mrf.mxu0 }
 0x227   : > { %6072 = vmatmul.mubr.bf16.gmra.mxu1 %v1275_v43  ;;  %v5672_v47 = vadd.f32 %v5671_v44, %v5670_v42  ;;  %v6518_v42 = vld [vmem:[%s9795_s2 + $0x1b0] sm:$0xff]   ;;  %v6519_v44 = vld [vmem:[%s9795_s2 + $0x1a8] sm:$0xff]  }
 0x228   : > { %v5673_v4 = vpop.f32.mrf.mxu0  ;;  %6084 = vmatpush3.bf16.msra.mxu1 %v6505_v37 }
 0x229   : > { %6085 = vmatprep.subr.bf16.mxu1 %v6506_v3 }
 0x22a   : > { %v5674_v46 = vpop.f32.mrf.mxu0 }
 0x22b   : > { %v5675_v5 = vadd.f32 %v5674_v46, %v5673_v4 }
 0x22c   : > { %v5676_v48 = vpop.f32.mrf.mxu0  ;;  %6086 = vmatpush3.bf16.msra.mxu1 %v6506_v3 }
 0x22d   : > { %v1528_v49 = vpack.c.bf16 %v5675_v5, %v5672_v47  ;;  %6087 = vmatprep.subr.bf16.mxu1 %v6507_v45 }
 0x22e   : > { %v5677_v50 = vpop.f32.mrf.mxu0 }
 0x22f   : > { %6091 = vmatprep.mubr.bf16.mxu1 %v1528_v49  ;;  %v5678_v8 = vadd.f32 %v5677_v50, %v5676_v48  ;;  %v6520_v48 = vld [vmem:[%s9795_s2 + $0x1a0] sm:$0xff]   ;;  %v6521_v50 = vld [vmem:[%s9795_s2 + $0x198] sm:$0xff]  }
 0x230   : > { %v5679_v38 = vpop.f32.mrf.mxu0  ;;  %6088 = vmatpush3.bf16.msra.mxu1 %v6507_v45 }
 0x231   : > { %6089 = vmatprep.subr.bf16.mxu1 %v6508_v6 }
 0x232   : > { %v5680_v7 = vpop.f32.mrf.mxu0 }
 0x233   : > { %v5681_v53 = vadd.f32 %v5680_v7, %v5679_v38 }
 0x234   : > { %v5682_v55 = vpop.f32.mrf.mxu0  ;;  %6090 = vmatpush3.bf16.msra.mxu1 %v6508_v6 }
 0x235   : > { %v1529_v59 = vpack.c.bf16 %v5681_v53, %v5678_v8  ;;  %6099 = vmatprep.subr.bf16.mxu1 %v6509_v51 }
 0x236   : > { %v5683_v0 = vpop.f32.mrf.mxu0 }
 0x237   : > { %6092 = vmatmul.mubr.bf16.vlgmr.msra.gmra.mxu1 %v1529_v59  ;;  %v5684_v10 = vadd.f32 %v5683_v0, %v5682_v55  ;;  %v6522_v55 = vld [vmem:[%s9795_s2 + $0x190] sm:$0xff]   ;;  %v6523_v0 = vld [vmem:[%s9795_s2 + $0x188] sm:$0xff]  }
 0x238   : > { %v5685_v12 = vpop.f32.mrf.mxu0  ;;  %6100 = vmatpush3.bf16.msra.mxu1 %v6509_v51 }
 0x239   : > { %6101 = vmatprep.subr.bf16.mxu1 %v6510_v63 }
 0x23a   : > { %v5686_v9 = vpop.f32.mrf.mxu0 }
 0x23b   : > { %v5687_v15 = vadd.f32 %v5686_v9, %v5685_v12 }
 0x23c   : > { %v5688_v16 = vpop.f32.mrf.mxu0  ;;  %6102 = vmatpush3.bf16.msra.mxu1 %v6510_v63 }
 0x23d   : > { %v1530_v54 = vpack.c.bf16 %v5687_v15, %v5684_v10  ;;  %6103 = vmatprep.subr.bf16.mxu1 %v6511_v13 }
 0x23e   : > { %v5689_v56 = vpop.f32.mrf.mxu0 }
 0x23f   : > { %6095 = vmatprep.mubr.bf16.mxu1 %v1530_v54  ;;  %v5690_v60 = vadd.f32 %v5689_v56, %v5688_v16  ;;  %v6524_v16 = vld [vmem:[%s9795_s2 + $0x180] sm:$0xff]   ;;  %v6525_v56 = vld [vmem:[%s9795_s2 + $0x1f8] sm:$0xff]  }
 0x240   : > { %v5691_v18 = vpop.f32.mrf.mxu0  ;;  %6104 = vmatpush3.bf16.msra.mxu1 %v6511_v13 }
 0x241   : > { %6105 = vmatprep.subr.bf16.mxu1 %v6512_v1 }
 0x242   : > { %v5692_v58 = vpop.f32.mrf.mxu0 }
 0x243   : > { %v5693_v24 = vadd.f32 %v5692_v58, %v5691_v18 }
 0x244   : > { %v5722_v62 = vpop.f32.mrf.mxu0  ;;  %6106 = vmatpush3.bf16.msra.mxu1 %v6512_v1 }
 0x245   : > { %v1531_v17 = vpack.c.bf16 %v5693_v24, %v5690_v60  ;;  %6107 = vmatprep.subr.bf16.mxu1 %v6513_v57 }
 0x246   : > { %v5723_v19 = vpop.f32.mrf.mxu0 }
 0x247   : > { %6096 = vmatmul.mubr.bf16.gmra.mxu1 %v1531_v17  ;;  %v5724_v25 = vadd.f32 %v5723_v19, %v5722_v62  ;;  %v6526_v62 = vld [vmem:[%s9795_s2 + $0x1f0] sm:$0xff]   ;;  %v6527_v19 = vld [vmem:[%s9795_s2 + $0x1e8] sm:$0xff]  }
 0x248   : > { %v5725_v29 = vpop.f32.mrf.mxu0  ;;  %6108 = vmatpush3.bf16.msra.mxu1 %v6513_v57 }
 0x249   : > { %6109 = vmatprep.subr.bf16.mxu1 %v6514_v2 }
 0x24a   : > { %v5726_v23 = vpop.f32.mrf.mxu0 }
 0x24b   : > { %v5727_v30 = vadd.f32 %v5726_v23, %v5725_v29 }
 0x24c   : > { %v5728_v27 = vpop.f32.mrf.mxu0  ;;  %6110 = vmatpush3.bf16.msra.mxu1 %v6514_v2 }
 0x24d   : > { %v1784_v31 = vpack.c.bf16 %v5727_v30, %v5724_v25  ;;  %6111 = vmatprep.subr.bf16.mxu1 %v6515_v22 }
 0x24e   : > { %v5729_v33 = vpop.f32.mrf.mxu0 }
 0x24f   : > { %6115 = vmatprep.mubr.bf16.mxu1 %v1784_v31  ;;  %v5730_v37 = vadd.f32 %v5729_v33, %v5728_v27  ;;  %v6528_v27 = vld [vmem:[%s9795_s2 + $0x1e0] sm:$0xff]   ;;  %v6529_v33 = vld [vmem:[%s9795_s2 + $0x1d8] sm:$0xff]  }
 0x250   : > { %v5731_v34 = vpop.f32.mrf.mxu0  ;;  %6112 = vmatpush3.bf16.msra.mxu1 %v6515_v22 }
 0x251   : > { %6113 = vmatprep.subr.bf16.mxu1 %v6516_v32 }
 0x252   : > { %v5732_v36 = vpop.f32.mrf.mxu0 }
 0x253   : > { %v5733_v39 = vadd.f32 %v5732_v36, %v5731_v34 }
 0x254   : > { %v5734_v40 = vpop.f32.mrf.mxu0  ;;  %6114 = vmatpush3.bf16.msra.mxu1 %v6516_v32 }
 0x255   : > { %v1785_v41 = vpack.c.bf16 %v5733_v39, %v5730_v37  ;;  %6123 = vmatprep.subr.bf16.mxu1 %v6517_v35 }
 0x256   : > { %v5735_v43 = vpop.f32.mrf.mxu0 }
 0x257   : > { %6116 = vmatmul.mubr.bf16.vlgmr.msra.gmra.mxu1 %v1785_v41  ;;  %v5736_v45 = vadd.f32 %v5735_v43, %v5734_v40  ;;  %v6530_v40 = vld [vmem:[%s9795_s2 + $0x1d0] sm:$0xff]   ;;  %v6531_v43 = vld [vmem:[%s9795_s2 + $0x1c8] sm:$0xff]  }
 0x258   : > { %v5737_v3 = vpop.f32.mrf.mxu0  ;;  %6124 = vmatpush3.bf16.msra.mxu1 %v6517_v35 }
 0x259   : > { %6125 = vmatprep.subr.bf16.mxu1 %v6518_v42 }
 0x25a   : > { %v5738_v4 = vpop.f32.mrf.mxu0 }
 0x25b   : > { %v5739_v46 = vadd.f32 %v5738_v4, %v5737_v3 }
 0x25c   : > { %v5740_v47 = vpop.f32.mrf.mxu0  ;;  %6126 = vmatpush3.bf16.msra.mxu1 %v6518_v42 }
 0x25d   : > { %v1786_v5 = vpack.c.bf16 %v5739_v46, %v5736_v45  ;;  %6127 = vmatprep.subr.bf16.mxu1 %v6519_v44 }
 0x25e   : > { %v5741_v49 = vpop.f32.mrf.mxu0 }
 0x25f   : > { %6119 = vmatprep.mubr.bf16.mxu1 %v1786_v5  ;;  %v5742_v51 = vadd.f32 %v5741_v49, %v5740_v47  ;;  %v6532_v47 = vld [vmem:[%s9795_s2 + $0x1c0] sm:$0xff]   ;;  %v6533_v49 = vld [vmem:[%s9795_s2 + $0x238] sm:$0xff]  }
 0x260   : > { %v5743_v6 = vpop.f32.mrf.mxu0  ;;  %6128 = vmatpush3.bf16.msra.mxu1 %v6519_v44 }
 0x261   : > { %6129 = vmatprep.subr.bf16.mxu1 %v6520_v48 }
 0x262   : > { %v5744_v38 = vpop.f32.mrf.mxu0 }
 0x263   : > { %v5745_v7 = vadd.f32 %v5744_v38, %v5743_v6 }
 0x264   : > { %v5774_v8 = vpop.f32.mrf.mxu0  ;;  %6130 = vmatpush3.bf16.msra.mxu1 %v6520_v48 }
 0x265   : > { %v1787_v53 = vpack.c.bf16 %v5745_v7, %v5742_v51  ;;  %6131 = vmatprep.subr.bf16.mxu1 %v6521_v50 }
 0x266   : > { %v5775_v59 = vpop.f32.mrf.mxu0 }
 0x267   : > { %6120 = vmatmul.mubr.bf16.gmra.mxu1 %v1787_v53  ;;  %v5776_v13 = vadd.f32 %v5775_v59, %v5774_v8  ;;  %v6534_v8 = vld [vmem:[%s9795_s2 + $0x230] sm:$0xff]   ;;  %v6535_v59 = vld [vmem:[%s9795_s2 + $0x228] sm:$0xff]  }
 0x268   : > { %v5777_v63 = vpop.f32.mrf.mxu0  ;;  %6132 = vmatpush3.bf16.msra.mxu1 %v6521_v50 }
 0x269   : > { %6133 = vmatprep.subr.bf16.mxu1 %v6522_v55 }
 0x26a   : > { %v5778_v12 = vpop.f32.mrf.mxu0 }
 0x26b   : > { %v5779_v9 = vadd.f32 %v5778_v12, %v5777_v63 }
 0x26c   : > { %v5780_v10 = vpop.f32.mrf.mxu0  ;;  %6134 = vmatpush3.bf16.msra.mxu1 %v6522_v55 }
 0x26d   : > { %v2040_v15 = vpack.c.bf16 %v5779_v9, %v5776_v13  ;;  %6135 = vmatprep.subr.bf16.mxu1 %v6523_v0 }
 0x26e   : > { %v5781_v54 = vpop.f32.mrf.mxu0 }
 0x26f   : > { %6139 = vmatprep.mubr.bf16.mxu1 %v2040_v15  ;;  %v5782_v57 = vadd.f32 %v5781_v54, %v5780_v10  ;;  %v6536_v10 = vld [vmem:[%s9795_s2 + $0x220] sm:$0xff]   ;;  %v6537_v54 = vld [vmem:[%s9795_s2 + $0x218] sm:$0xff]  }
 0x270   : > { %v5783_v1 = vpop.f32.mrf.mxu0  ;;  %6136 = vmatpush3.bf16.msra.mxu1 %v6523_v0 }
 0x271   : > { %6137 = vmatprep.subr.bf16.mxu1 %v6524_v16 }
 0x272   : > { %v5784_v18 = vpop.f32.mrf.mxu0 }
 0x273   : > { %v5785_v58 = vadd.f32 %v5784_v18, %v5783_v1 }
 0x274   : > { %v5786_v60 = vpop.f32.mrf.mxu0  ;;  %6138 = vmatpush3.bf16.msra.mxu1 %v6524_v16 }
 0x275   : > { %v2041_v24 = vpack.c.bf16 %v5785_v58, %v5782_v57  ;;  %6147 = vmatprep.subr.bf16.mxu1 %v6525_v56 }
 0x276   : > { %v5787_v17 = vpop.f32.mrf.mxu0 }
 0x277   : > { %6140 = vmatmul.mubr.bf16.vlgmr.msra.gmra.mxu1 %v2041_v24  ;;  %v5788_v22 = vadd.f32 %v5787_v17, %v5786_v60  ;;  %v6538_v60 = vld [vmem:[%s9795_s2 + $0x210] sm:$0xff]   ;;  %v6539_v17 = vld [vmem:[%s9795_s2 + $0x208] sm:$0xff]  }
 0x278   : > { %v5789_v2 = vpop.f32.mrf.mxu0  ;;  %6148 = vmatpush3.bf16.msra.mxu1 %v6525_v56 }
 0x279   : > { %6149 = vmatprep.subr.bf16.mxu1 %v6526_v62 }
 0x27a   : > { %v5790_v29 = vpop.f32.mrf.mxu0 }
 0x27b   : > { %v5791_v23 = vadd.f32 %v5790_v29, %v5789_v2 }
 0x27c   : > { %v5792_v25 = vpop.f32.mrf.mxu0  ;;  %6150 = vmatpush3.bf16.msra.mxu1 %v6526_v62 }
 0x27d   : > { %v2042_v30 = vpack.c.bf16 %v5791_v23, %v5788_v22  ;;  %6151 = vmatprep.subr.bf16.mxu1 %v6527_v19 }
 0x27e   : > { %v5793_v31 = vpop.f32.mrf.mxu0 }
 0x27f   : > { %6143 = vmatprep.mubr.bf16.mxu1 %v2042_v30  ;;  %v5794_v35 = vadd.f32 %v5793_v31, %v5792_v25  ;;  %v6540_v25 = vld [vmem:[%s9795_s2 + $0x200] sm:$0xff]  }
 0x280   : > { %v5795_v32 = vpop.f32.mrf.mxu0  ;;  %6152 = vmatpush3.bf16.msra.mxu1 %v6527_v19 }
 0x281   : > { %6153 = vmatprep.subr.bf16.mxu1 %v6528_v27 }
 0x282   : > { %v5796_v34 = vpop.f32.mrf.mxu0 }
 0x283   : > { %v5797_v36 = vadd.f32 %v5796_v34, %v5795_v32 }
 0x284   : > { %v5826_v37 = vpop.f32.mrf.mxu0  ;;  %6154 = vmatpush3.bf16.msra.mxu1 %v6528_v27 }
 0x285   : > { %v2043_v39 = vpack.c.bf16 %v5797_v36, %v5794_v35  ;;  %6155 = vmatprep.subr.bf16.mxu1 %v6529_v33  ;;  %v890_v35 = vpop.f32.mrf.mxu1 }
 0x286   : > { %v5827_v41 = vpop.f32.mrf.mxu0 }
 0x287   : > { %6144 = vmatmul.mubr.bf16.gmra.mxu1 %v2043_v39  ;;  %v5828_v44 = vadd.f32 %v5827_v41, %v5826_v37 }
 0x288   : > { %v5829_v42 = vpop.f32.mrf.mxu0  ;;  %6156 = vmatpush3.bf16.msra.mxu1 %v6529_v33 }
 0x289   : > { %6157 = vmatprep.subr.bf16.mxu1 %v6530_v40 }
 0x28a   : > { %v5830_v3 = vpop.f32.mrf.mxu0 }
 0x28b   : > { %v5831_v4 = vadd.f32 %v5830_v3, %v5829_v42 }
 0x28c   : > { %v5832_v45 = vpop.f32.mrf.mxu0  ;;  %6158 = vmatpush3.bf16.msra.mxu1 %v6530_v40 }
 0x28d   : > { %v2296_v46 = vpack.c.bf16 %v5831_v4, %v5828_v44  ;;  %6159 = vmatprep.subr.bf16.mxu1 %v6531_v43 }
 0x28e   : > { %v5833_v5 = vpop.f32.mrf.mxu0 }
 0x28f   : > { %6163 = vmatprep.mubr.bf16.mxu1 %v2296_v46  ;;  %v5834_v50 = vadd.f32 %v5833_v5, %v5832_v45 }
 0x290   : > { %v5835_v48 = vpop.f32.mrf.mxu0  ;;  %6160 = vmatpush3.bf16.msra.mxu1 %v6531_v43 }
 0x291   : > { %6161 = vmatprep.subr.bf16.mxu1 %v6532_v47 }
 0x292   : > { %v5836_v6 = vpop.f32.mrf.mxu0 }
 0x293   : > { %v5837_v38 = vadd.f32 %v5836_v6, %v5835_v48 }
 0x294   : > { %v5838_v51 = vpop.f32.mrf.mxu0  ;;  %6162 = vmatpush3.bf16.msra.mxu1 %v6532_v47 }
 0x295   : > { %v2297_v7 = vpack.c.bf16 %v5837_v38, %v5834_v50  ;;  %6171 = vmatprep.subr.bf16.mxu1 %v6533_v49 }
 0x296   : > { %v5839_v53 = vpop.f32.mrf.mxu0 }
 0x297   : > { %6164 = vmatmul.mubr.bf16.vlgmr.msra.gmra.mxu1 %v2297_v7  ;;  %v5840_v0 = vadd.f32 %v5839_v53, %v5838_v51 }
 0x298   : > { %v5841_v55 = vpop.f32.mrf.mxu0  ;;  %6172 = vmatpush3.bf16.msra.mxu1 %v6533_v49 }
 0x299   : > { %6173 = vmatprep.subr.bf16.mxu1 %v6534_v8 }
 0x29a   : > { %v5842_v63 = vpop.f32.mrf.mxu0 }
 0x29b   : > { %v5843_v12 = vadd.f32 %v5842_v63, %v5841_v55 }
 0x29c   : > { %v5844_v13 = vpop.f32.mrf.mxu0  ;;  %6174 = vmatpush3.bf16.msra.mxu1 %v6534_v8 }
 0x29d   : > { %v2298_v9 = vpack.c.bf16 %v5843_v12, %v5840_v0  ;;  %6175 = vmatprep.subr.bf16.mxu1 %v6535_v59 }
 0x29e   : > { %v5845_v15 = vpop.f32.mrf.mxu0 }
 0x29f   : > { %6167 = vmatprep.mubr.bf16.mxu1 %v2298_v9  ;;  %v5846_v56 = vadd.f32 %v5845_v15, %v5844_v13 }
 0x2a0   : > { %v5847_v16 = vpop.f32.mrf.mxu0  ;;  %6176 = vmatpush3.bf16.msra.mxu1 %v6535_v59  ;;  %v891_v59 = vadd.f32 %v890_v35, %v7205_v28  ;;  %v6544_v35 = vld [vmem:[%s9796_s3 + $0x20] sm:$0xff]  }
 0x2a1   : > { %6177 = vmatprep.subr.bf16.mxu1 %v6536_v10 }
 0x2a2   : > { %v5848_v1 = vpop.f32.mrf.mxu0 }
 0x2a3   : > { %v5849_v18 = vadd.f32 %v5848_v1, %v5847_v16 }
 0x2a4   : > { %v5878_v57 = vpop.f32.mrf.mxu0  ;;  %6178 = vmatpush3.bf16.msra.mxu1 %v6536_v10 }
 0x2a5   : > { %v2299_v58 = vpack.c.bf16 %v5849_v18, %v5846_v56  ;;  %6179 = vmatprep.subr.bf16.mxu1 %v6537_v54 }
 0x2a6   : > { %v5879_v24 = vpop.f32.mrf.mxu0 }
 0x2a7   : > { %6168 = vmatmul.mubr.bf16.gmra.mxu1 %v2299_v58  ;;  %v5880_v19 = vadd.f32 %v5879_v24, %v5878_v57 }
 0x2a8   : > { %v5881_v62 = vpop.f32.mrf.mxu0  ;;  %6180 = vmatpush3.bf16.msra.mxu1 %v6537_v54 }
 0x2a9   : > { %6181 = vmatprep.subr.bf16.mxu1 %v6538_v60 }
 0x2aa   : > { %v5882_v2 = vpop.f32.mrf.mxu0 }
 0x2ab   : > { %v5883_v29 = vadd.f32 %v5882_v2, %v5881_v62 }
 0x2ac   : > { %v5884_v22 = vpop.f32.mrf.mxu0  ;;  %6182 = vmatpush3.bf16.msra.mxu1 %v6538_v60 }
 0x2ad   : > { %v2552_v23 = vpack.c.bf16 %v5883_v29, %v5880_v19  ;;  %6183 = vmatprep.subr.bf16.mxu1 %v6539_v17 }
 0x2ae   : > { %v5885_v30 = vpop.f32.mrf.mxu0 }
 0x2af   : > { %6187 = vmatprep.mubr.bf16.mxu1 %v2552_v23  ;;  %v5886_v32 = vadd.f32 %v5885_v30, %v5884_v22 }
 0x2b0   : > { %v5887_v27 = vpop.f32.mrf.mxu0  ;;  %6184 = vmatpush3.bf16.msra.mxu1 %v6539_v17 }
 0x2b1   : > { %6185 = vmatprep.subr.bf16.mxu1 %v6540_v25 }
 0x2b2   : > { %v5888_v31 = vpop.f32.mrf.mxu0 }
 0x2b3   : > { %v5889_v33 = vadd.f32 %v5888_v31, %v5887_v27 }
 0x2b4   : > { %v5890_v34 = vpop.f32.mrf.mxu0  ;;  %6186 = vmatpush3.bf16.msra.mxu1 %v6540_v25 }
 0x2b5   : > { %v2553_v36 = vpack.c.bf16 %v5889_v33, %v5886_v32  ;;  %v6541_v32 = vld [vmem:[%s9796_s3 + $0x38] sm:$0xff]   ;;  %v6542_v33 = vld [vmem:[%s9796_s3 + $0x30] sm:$0xff]  }
 0x2b6   : > { %v5891_v37 = vpop.f32.mrf.mxu0  ;;  %6195 = vmatprep.subr.bf16.mxu0 %v6541_v32 }
 0x2b7   : > { %v6045_v39 = vpop.f32.mrf.mxu1  ;;  %6188 = vmatmul.mubr.bf16.vlgmr.msra.gmra.mxu1 %v2553_v36  ;;  %v5892_v44 = vadd.f32 %v5891_v37, %v5890_v34  ;;  %6196 = vmatpush3.bf16.msra.mxu0 %v6541_v32  ;;  %v6543_v34 = vld [vmem:[%s9796_s3 + $0x28] sm:$0xff]   ;;  %v6545_v36 = vld [vmem:[%s9796_s3 + $0x18] sm:$0xff]  }
 0x2b8   : > { %v1152_v40 = vadd.f32 %v6045_v39, %v7152_v61  ;;  %v5893_v41 = vpop.f32.mrf.mxu0  ;;  %6197 = vmatprep.subr.bf16.mxu0 %v6542_v33  ;;  %v6546_v39 = vld [vmem:[%s9796_s3 + $0x10] sm:$0xff]  }
 0x2b9   : > { %v1119_v42 = vpop.f32.mrf.mxu1 }
 0x2ba   : > { %v1150_v43 = vadd.f32 %v1119_v42, %v7156_v11  ;;  %v5894_v3 = vpop.f32.mrf.mxu0 }
 0x2bb   : > { %v5895_v4 = vadd.f32 %v5894_v3, %v5893_v41  ;;  %v6046_v45 = vpop.f32.mrf.mxu1  ;;  %6198 = vmatpush3.bf16.msra.mxu0 %v6542_v33  ;;  %v6547_v41 = vld [vmem:[%s9796_s3 + $0x8] sm:$0xff]  }
 0x2bc   : > { %v1153_v46 = vadd.f32 %v6046_v45, %v7161_v14  ;;  %v5896_v47 = vpop.f32.mrf.mxu0  ;;  %6199 = vmatprep.subr.bf16.mxu0 %v6543_v34 }
 0x2bd   : > { %v2554_v5 = vpack.c.bf16 %v5895_v4, %v5892_v44  ;;  %v1122_v48 = vpop.f32.mrf.mxu1 }
 0x2be   : > { %v1151_v49 = vadd.f32 %v1122_v48, %v7168_v52  ;;  %v5897_v6 = vpop.f32.mrf.mxu0 }
 0x2bf   : > { %6191 = vmatprep.mubr.bf16.mxu1 %v2554_v5  ;;  %v5898_v61 = vadd.f32 %v5897_v6, %v5896_v47  ;;  %6200 = vmatpush3.bf16.msra.mxu0 %v6543_v34 }
 0x2c0   : > { %v5899_v50 = vpop.f32.mrf.mxu0  ;;  %6201 = vmatprep.subr.bf16.mxu0 %v6544_v35 }
 0x2c2   : > { %v5900_v38 = vpop.f32.mrf.mxu0 }
 0x2c3   : > { %v5901_v51 = vadd.f32 %v5900_v38, %v5899_v50  ;;  %6202 = vmatpush3.bf16.msra.mxu0 %v6544_v35  ;;  %v6549_v38 = vld [vmem:[%s9796_s3 + $0x78] sm:$0xff]  }
 0x2c4   : > { %6203 = vmatprep.subr.bf16.mxu0 %v6545_v36  ;;  %6219 = vmatprep.subr.bf16.mxu1 %v6549_v38 }
 0x2c5   : > { %v2555_v7 = vpack.c.bf16 %v5901_v51, %v5898_v61  ;;  %v6550_v61 = vld [vmem:[%s9796_s3 + $0x70] sm:$0xff]   ;;  %6220 = vmatpush3.bf16.msra.mxu1 %v6549_v38 }
 0x2c6   : > { %6221 = vmatprep.subr.bf16.mxu1 %v6550_v61 }
 0x2c7   : > { %v6049_v8 = vpop.f32.mrf.mxu1  ;;  %6192 = vmatmul.mubr.bf16.gmra.mxu1 %v2555_v7  ;;  %6204 = vmatpush3.bf16.msra.mxu0 %v6545_v36  ;;  %v6551_v7 = vld [vmem:[%s9796_s3 + $0x68] sm:$0xff]  }
 0x2c8   : > { %v1156_v11 = vadd.f32 %v6049_v8, %v7180_v20  ;;  %6205 = vmatprep.subr.bf16.mxu0 %v6546_v39  ;;  %v2725_v8 = vlaneseq }
 0x2c9   : > { %v1135_v53 = vpop.f32.mrf.mxu1  ;;  %6222 = vmatpush3.bf16.msra.mxu1 %v6550_v61 }
 0x2ca   : > { %v1154_v55 = vadd.f32 %v1135_v53, %v7184_v21  ;;  %6223 = vmatprep.subr.bf16.mxu1 %v6551_v7  ;;  %v6552_v53 = vld [vmem:[%s9796_s3 + $0x60] sm:$0xff]  }
 0x2cb   : > { %v6050_v14 = vpop.f32.mrf.mxu1  ;;  %6206 = vmatpush3.bf16.msra.mxu0 %v6546_v39 }
 0x2cc   : > { %v1157_v63 = vadd.f32 %v6050_v14, %v7189_v26  ;;  %6207 = vmatprep.subr.bf16.mxu0 %v6547_v41  ;;  %v7464_v14 = vshrl.u32 %v2725_v8, 7 }
 0x2cd   : > { %v1138_v52 = vpop.f32.mrf.mxu1  ;;  %6224 = vmatpush3.bf16.msra.mxu1 %v6551_v7 }
 0x2ce   : > { %v1155_v0 = vadd.f32 %v1138_v52, %v891_v59  ;;  %10004 = vst [vmem:[#allocation2_spill] sm:$0xff] %v7464_v14  ;;  %6225 = vmatprep.subr.bf16.mxu1 %v6552_v53  ;;  %v6553_v59 = vld [vmem:[%s9796_s3 + $0x58] sm:$0xff]   ;;  %v2729_v52 = vadd.s32 24, %v7464_v14  ;;  %v7539_v36 = vshra.s32 %v7464_v14, 3  ;;  %v7551_v61 = vadd.s32 32, %v7464_v14 }
 0x2cf   : > { %6208 = vmatpush3.bf16.msra.mxu0 %v6547_v41 }
 0x2d1   : > { %6226 = vmatpush3.bf16.msra.mxu1 %v6552_v53 }
 0x2d2   : > { %6227 = vmatprep.subr.bf16.mxu1 %v6553_v59 }
 0x2d5   : > { %6228 = vmatpush3.bf16.msra.mxu1 %v6553_v59  ;;  %v7560_v59 = vsub.s32 2, %v7464_v14 }
 0x2d7   : > { %v6069_v12 = vpop.f32.mrf.mxu1  ;;  %10014 = vst [vmem:[#allocation12_spill] sm:$0xff] %v7560_v59 }
 0x2d8   : > { %v1408_v13 = vadd.f32 %v6069_v12, %v1152_v40  ;;  %v2728_v12 = vadd.s32 16, %v7464_v14 }
 0x2d9   : > { %v1375_v9 = vpop.f32.mrf.mxu1 }
 0x2da   : > { %v1406_v10 = vadd.f32 %v1375_v9, %v1150_v43  ;;  %v6548_v43 = vld [vmem:[%s9796_s3] sm:$0xff]   ;;  %v7478_v9 = vadd.s32 8, %v7464_v14 }
 0x2db   : > { %v6070_v15 = vpop.f32.mrf.mxu1  ;;  %6209 = vmatprep.subr.bf16.mxu0 %v6548_v43 }
 0x2dc   : > { %v1409_v16 = vadd.f32 %v6070_v15, %v1153_v46  ;;  %6210 = vmatpush3.bf16.msra.mxu0 %v6548_v43  ;;  %10005 = vst [vmem:[#allocation3_spill] sm:$0xff] %v7478_v9  ;;  %v7484_v15 = vsub.s32 1, %v7464_v14  ;;  %v2743_v39 = vand.u32 7, %v7478_v9  ;;  %v7546_v43 = vadd.s32 48, %v7464_v14 }
 0x2dd   : > { %v1378_v54 = vpop.f32.mrf.mxu1 }
 0x2de   : > { %v7372_v1 = vadd.f32 %v1378_v54, %v1151_v49  ;;  %10006 = vst [vmem:[#allocation4_spill] sm:$0xff] %v7484_v15 }
 0x2e7   : > { %v6073_v20 = vpop.f32.mrf.mxu1 }
 0x2e8   : > { %v7374_v56 = vadd.f32 %v6073_v20, %v1156_v11  ;;  %v7494_v20 = vld [vmem:[%s9797_s4] sm:$0xff] }
 0x2e9   : > { %v1391_v21 = vpop.f32.mrf.mxu1  ;;  %v7519_v32 = vrot.slane %v7494_v20, %v7484_v15 }
 0x2ea   : > { %v1410_v18 = vadd.f32 %v1391_v21, %v1154_v55  ;;  %v7497_v21 = vsub.s32 7, %v7464_v14 }
 0x2eb   : > { %v6074_v57 = vpop.f32.mrf.mxu1  ;;  %10009 = vst [vmem:[#allocation7_spill] sm:$0xff] %v7519_v32 }
 0x2ec   : > { %v7376_v28 = vadd.f32 %v6074_v57, %v1157_v63  ;;  %10008 = vst [vmem:[#allocation6_spill] sm:$0xff] %v7497_v21  ;;  %v7536_v35 = vrot.slane %v7494_v20, %v7497_v21 }
 0x2ed   : > { %v1394_v26 = vpop.f32.mrf.mxu1 }
 0x2ee   : > { %v1411_v58 = vadd.f32 %v1394_v26, %v1155_v0  ;;  %v7505_v26 = vshra.s32 %v7478_v9, 3  ;;  %10012 = vst [vmem:[#allocation10_spill] sm:$0xff] %v7536_v35  ;;  %v7567_v9 = vadd.s32 4294967295, %v2743_v39  ;;  %v7579_v35 = vadd.s32 1, %v2743_v39 }
 0x2ef   : > { %v7608_v39 = vrot.slane %v7494_v20, %v7560_v59  ;;  %v7625_v59 = vsub.s32 6, %v7464_v14 }
 0x2f0   : > { %v7526_v34 = vadd.s32 4294967295, %v7505_v26 }
 0x2f1   : > { %10020 = vst [vmem:[#allocation18_spill] sm:$0xff] %v7608_v39  ;;  %10022 = vst [vmem:[#allocation20_spill] sm:$0xff] %v7625_v59  ;;  %v2746_v39 = vand.u32 7, %v7551_v61 }
 0x2f2   : > { %vm2759_vm4 = vcmp.ge.s32.totalorder %v7526_v34, 0  ;;  %vm2767_vm5 = vcmp.lt.s32.totalorder %v7526_v34, 8  ;;  %v10044_v34 = vmov 0 }
 0x2f7   : > { %v6093_v60 = vpop.f32.mrf.mxu1 }
 0x2f8   : > { %v7378_v24 = vadd.f32 %v6093_v60, %v1408_v13  ;;  %v7475_v13 = vshra.s32 %v2729_v52, 3 }
 0x2f9   : > { %v1631_v62 = vpop.f32.mrf.mxu1 }
 0x2fa   : > { %v7380_v17 = vadd.f32 %v1631_v62, %v1406_v10  ;;  %v7481_v10 = vadd.s32 56, %v7464_v14  ;;  %v7502_v57 = vadd.s32 4294967295, %v7475_v13  ;;  %vm3063_vm6 = vcmp.ge.s32.totalorder %v7475_v13, 0 }
 0x2fb   : > { %v6094_v2 = vpop.f32.mrf.mxu1  ;;  %vm3071_vm7 = vcmp.lt.s32.totalorder %v7475_v13, 8 }
 0x2fc   : > { %v7382_v19 = vadd.f32 %v6094_v2, %v1409_v16  ;;  %v7487_v16 = vsub.s32 4, %v7464_v14  ;;  %v7514_v2 = vshra.s32 %v7481_v10, 3  ;;  %vm2761_vm0 = vcmp.ge.s32.totalorder %v7502_v57, 0  ;;  %vm7749_vm13 = vmand %vm3063_vm6, %vm3071_vm7 }
 0x2fd   : > { %v7384_v29 = vpop.f32.mrf.mxu1  ;;  %vm2769_vm1 = vcmp.lt.s32.totalorder %v7502_v57, 8  ;;  %v7725_v57 = vadd.s32 1, %v2746_v39  ;;  %v10045_v34 = vsel %vm7749_vm13, 4294967295, %v10044_v34 }
 0x2fe   : > { %10007 = vst [vmem:[#allocation5_spill] sm:$0xff] %v7487_v16  ;;  %v7509_v60 = vadd.f32 %v7384_v29, %v7372_v1  ;;  %v7523_v33 = vrot.slane %v7494_v20, %v7487_v16  ;;  %v7529_v1 = vsub.s32 0, %v7464_v14  ;;  %vm7707_vm15 = vmand %vm2761_vm0, %vm2769_vm1 }
 0x2ff   : > { %10039 = vst [vmem:[#allocation33_spill] sm:$0xff] %v7725_v57  ;;  %vm7736_vm0 = vmand %vm2759_vm4, %vm2767_vm5 }
 0x300   : > { %10010 = vst [vmem:[#allocation8_spill] sm:$0xff] %v7523_v33  ;;  %10011 = vst [vmem:[#allocation9_spill] sm:$0xff] %v7529_v1  ;;  %v7571_v21 = vrot.slane %v7494_v20, %v7529_v1  ;;  %v7622_v33 = vadd.s32 4294967295, %v7539_v36 }
 0x301   : > { %10046 = vst [vmem:[#allocation36_spill] sm:$0xff] %v10045_v34 }
 0x302   : > { %10016 = vst [vmem:[#allocation14_spill] sm:$0xff] %v7571_v21  ;;  %v7615_v21 = vadd.s32 40, %v7464_v14 }
 0x307   : > { %v7386_v22 = vpop.f32.mrf.mxu1 }
 0x309   : > { %v1647_v23 = vpop.f32.mrf.mxu1 }
 0x30a   : > { %v7388_v25 = vadd.f32 %v1647_v23, %v1410_v18  ;;  %v7499_v18 = vshra.s32 %v2728_v12, 3  ;;  %v2742_v23 = vand.u32 7, %v7464_v14 }
 0x30b   : > { %v7390_v30 = vpop.f32.mrf.mxu1 }
 0x30c   : > { %v7532_v29 = vadd.s32 1, %v7499_v18  ;;  %v7543_v41 = vadd.s32 4294967295, %v7499_v18  ;;  %v7555_v8 = vadd.s32 4294967295, %v2742_v23  ;;  %v7573_v16 = vadd.s32 1, %v2742_v23 }
 0x30d   : > { %v1650_v27 = vpop.f32.mrf.mxu1  ;;  %v1669_v15 = vadd.f32 %v7390_v30, %v7376_v28  ;;  %vm3062_vm2 = vcmp.ge.s32.totalorder %v7499_v18, 0  ;;  %vm3070_vm3 = vcmp.lt.s32.totalorder %v7499_v18, 8  ;;  %v7591_v23 = vadd.s32 4294967295, %v7514_v2 }
 0x30e   : > { %v7392_v31 = vadd.f32 %v1650_v27, %v1411_v58  ;;  %v2744_v58 = vand.u32 7, %v2728_v12  ;;  %v2745_v27 = vand.u32 7, %v2729_v52  ;;  %10013 = vst [vmem:[#allocation11_spill] sm:$0xff] %v7555_v8  ;;  %v7563_v52 = vsub.s32 3, %v7464_v14  ;;  %10017 = vst [vmem:[#allocation15_spill] sm:$0xff] %v7573_v16 }
 0x30f   : > { %v1668_v12 = vadd.f32 %v7386_v22, %v7374_v56  ;;  %v7588_v22 = vshra.s32 %v7546_v43, 3  ;;  %v7594_v28 = vsub.s32 5, %v7464_v14  ;;  %v7597_v30 = vshra.s32 %v7551_v61, 3  ;;  %vm7715_vm12 = vmand %vm3062_vm2, %vm3070_vm3 }
 0x310   : > { %v7548_v38 = vadd.s32 4294967295, %v2744_v58  ;;  %v7557_v53 = vadd.s32 4294967295, %v2745_v27  ;;  %10015 = vst [vmem:[#allocation13_spill] sm:$0xff] %v7563_v52  ;;  %v7581_v8 = vadd.s32 1, %v2744_v58  ;;  %v7583_v56 = vadd.s32 1, %v2745_v27 }
 0x311   : > { %10018 = vst [vmem:[#allocation16_spill] sm:$0xff] %v7594_v28  ;;  %10019 = vst [vmem:[#allocation17_spill] sm:$0xff] %v7597_v30  ;;  %v7604_v27 = vadd.s32 1, %v7475_v13  ;;  %v7612_v1 = vrot.slane %v7494_v20, %v7563_v52  ;;  %vm3274_vm8 = vcmp.ge.s32.totalorder %v7532_v29, 0  ;;  %vm3282_vm9 = vcmp.lt.s32.totalorder %v7532_v29, 8 }
 0x312   : > { %vm2760_vm10 = vcmp.ge.s32.totalorder %v7543_v41, 0  ;;  %vm2768_vm11 = vcmp.lt.s32.totalorder %v7543_v41, 8  ;;  %vm9837_vm3 = vcmp.lt.s32.totalorder %v7581_v8, 8  ;;  %vm7770_vm6 = vmand %vm3274_vm8, %vm3282_vm9  ;;  %v10054_v29 = vmov 0 }
 0x313   : > { %10021 = vst [vmem:[#allocation19_spill] sm:$0xff] %v7612_v1  ;;  %v7639_v1 = vadd.s32 1, %v7505_v26  ;;  %vm7783_vm1 = vmand %vm2760_vm10, %vm2768_vm11  ;;  %vm10059_vm11 = vcmp.lt.s32.totalorder %v7539_v36, 8  ;;  %vm10060_vm8 = vcmp.ge.s32.totalorder %v7539_v36, 0  ;;  %vm10064_vm7 = vcmp.ge.s32.totalorder %v7548_v38, 0 }
 0x314   : > { %v10055_v29 = vsel %vm7783_vm1, 4294967295, %v10054_v29  ;;  %vm7806_vm9 = vmand %vm10060_vm8, %vm10059_vm11  ;;  %vm10070_vm8 = vcmp.ge.s32.totalorder %v7557_v53, 0  ;;  %vm10082_vm11 = vcmp.lt.s32.totalorder %v7579_v35, 8 }
 0x315   : > { %10056 = vst [vmem:[#allocation42_spill] sm:$0xff] %v10055_v29  ;;  %vm7819_vm10 = vmand %vm7783_vm1, %vm10064_vm7  ;;  %vm10077_vm4 = vcmp.lt.s32.totalorder %v7639_v1, 8 }
 0x316   : > { %vm7837_vm7 = vmand %vm7707_vm15, %vm10070_vm8  ;;  %vm10078_vm8 = vcmp.ge.s32.totalorder %v7639_v1, 0 }
 0x317   : > { %v7409_v37 = vpop.f32.mrf.mxu1  ;;  %vm7855_vm14 = vmand %vm10078_vm8, %vm10077_vm4  ;;  %vm10090_vm8 = vcmp.lt.s32.totalorder %v7583_v56, 8 }
 0x318   : > { %v1920_v16 = vadd.f32 %v7409_v37, %v7378_v24  ;;  %v7633_v24 = vadd.s32 4294967295, %v7588_v22  ;;  %v7636_v37 = vadd.s32 1, %v7539_v36  ;;  %vm7869_vm5 = vmand %vm7736_vm0, %vm10082_vm11 }
 0x319   : > { %v7414_v40 = vpop.f32.mrf.mxu1  ;;  %vm7886_vm4 = vmand %vm7783_vm1, %vm9837_vm3  ;;  %vm10098_vm3 = vcmp.ge.s32.totalorder %v7591_v23, 0 }
 0x31a   : > { %v1918_v52 = vadd.f32 %v7414_v40, %v7380_v17  ;;  %10023 = vst [vmem:[#allocation21_spill] sm:$0xff] %v7633_v24  ;;  %10024 = vst [vmem:[#allocation22_spill] sm:$0xff] %v7636_v37  ;;  %v7648_v17 = vrot.slane %v7494_v20, %v7594_v28  ;;  %v7651_v40 = vadd.s32 4294967295, %v7597_v30 }
 0x31b   : > { %v7419_v42 = vpop.f32.mrf.mxu1  ;;  %vm7899_vm2 = vmand %vm7707_vm15, %vm10090_vm8  ;;  %vm10097_vm8 = vcmp.lt.s32.totalorder %v7591_v23, 8 }
 0x31c   : > { %v1921_v32 = vadd.f32 %v7419_v42, %v7382_v19  ;;  %10025 = vst [vmem:[#allocation23_spill] sm:$0xff] %v7648_v17  ;;  %10026 = vst [vmem:[#allocation24_spill] sm:$0xff] %v7651_v40  ;;  %v7660_v19 = vshra.s32 %v7615_v21, 3  ;;  %v2747_v42 = vand.u32 7, %v7615_v21 }
 0x31d   : > { %v7424_v3 = vpop.f32.mrf.mxu1  ;;  %vm7920_vm11 = vmand %vm10098_vm3, %vm10097_vm8  ;;  %vm10108_vm8 = vcmp.lt.s32.totalorder %v7505_v26, 8 }
 0x31e   : > { %v1919_v37 = vadd.f32 %v7424_v3, %v7509_v60  ;;  %10028 = vst [vmem:[#allocation26_spill] sm:$0xff] %v7660_v19  ;;  %v7668_v3 = vrot.slane %v7494_v20, %v7625_v59  ;;  %v7670_v60 = vadd.s32 4294967295, %v2746_v39  ;;  %v10089_v59 = vld [vmem:[#allocation11_spill] sm:$0xff] }
 0x320   : > { %10029 = vst [vmem:[#allocation27_spill] sm:$0xff] %v7668_v3  ;;  %v10110_v3 = vmov 0 }
 0x327   : > { %v7426_v44 = vpop.f32.mrf.mxu1 }
 0x328   : > { %v1924_v17 = vadd.f32 %v7426_v44, %v1668_v12 }
 0x329   : > { %v7428_v4 = vpop.f32.mrf.mxu1 }
 0x32a   : > { %v1922_v40 = vadd.f32 %v7428_v4, %v7388_v25  ;;  %v7690_v25 = vadd.s32 1, %v7514_v2 }
 0x32b   : > { %v7430_v45 = vpop.f32.mrf.mxu1 }
 0x32c   : > { %10030 = vst [vmem:[#allocation28_spill] sm:$0xff] %v7690_v25  ;;  %v1925_v44 = vadd.f32 %v7430_v45, %v1669_v15  ;;  %v10032_v45 = vmov 0 }
 0x32d   : > { %v7432_v46 = vpop.f32.mrf.mxu1  ;;  %v10033_v45 = vsel %vm7707_vm15, 4294967295, %v10032_v45 }
 0x32e   : > { %v1923_v4 = vadd.f32 %v7432_v46, %v7392_v31  ;;  %10034 = vst [vmem:[#allocation30_spill] sm:$0xff] %v10033_v45  ;;  %v10035_v46 = vmov 0 }
 0x32f   : > { %v10036_v46 = vsel %vm7715_vm12, 4294967295, %v10035_v46 }
 0x330   : > { %10037 = vst [vmem:[#allocation31_spill] sm:$0xff] %v10036_v46 }
 0x337   : > { %v7434_v47 = vpop.f32.mrf.mxu1 }
 0x338   : > { %v2176_v61 = vadd.f32 %v7434_v47, %v1920_v16  ;;  %v2749_v47 = vand.u32 7, %v7481_v10  ;;  %v7678_v10 = vld [vmem:[%s9798_s5] ss:$0 sm:$0xff] }
 0x339   : > { %v7436_v5 = vpop.f32.mrf.mxu1 }
 0x33a   : > { %v2174_v16 = vadd.f32 %v7436_v5, %v1918_v52  ;;  %v2748_v5 = vand.u32 7, %v7546_v43  ;;  %v7723_v15 = vadd.s32 4294967295, %v2749_v47 }
 0x33b   : > { %v7438_v48 = vpop.f32.mrf.mxu1 }
 0x33c   : > { %v2177_v20 = vadd.f32 %v7438_v48, %v1921_v32  ;;  %v7696_v48 = vadd.s32 4294967295, %v2747_v42  ;;  %10038 = vst [vmem:[#allocation32_spill] sm:$0xff] %v7723_v15 }
 0x33d   : > { %v7440_v49 = vpop.f32.mrf.mxu1 }
 0x33e   : > { %v2175_v32 = vadd.f32 %v7440_v49, %v1919_v37 }
 0x347   : > { %v7442_v6 = vpop.f32.mrf.mxu1 }
 0x349   : > { %v7444_v50 = vpop.f32.mrf.mxu1 }
 0x34b   : > { %v7452_v51 = vpop.f32.mrf.mxu1 }
 0x34d   : > { %v7457_v11 = vpop.f32.mrf.mxu1 }
 0x357   : > { %v7462_v55 = vpop.f32.mrf.mxu1 }
 0x358   : > { %v2432_v28 = vadd.f32 %v7462_v55, %v2176_v61  ;;  %v7682_v55 = vadd.s32 4294967295, %v7660_v19 }
 0x359   : > { %v7469_v63 = vpop.f32.mrf.mxu1 }
 0x35a   : > { %v2430_v21 = vadd.f32 %v7469_v63, %v2174_v16  ;;  %v7698_v63 = vadd.s32 1, %v2749_v47  ;;  %v10041_v16 = vmov 0 }
 0x35b   : > { %v7472_v0 = vpop.f32.mrf.mxu1  ;;  %v10042_v16 = vsel %vm7736_vm0, 4294967295, %v10041_v16 }
 0x35c   : > { %10031 = vst [vmem:[#allocation29_spill] sm:$0xff] %v7698_v63  ;;  %v2433_v12 = vadd.f32 %v7472_v0, %v2177_v20  ;;  %v7721_v0 = vadd.s32 4294967295, %v2748_v5  ;;  %10043 = vst [vmem:[#allocation35_spill] sm:$0xff] %v10042_v16  ;;  %v7756_v20 = vadd.s32 1, %v2747_v42 }
 0x35d   : > { %v7489_v54 = vpop.f32.mrf.mxu1 }
 0x35e   : > { %v2431_v18 = vadd.f32 %v7489_v54, %v2175_v32  ;;  %v2180_v54 = vadd.f32 %v7442_v6, %v1924_v17  ;;  %10047 = vst [vmem:[#allocation37_spill] sm:$0xff] %v7756_v20  ;;  %v7758_v6 = vadd.s32 1, %v2748_v5  ;;  %v7761_v17 = vadd.s32 1, %v7597_v30  ;;  %v10107_v20 = vld [vmem:[#allocation15_spill] sm:$0xff]  ;;  %v10140_v30 = vld [vmem:[#allocation22_spill] sm:$0xff] }
 0x35f   : > { %v2178_v5 = vadd.f32 %v7444_v50, %v1922_v40  ;;  %v2181_v32 = vadd.f32 %v7452_v51, %v1925_v44  ;;  %v10061_v40 = vmov 0 }
 0x360   : > { %10048 = vst [vmem:[#allocation38_spill] sm:$0xff] %v7758_v6  ;;  %10049 = vst [vmem:[#allocation39_spill] sm:$0xff] %v7761_v17  ;;  %v10062_v40 = vsel %vm7806_vm9, 4294967295, %v10061_v40  ;;  %v10095_v17 = vld [vmem:[#allocation10_spill] sm:$0xff] }
 0x361   : > { %10063 = vst [vmem:[#allocation45_spill] sm:$0xff] %v10062_v40 }
 0x367   : > { %v7511_v62 = vpop.f32.mrf.mxu1 }
 0x368   : > { %v2436_v50 = vadd.f32 %v7511_v62, %v2180_v54  ;;  %v10074_v54 = vld [vmem:[#allocation8_spill] sm:$0xff] }
 0x369   : > { %v7553_v7 = vpop.f32.mrf.mxu1 }
 0x36a   : > { %v2434_v62 = vadd.f32 %v7553_v7, %v2178_v5  ;;  %v10069_v7 = vld [vmem:[#allocation7_spill] sm:$0xff] }
 0x36b   : > { %v7599_v58 = vpop.f32.mrf.mxu1 }
 0x36c   : > { %v7812_v44 = vadd.f32 %v7599_v58, %v2181_v32  ;;  %v10079_v32 = vmov 0 }
 0x36d   : > { %v7655_v24 = vpop.f32.mrf.mxu1  ;;  %v10080_v32 = vsel %vm7855_vm14, 4294967295, %v10079_v32 }
 0x36e   : > { %10027 = vst [vmem:[#allocation25_spill] sm:$0xff] %v7655_v24  ;;  %10081 = vst [vmem:[#allocation8_spill] sm:$0xff] %v10080_v32 }
 0x375   : > { %v10068_v36 = vld [vmem:[#allocation25_spill] sm:$0xff] }
 0x377   : > { %v6189_v24 = vpop.f32.mrf.mxu1 }
 0x378   : > { %v2688_v52 = vadd.f32 %v6189_v24, %v2432_v28  ;;  %v7728_v24 = vadd.s32 1, %v7660_v19 }
 0x379   : > { %v2655_v43 = vpop.f32.mrf.mxu1 }
 0x37a   : > { %v2701_v28 = vadd.f32 %v7678_v10, %v2688_v52  ;;  %v2686_v31 = vadd.f32 %v2655_v43, %v2430_v21  ;;  %10040 = vst [vmem:[#allocation34_spill] sm:$0xff] %v7728_v24  ;;  %v10051_v43 = vmov 0 }
 0x37b   : > { %v6190_v49 = vpop.f32.mrf.mxu1  ;;  %v10052_v43 = vsel %vm7770_vm6, 4294967295, %v10051_v43 }
 0x37c   : > { %v2709_v37 = vmax.f32 %v2701_v28, 0.0  ;;  %v2699_v61 = vadd.f32 %v7678_v10, %v2686_v31  ;;  %v2689_v47 = vadd.f32 %v6190_v49, %v2433_v12  ;;  %10053 = vst [vmem:[#allocation41_spill] sm:$0xff] %v10052_v43  ;;  %v2179_v12 = vadd.f32 %v7457_v11, %v1923_v4 }
 0x37d   : > { %v2658_v39 = vpop.f32.mrf.mxu1  ;;  %v7790_v28 = vadd.s32 1, %v7588_v22  ;;  %v10065_v49 = vmov 0 }
 0x37e   : > { %v7763_v21 = vmin.f32 %v2709_v37, 6.0  ;;  %v2707_v13 = vmax.f32 %v2699_v61, 0.0  ;;  %v2702_v52 = vadd.f32 %v7678_v10, %v2689_v47  ;;  %v2687_v42 = vadd.f32 %v2658_v39, %v2431_v18 }
 0x37f   : > { %10057 = vst [vmem:[#allocation43_spill] sm:$0xff] %v7790_v28  ;;  %v10066_v49 = vsel %vm7819_vm10, 4294967295, %v10065_v49  ;;  %v7824_v18 = vadd.f32 %v10068_v36, %v2179_v12  ;;  %v10071_v47 = vmov 0  ;;  %v10086_v12 = vmov 0 }
 0x380   : > { %10050 = vst [vmem:[#allocation40_spill] sm:$0xff] %v7763_v21  ;;  %v2934_v51 = vsel %vm7707_vm15, %v7763_v21, 0.0  ;;  %v3178_v11 = vsel %vm7715_vm12, %v7763_v21, 0.0  ;;  %v7799_v41 = vmin.f32 %v2707_v13, 6.0  ;;  %v2710_v4 = vmax.f32 %v2702_v52, 0.0  ;;  %10067 = vst [vmem:[#allocation46_spill] sm:$0xff] %v10066_v49 }
 0x381   : > { %v2700_v31 = vadd.f32 %v7678_v10, %v2687_v42  ;;  %v2784_v37 = vrot.slane %v7763_v21, 7  ;;  %v7828_v61 = vmul.f32 %v10069_v7, %v2934_v51  ;;  %v10072_v47 = vsel %vm7837_vm7, 4294967295, %v10071_v47  ;;  %v10076_v42 = vld [vmem:[#allocation21_spill] sm:$0xff] }
 0x382   : > { %10058 = vst [vmem:[#allocation44_spill] sm:$0xff] %v7799_v41  ;;  %v2932_v58 = vsel %vm7736_vm0, %v7799_v41, 0.0  ;;  %10073 = vst [vmem:[#allocation25_spill] sm:$0xff] %v10072_v47  ;;  %v7842_v39 = vmul.f32 %v10074_v54, %v3178_v11  ;;  %v7844_v13 = vmin.f32 %v2710_v4, 6.0  ;;  %v3176_v5 = vsel %vm7806_vm9, %v7799_v41, 0.0 }
 0x383   : > { %v2708_v52 = vmax.f32 %v2700_v31, 0.0  ;;  %v7861_v51 = vmul.f32 %v10069_v7, %v2932_v58  ;;  %v2961_v4 = vrot.slane %v7763_v21, 1  ;;  %v10083_v31 = vmov 0 }
 0x384   : > { %10075 = vst [vmem:[#allocation7_spill] sm:$0xff] %v7844_v13  ;;  %v10084_v31 = vsel %vm7869_vm5, 4294967295, %v10083_v31  ;;  %v3179_v36 = vsel %vm7749_vm13, %v7844_v13, 0.0  ;;  %v3390_v58 = vsel %vm7770_vm6, %v7844_v13, 0.0  ;;  %v10087_v12 = vsel %vm7886_vm4, 4294967295, %v10086_v12 }
 0x385   : > { %10085 = vst [vmem:[#allocation21_spill] sm:$0xff] %v10084_v31  ;;  %v7880_v11 = vmin.f32 %v2708_v52, 6.0  ;;  %10088 = vst [vmem:[#allocation47_spill] sm:$0xff] %v10087_v12  ;;  %v7891_v1 = vmul.f32 %v10074_v54, %v3179_v36  ;;  %v10091_v52 = vmov 0  ;;  %v7904_v24 = vmul.f32 %v10074_v54, %v3176_v5 }
 0x386   : > { %v10092_v52 = vsel %vm7899_vm2, 4294967295, %v10091_v52  ;;  %v3389_v36 = vsel %vm7855_vm14, %v7763_v21, 0.0  ;;  %v7910_v25 = vmul.f32 %v10095_v17, %v3390_v58  ;;  %v10099_v5 = vmov 0 }
 0x387   : > { %10093 = vst [vmem:[#allocation11_spill] sm:$0xff] %v10092_v52  ;;  %10094 = vst [vmem:[#allocation48_spill] sm:$0xff] %v7904_v24  ;;  %v2783_v28 = vrot.slane %v7880_v11, 7  ;;  %v2933_v45 = vsel %vm7783_vm1, %v7880_v11, 0.0  ;;  %v6193_v6 = vpop.f32.mrf.mxu1  ;;  %v10100_v5 = vsel %vm7920_vm11, 4294967295, %v10099_v5  ;;  %v2960_v21 = vrot.slane %v7880_v11, 1 }
 0x388   : > { %10096 = vst [vmem:[#allocation10_spill] sm:$0xff] %v7910_v25  ;;  %10101 = vst [vmem:[#allocation49_spill] sm:$0xff] %v10100_v5  ;;  %v10102_v58 = vrot.slane %v7844_v13, 7  ;;  %vm10103_vm15 = vcmp.lt.s32.totalorder %v7464_v14, 1  ;;  %v2945_v29 = vmul.f32 %v10069_v7, %v2933_v45  ;;  %v2692_v24 = vadd.f32 %v6193_v6, %v2436_v50 }
 0x389   : > { %v10104_v19 = vrot.slane %v7844_v13, 1  ;;  %vm10105_vm1 = vcmp.lt.s32.totalorder %v7464_v14, 7  ;;  %vm10109_vm6 = vcmp.ge.s32.totalorder %v7505_v26, 0  ;;  %vm10114_vm9 = vcmp.ge.s32.totalorder %v7604_v27, 0 }
 0x38a   : > { %v7929_v25 = vsel %vm10103_vm15, %v2784_v37, %v10102_v58  ;;  %vm7943_vm14 = vmand %vm10109_vm6, %vm10108_vm8  ;;  %v2671_v58 = vpop.f32.mrf.mxu1  ;;  %vm10113_vm15 = vcmp.lt.s32.totalorder %v7604_v27, 8  ;;  %v10115_v45 = vmov 0  ;;  %v10119_v6 = vrot.slane %v7799_v41, 7 }
 0x38b   : > { %v7936_v23 = vsel %vm10105_vm1, %v2961_v4, %v10104_v19  ;;  %v10111_v3 = vsel %vm7943_vm14, 4294967295, %v10110_v3  ;;  %vm7951_vm0 = vmand %vm10114_vm9, %vm10113_vm15  ;;  %vm10118_vm1 = vcmp.lt.s32.totalorder %v7464_v14, 1  ;;  %vm10121_vm8 = vcmp.lt.s32.totalorder %v7464_v14, 7 }
 0x38c   : > { %10106 = vst [vmem:[#allocation50_spill] sm:$0xff] %v7936_v23  ;;  %10112 = vst [vmem:[#allocation15_spill] sm:$0xff] %v10111_v3  ;;  %v10116_v45 = vsel %vm7951_vm0, 4294967295, %v10115_v45  ;;  %v7957_v19 = vsel %vm10118_vm1, %v2783_v28, %v2784_v37  ;;  %v7967_v50 = vsel %vm10121_vm8, %v2960_v21, %v2961_v4  ;;  %v10123_v27 = vrot.slane %v7799_v41, 1 }
 0x38d   : > { %10117 = vst [vmem:[#allocation51_spill] sm:$0xff] %v10116_v45  ;;  %vm10120_vm6 = vmmov %vm10118_vm1  ;;  %v2705_v57 = vadd.f32 %v7678_v10, %v2692_v24  ;;  %v2690_v37 = vadd.f32 %v2671_v58, %v2434_v62  ;;  %vm10126_vm15 = vcmp.lt.s32.totalorder %v7622_v33, 8  ;;  %vm10127_vm1 = vcmp.ge.s32.totalorder %v7622_v33, 0  ;;  %v10259_v45 = vld [vmem:[#allocation26_spill] sm:$0xff] }
 0x38e   : > { %v7963_v26 = vsel %vm10120_vm6, %v10119_v6, %v2783_v28  ;;  %10122 = vst [vmem:[#allocation52_spill] sm:$0xff] %v7967_v50  ;;  %vm10124_vm9 = vmmov %vm10121_vm8  ;;  %v10128_v28 = vmov 0  ;;  %v6194_v6 = vpop.f32.mrf.mxu1  ;;  %v3034_v58 = vsel %vm7886_vm4, %v7967_v50, 0.0  ;;  %vm10132_vm6 = vcmp.ge.s32.totalorder %v7567_v9, 0 }
 0x38f   : > { %v7973_v63 = vsel %vm10124_vm9, %v10123_v27, %v2960_v21  ;;  %vm7980_vm3 = vmand %vm10127_vm1, %vm10126_vm15  ;;  %v2857_v4 = vsel %vm7819_vm10, %v7963_v26, 0.0  ;;  %v2858_v21 = vsel %vm7837_vm7, %v7957_v19, 0.0  ;;  %v10131_v27 = vld [vmem:[#allocation14_spill] sm:$0xff]  ;;  %v10133_v47 = vmov 0 }
 0x390   : > { %10125 = vst [vmem:[#allocation53_spill] sm:$0xff] %v7973_v63  ;;  %v10129_v28 = vsel %vm7980_vm3, 4294967295, %v10128_v28  ;;  %v2869_v24 = vmul.f32 %v10131_v27, %v2857_v4  ;;  %v2870_v62 = vmul.f32 %v10131_v27, %v2858_v21  ;;  %v3033_v33 = vsel %vm7869_vm5, %v7973_v63, 0.0  ;;  %vm8002_vm8 = vmand %vm7943_vm14, %vm10132_vm6 }
 0x391   : > { %10130 = vst [vmem:[#allocation54_spill] sm:$0xff] %v10129_v28  ;;  %v10134_v47 = vsel %vm8002_vm8, 4294967295, %v10133_v47  ;;  %v2713_v49 = vmax.f32 %v2705_v57, 0.0  ;;  %v2703_v4 = vadd.f32 %v7678_v10, %v2690_v37  ;;  %v2693_v21 = vadd.f32 %v6194_v6, %v7812_v44  ;;  %v2674_v57 = vpop.f32.mrf.mxu1  ;;  %v10141_v6 = vld [vmem:[#allocation18_spill] sm:$0xff] }
 0x392   : > { %10135 = vst [vmem:[#allocation14_spill] sm:$0xff] %v10134_v47  ;;  %v3035_v31 = vsel %vm7899_vm2, %v7936_v23, 0.0  ;;  %vm10136_vm9 = vcmp.ge.s32.totalorder %v7557_v53, 0  ;;  %v10137_v12 = vmov 0  ;;  %v2953_v37 = vadd.f32 %v2945_v29, %v2869_v24 }
 0x393   : > { %vm8015_vm15 = vmand %vm7749_vm13, %vm10136_vm9  ;;  %v2954_v44 = vadd.f32 %v7828_v61, %v2870_v62  ;;  %v3046_v15 = vmul.f32 %v10141_v6, %v3034_v58  ;;  %vm10142_vm5 = vcmp.ge.s32.totalorder %v7548_v38, 0  ;;  %v10143_v52 = vmov 0 }
 0x394   : > { %v10138_v12 = vsel %vm8015_vm15, 4294967295, %v10137_v12  ;;  %vm8027_vm2 = vmand %vm7715_vm12, %vm10142_vm5  ;;  %v8032_v23 = vmul.f32 %v10095_v17, %v3389_v36  ;;  %v8034_v50 = vmin.f32 %v2713_v49, 6.0  ;;  %v2711_v63 = vmax.f32 %v2703_v4, 0.0 }
 0x395   : > { %10139 = vst [vmem:[#allocation55_spill] sm:$0xff] %v10138_v12  ;;  %v10144_v52 = vsel %vm8027_vm2, 4294967295, %v10143_v52  ;;  %v2706_v29 = vadd.f32 %v7678_v10, %v2693_v21  ;;  %v2691_v61 = vadd.f32 %v2674_v57, %v7824_v18  ;;  %vm10147_vm9 = vcmp.lt.s32.totalorder %v10076_v42, 8 }
 0x396   : > { %10145 = vst [vmem:[#allocation22_spill] sm:$0xff] %v10144_v52  ;;  %10146 = vst [vmem:[#allocation18_spill] sm:$0xff] %v8032_v23  ;;  %vm10148_vm1 = vcmp.ge.s32.totalorder %v10076_v42, 0  ;;  %v10149_v24 = vmov 0  ;;  %vm10152_vm5 = vcmp.ge.s32.totalorder %v10089_v59, 0  ;;  %v10153_v49 = vmov 0 }
 0x397   : > { %vm8042_vm6 = vmand %vm10148_vm1, %vm10147_vm9  ;;  %v8055_v36 = vmul.f32 %v10141_v6, %v3033_v33  ;;  %v3047_v18 = vmul.f32 %v10141_v6, %v3035_v31  ;;  %v3054_v62 = vadd.f32 %v3046_v15, %v2953_v37  ;;  %v3119_v42 = vsel %vm8015_vm15, %v7929_v25, 0.0 }
 0x398   : > { %v10150_v24 = vsel %vm8042_vm6, 4294967295, %v10149_v24  ;;  %vm8050_vm4 = vmand %vm7980_vm3, %vm10152_vm5  ;;  %v2938_v58 = vsel %vm7920_vm11, %v8034_v50, 0.0  ;;  %v8064_v4 = vmin.f32 %v2711_v63, 6.0  ;;  %vm10157_vm1 = vcmp.ge.s32.totalorder %v7567_v9, 0 }
 0x399   : > { %10151 = vst [vmem:[#allocation56_spill] sm:$0xff] %v10150_v24  ;;  %v10154_v49 = vsel %vm8050_vm4, 4294967295, %v10153_v49  ;;  %vm10158_vm9 = vnez %v10042_v16  ;;  %v10159_v33 = vmov 0  ;;  %v3117_v15 = vsel %vm8002_vm8, %v7963_v26, 0.0  ;;  %v10173_v16 = vld [vmem:[#allocation19_spill] sm:$0xff] }
 0x39a   : > { %10155 = vst [vmem:[#allocation57_spill] sm:$0xff] %v10154_v49  ;;  %10156 = vst [vmem:[#allocation58_spill] sm:$0xff] %v8064_v4  ;;  %v3118_v31 = vsel %vm8027_vm2, %v7957_v19, 0.0  ;;  %v8082_v63 = vmul.f32 %v10069_v7, %v2938_v58  ;;  %v2714_v57 = vmax.f32 %v2706_v29, 0.0  ;;  %v2704_v37 = vadd.f32 %v7678_v10, %v2691_v61 }
 0x39b   : > { %vm8070_vm5 = vmand %vm10158_vm9, %vm10157_vm1  ;;  %vm10163_vm1 = vcmp.lt.s32.totalorder %v10107_v20, 8  ;;  %v10164_v12 = vmov 0  ;;  %v2963_v52 = vrot.slane %v8064_v4, 1  ;;  %v3391_v58 = vsel %vm7951_vm0, %v8064_v4, 0.0 }
 0x39c   : > { %v10160_v33 = vsel %vm8070_vm5, 4294967295, %v10159_v33  ;;  %10162 = vst [vmem:[#allocation60_spill] sm:$0xff] %v8082_v63  ;;  %vm8089_vm15 = vmand %vm7980_vm3, %vm10163_vm1  ;;  %v3055_v21 = vadd.f32 %v3047_v18, %v2954_v44  ;;  %vm10167_vm8 = vcmp.ge.s32.totalorder %v10089_v59, 0  ;;  %vm10168_vm2 = vnez %v10062_v40 }
 0x39d   : > { %10161 = vst [vmem:[#allocation59_spill] sm:$0xff] %v10160_v33  ;;  %v10165_v12 = vsel %vm8089_vm15, 4294967295, %v10164_v12  ;;  %vm8102_vm7 = vmand %vm10168_vm2, %vm10167_vm8  ;;  %v10169_v10 = vmov 0  ;;  %v8107_v29 = vmul.f32 %v10095_v17, %v3391_v58  ;;  %v8109_v61 = vmin.f32 %v2714_v57, 6.0 }
 0x39e   : > { %10166 = vst [vmem:[#allocation61_spill] sm:$0xff] %v10165_v12  ;;  %v10170_v10 = vsel %vm8102_vm7, 4294967295, %v10169_v10  ;;  %v2712_v47 = vmax.f32 %v2704_v37, 0.0  ;;  %v8112_v63 = vmul.f32 %v10173_v16, %v3117_v15  ;;  %vm8118_vm10 = vmand %vm10168_vm2, %vm10163_vm1  ;;  %v10174_v44 = vmov 0 }
 0x39f   : > { %10171 = vst [vmem:[#allocation62_spill] sm:$0xff] %v10170_v10  ;;  %10172 = vst [vmem:[#allocation63_spill] sm:$0xff] %v8107_v29  ;;  %v10175_v44 = vsel %vm8118_vm10, 4294967295, %v10174_v44  ;;  %v10177_v18 = vrot.slane %v8064_v4, 7  ;;  %v10178_v23 = vrot.slane %v7844_v13, 7  ;;  %vm10179_vm8 = vcmp.lt.s32.totalorder %v7464_v14, 1 }
 0x3a0   : > { %10176 = vst [vmem:[#allocation19_spill] sm:$0xff] %v10175_v44  ;;  %v3130_v37 = vmul.f32 %v10173_v16, %v3118_v31  ;;  %v3131_v15 = vmul.f32 %v10173_v16, %v3119_v42  ;;  %v3177_v58 = vsel %vm7943_vm14, %v7880_v11, 0.0  ;;  %vm10180_vm1 = vcmp.lt.s32.totalorder %v7579_v35, 8  ;;  %v10190_v4 = vld [vmem:[#allocation24_spill] sm:$0xff]  ;;  %v10237_v44 = vld [vmem:[#allocation23_spill] sm:$0xff] }
 0x3a1   : > { %v8128_v57 = vsel %vm10179_vm8, %v10178_v23, %v10177_v18  ;;  %vm8139_vm2 = vmand %vm7943_vm14, %vm10180_vm1  ;;  %v10181_v40 = vmov 0  ;;  %v2789_v29 = vrot.slane %v8109_v61, 7  ;;  %v2931_v23 = vsel %vm7980_vm3, %v8109_v61, 0.0 }
 0x3a2   : > { %v10182_v40 = vsel %vm8139_vm2, 4294967295, %v10181_v40  ;;  %v10184_v31 = vrot.slane %v7844_v13, 1  ;;  %vm10185_vm8 = vcmp.lt.s32.totalorder %v7464_v14, 7  ;;  %vm10186_vm9 = vcmp.lt.s32.totalorder %v7581_v8, 8 }
 0x3a3   : > { %10183 = vst [vmem:[#allocation64_spill] sm:$0xff] %v10182_v40  ;;  %vm8158_vm1 = vmand %vm7715_vm12, %vm10186_vm9  ;;  %v10187_v3 = vmov 0  ;;  %v2943_v42 = vmul.f32 %v10069_v7, %v2931_v23  ;;  %v8165_v28 = vmin.f32 %v2712_v47, 6.0  ;;  %v3138_v13 = vadd.f32 %v3130_v37, %v3054_v62 }
 0x3a4   : > { %v8152_v18 = vsel %vm10185_vm8, %v10184_v31, %v2963_v52  ;;  %v10188_v3 = vsel %vm8158_vm1, 4294967295, %v10187_v3  ;;  %v3139_v5 = vadd.f32 %v3131_v15, %v3055_v21  ;;  %vm10191_vm8 = vcmp.lt.s32.totalorder %v7583_v56, 8 }
 0x3a5   : > { %10189 = vst [vmem:[#allocation65_spill] sm:$0xff] %v10188_v3  ;;  %vm8171_vm11 = vmand %vm7749_vm13, %vm10191_vm8  ;;  %v10192_v31 = vmov 0  ;;  %v10195_v46 = vrot.slane %v8034_v50, 7  ;;  %vm10196_vm3 = vcmp.lt.s32.totalorder %v7464_v14, 1  ;;  %v10197_v62 = vrot.slane %v7799_v41, 7 }
 0x3a6   : > { %v10193_v31 = vsel %vm8171_vm11, 4294967295, %v10192_v31  ;;  %vm10198_vm12 = vmmov %vm10196_vm3  ;;  %v10200_v37 = vrot.slane %v7799_v41, 1  ;;  %v10201_v15 = vrot.slane %v8109_v61, 1  ;;  %vm10202_vm8 = vcmp.lt.s32.totalorder %v7464_v14, 7 }
 0x3a7   : > { %10194 = vst [vmem:[#allocation24_spill] sm:$0xff] %v10193_v31  ;;  %v8181_v47 = vsel %vm10196_vm3, %v10195_v46, %v2789_v29  ;;  %v8187_v21 = vsel %vm10198_vm12, %v2789_v29, %v10197_v62  ;;  %v8198_v34 = vmul.f32 %v10074_v54, %v3177_v58  ;;  %vm10203_vm3 = vcmp.lt.s32.totalorder %v10140_v30, 8 }
 0x3a8   : > { %10199 = vst [vmem:[#allocation66_spill] sm:$0xff] %v8187_v21  ;;  %v8195_v23 = vsel %vm10202_vm8, %v10201_v15, %v10200_v37  ;;  %vm10204_vm9 = vcmp.ge.s32.totalorder %v10140_v30, 0  ;;  %v10205_v46 = vmov 0  ;;  %v2937_v62 = vsel %vm8042_vm6, %v8165_v28, 0.0 }
 0x3a9   : > { %vm8204_vm14 = vmand %vm10204_vm9, %vm10203_vm3  ;;  %v2855_v58 = vsel %vm8050_vm4, %v8181_v47, 0.0  ;;  %vm10208_vm8 = vcmp.ge.s32.totalorder %v10089_v59, 0  ;;  %v10209_v30 = vmov 0  ;;  %v8227_v15 = vmul.f32 %v10069_v7, %v2937_v62 }
 0x3aa   : > { %v10206_v46 = vsel %vm8204_vm14, 4294967295, %v10205_v46  ;;  %vm8221_vm9 = vmand %vm8204_vm14, %vm10208_vm8  ;;  %v2856_v29 = vsel %vm8070_vm5, %v8187_v21, 0.0  ;;  %v2867_v37 = vmul.f32 %v10131_v27, %v2855_v58  ;;  %v3032_v59 = vsel %vm8089_vm15, %v8195_v23, 0.0 }
 0x3ab   : > { %10207 = vst [vmem:[#allocation67_spill] sm:$0xff] %v10206_v46  ;;  %v10210_v30 = vsel %vm8221_vm9, 4294967295, %v10209_v30  ;;  %vm10212_vm8 = vcmp.ge.s32.totalorder %v7567_v9, 0  ;;  %vm10213_vm12 = vnez %v10080_v32  ;;  %v10214_v49 = vmov 0 }
 0x3ac   : > { %10211 = vst [vmem:[#allocation68_spill] sm:$0xff] %v10210_v30  ;;  %vm8240_vm4 = vmand %vm10213_vm12, %vm10212_vm8  ;;  %v2868_v62 = vmul.f32 %v10131_v27, %v2856_v29  ;;  %v10217_v58 = vrot.slane %v8165_v28, 1  ;;  %vm10218_vm5 = vcmp.lt.s32.totalorder %v7464_v14, 7  ;;  %v3044_v9 = vmul.f32 %v10141_v6, %v3032_v59 }
 0x3ad   : > { %v10215_v49 = vsel %vm8240_vm4, 4294967295, %v10214_v49  ;;  %v3116_v33 = vsel %vm8102_vm7, %v8187_v21, 0.0  ;;  %vm10219_vm8 = vcmp.ge.s32.totalorder %v7548_v38, 0  ;;  %vm10220_vm3 = vnez %v10052_v43  ;;  %v10228_v21 = vld [vmem:[#allocation53_spill] sm:$0xff]  ;;  %v10333_v43 = vld [vmem:[#allocation60_spill] sm:$0xff] }
 0x3ae   : > { %10216 = vst [vmem:[#allocation69_spill] sm:$0xff] %v10215_v49  ;;  %v8251_v12 = vsel %vm10218_vm5, %v2963_v52, %v10217_v58  ;;  %vm8261_vm15 = vmand %vm10220_vm3, %vm10219_vm8  ;;  %v10221_v41 = vmov 0  ;;  %v2951_v52 = vadd.f32 %v2943_v42, %v2867_v37  ;;  %v3128_v29 = vmul.f32 %v10173_v16, %v3116_v33  ;;  %v10229_v42 = vld [vmem:[#allocation52_spill] sm:$0xff] }
 0x3af   : > { %v10222_v41 = vsel %vm8261_vm15, 4294967295, %v10221_v41  ;;  %v3198_v59 = vadd.f32 %v7842_v39, %v3138_v13  ;;  %v3199_v58 = vadd.f32 %v7891_v1, %v3139_v5  ;;  %vm10224_vm5 = vcmp.ge.s32.totalorder %v7557_v53, 0  ;;  %v10230_v13 = vld [vmem:[#allocation50_spill] sm:$0xff]  ;;  %v10236_v5 = vld [vmem:[#allocation17_spill] sm:$0xff] }
 0x3b0   : > { %10223 = vst [vmem:[#allocation70_spill] sm:$0xff] %v10222_v41  ;;  %vm8274_vm7 = vmand %vm7951_vm0, %vm10224_vm5  ;;  %v10225_v38 = vmov 0  ;;  %v2952_v10 = vadd.f32 %v7861_v51, %v2868_v62  ;;  %v3236_v33 = vsel %vm8118_vm10, %v10228_v21, 0.0  ;;  %v3237_v39 = vsel %vm8139_vm2, %v10229_v42, 0.0  ;;  %v10235_v51 = vld [vmem:[#allocation32_spill] sm:$0xff]  ;;  %v10242_v21 = vld [vmem:[#allocation33_spill] sm:$0xff] }
 0x3b1   : > { %v10226_v38 = vsel %vm8274_vm7, 4294967295, %v10225_v38  ;;  %v3238_v53 = vsel %vm8158_vm1, %v10230_v13, 0.0  ;;  %vm10231_vm5 = vcmp.lt.s32.totalorder %v10107_v20, 8  ;;  %v10232_v1 = vmov 0  ;;  %v10324_v41 = vld [vmem:[#allocation7_spill] sm:$0xff] }
 0x3b2   : > { %10227 = vst [vmem:[#allocation71_spill] sm:$0xff] %v10226_v38  ;;  %vm8293_vm13 = vmand %vm8204_vm14, %vm10231_vm5  ;;  %v3052_v37 = vadd.f32 %v3044_v9, %v2951_v52  ;;  %v3239_v62 = vsel %vm8171_vm11, %v8152_v18, 0.0  ;;  %v3248_v40 = vmul.f32 %v10237_v44, %v3236_v33  ;;  %v3249_v20 = vmul.f32 %v10237_v44, %v3237_v39  ;;  %v10247_v39 = vld [vmem:[#allocation29_spill] sm:$0xff] }
 0x3b3   : > { %v10233_v1 = vsel %vm8293_vm13, 4294967295, %v10232_v1  ;;  %vm10238_vm5 = vcmp.lt.s32.totalorder %v7579_v35, 8  ;;  %v10239_v3 = vmov 0  ;;  %v3053_v9 = vadd.f32 %v8055_v36, %v2952_v10 }
 0x3b4   : > { %10234 = vst [vmem:[#allocation52_spill] sm:$0xff] %v10233_v1  ;;  %vm8309_vm2 = vmand %vm10213_vm12, %vm10238_vm5  ;;  %v3250_v52 = vmul.f32 %v10237_v44, %v3238_v53  ;;  %v3251_v31 = vmul.f32 %v10237_v44, %v3239_v62  ;;  %v3328_v33 = vsel %vm8221_vm9, %v7963_v26, 0.0  ;;  %vm10243_vm10 = vcmp.lt.s32.totalorder %v7581_v8, 8  ;;  %v10285_v1 = vld [vmem:[#allocation49_spill] sm:$0xff] }
 0x3b5   : > { %v10240_v3 = vsel %vm8309_vm2, 4294967295, %v10239_v3  ;;  %vm8324_vm5 = vmand %vm10220_vm3, %vm10243_vm10  ;;  %v10244_v35 = vmov 0  ;;  %v3136_v32 = vadd.f32 %v3128_v29, %v3052_v37  ;;  %v3329_v36 = vsel %vm8240_vm4, %v7957_v19, 0.0  ;;  %v10252_v37 = vld [vmem:[#allocation27_spill] sm:$0xff] }
 0x3b6   : > { %10241 = vst [vmem:[#allocation50_spill] sm:$0xff] %v10240_v3  ;;  %v10245_v35 = vsel %vm8324_vm5, 4294967295, %v10244_v35  ;;  %v3330_v10 = vsel %vm8261_vm15, %v7929_v25, 0.0  ;;  %v3331_v8 = vsel %vm8274_vm7, %v8128_v57, 0.0  ;;  %vm10248_vm10 = vcmp.lt.s32.totalorder %v7583_v56, 8  ;;  %v10258_v56 = vld [vmem:[#allocation37_spill] sm:$0xff] }
 0x3b7   : > { %10246 = vst [vmem:[#allocation32_spill] sm:$0xff] %v10245_v35  ;;  %vm8342_vm6 = vmand %vm7951_vm0, %vm10248_vm10  ;;  %v10249_v26 = vmov 0  ;;  %v3137_v29 = vadd.f32 %v8112_v63, %v3053_v9  ;;  %v3258_v53 = vadd.f32 %v3250_v52, %v3198_v59  ;;  %v3259_v19 = vadd.f32 %v3251_v31, %v3199_v58  ;;  %v8362_v63 = vld [vmem:[%s9797_s4 + $0x8] ss:$0 sm:$0xff]  ;;  %v10260_v31 = vld [vmem:[#allocation48_spill] sm:$0xff] }
 0x3b8   : > { %v10250_v26 = vsel %vm8342_vm6, 4294967295, %v10249_v26  ;;  %v3340_v62 = vmul.f32 %v10252_v37, %v3328_v33  ;;  %vm10253_vm8 = vcmp.lt.s32.totalorder %v10190_v4, 8  ;;  %vm10254_vm11 = vcmp.ge.s32.totalorder %v10190_v4, 0  ;;  %v10266_v33 = vld [vmem:[#allocation38_spill] sm:$0xff] }
 0x3b9   : > { %10251 = vst [vmem:[#allocation17_spill] sm:$0xff] %v10250_v26  ;;  %vm8352_vm4 = vmand %vm10254_vm11, %vm10253_vm8  ;;  %v10255_v38 = vmov 0  ;;  %v3196_v59 = vadd.f32 %v10260_v31, %v3136_v32  ;;  %v3341_v58 = vmul.f32 %v10252_v37, %v3329_v36  ;;  %v3342_v4 = vmul.f32 %v10252_v37, %v3330_v10  ;;  %v10298_v35 = vld [vmem:[#allocation58_spill] sm:$0xff] }
 0x3ba   : > { %v10256_v38 = vsel %vm8352_vm4, 4294967295, %v10255_v38  ;;  %v3343_v9 = vmul.f32 %v10252_v37, %v3331_v8  ;;  %vm10261_vm11 = vcmp.lt.s32.totalorder %v7682_v55, 8  ;;  %vm10262_vm8 = vcmp.ge.s32.totalorder %v7682_v55, 0 }
 0x3bb   : > { %10257 = vst [vmem:[#allocation23_spill] sm:$0xff] %v10256_v38  ;;  %vm8372_vm10 = vmand %vm10262_vm8, %vm10261_vm11  ;;  %v10263_v52 = vmov 0  ;;  %v3197_v49 = vadd.f32 %v8198_v34, %v3137_v29  ;;  %v3388_v32 = vsel %vm8204_vm14, %v7880_v11, 0.0  ;;  %v3448_v36 = vsel %vm8293_vm13, %v10229_v42, 0.0 }
 0x3bc   : > { %v10264_v52 = vsel %vm8372_vm10, 4294967295, %v10263_v52  ;;  %v3449_v55 = vsel %vm8309_vm2, %v10230_v13, 0.0  ;;  %vm10267_vm11 = vcmp.ge.s32.totalorder %v7670_v60, 0  ;;  %v10268_v10 = vmov 0 }
 0x3bd   : > { %10265 = vst [vmem:[#allocation33_spill] sm:$0xff] %v10264_v52  ;;  %vm8391_vm8 = vmand %vm8352_vm4, %vm10267_vm11  ;;  %v3256_v34 = vadd.f32 %v3248_v40, %v3196_v59  ;;  %v3350_v8 = vadd.f32 %v3342_v4, %v3258_v53  ;;  %v3400_v29 = vmul.f32 %v10095_v17, %v3388_v32  ;;  %v3450_v42 = vsel %vm8324_vm5, %v8152_v18, 0.0  ;;  %v10283_v32 = vld [vmem:[#allocation10_spill] sm:$0xff] }
 0x3be   : > { %v10269_v10 = vsel %vm8391_vm8, 4294967295, %v10268_v10  ;;  %vm10270_vm0 = vcmp.ge.s32.totalorder %v7696_v48, 0  ;;  %v10271_v13 = vmov 0  ;;  %v3257_v31 = vadd.f32 %v3249_v20, %v3197_v49 }
 0x3bf   : > { %vm8403_vm7 = vmand %vm8372_vm10, %vm10270_vm0  ;;  %v3451_v40 = vsel %vm8342_vm6, %v8251_v12, 0.0  ;;  %v3460_v53 = vmul.f32 %v8362_v63, %v3448_v36  ;;  %v3461_v59 = vmul.f32 %v8362_v63, %v3449_v55  ;;  %vm10274_vm11 = vcmp.ge.s32.totalorder %v7721_v0, 0 }
 0x3c0   : > { %v10272_v13 = vsel %vm8403_vm7, 4294967295, %v10271_v13  ;;  %vm10275_vm2 = vnez %v10150_v24  ;;  %v10276_v4 = vmov 0  ;;  %vm10279_vm0 = vcmp.lt.s32.totalorder %v7588_v22, 8 }
 0x3c1   : > { %10273 = vst [vmem:[#allocation29_spill] sm:$0xff] %v10272_v13  ;;  %vm8416_vm13 = vmand %vm10275_vm2, %vm10274_vm11  ;;  %vm10280_vm5 = vcmp.ge.s32.totalorder %v7588_v22, 0  ;;  %v3348_v20 = vadd.f32 %v3340_v62, %v3256_v34  ;;  %v3410_v36 = vadd.f32 %v10283_v32, %v3350_v8  ;;  %v3462_v55 = vmul.f32 %v8362_v63, %v3450_v42  ;;  %v8450_v34 = vld [vmem:[%s9798_s5 + $0x1] ss:$0 sm:$0xff]  ;;  %v10506_v22 = vld [vmem:[#allocation57_spill] sm:$0xff] }
 0x3c2   : > { %v10277_v4 = vsel %vm8416_vm13, 4294967295, %v10276_v4  ;;  %vm8424_vm9 = vmand %vm10280_vm5, %vm10279_vm0  ;;  %v3463_v3 = vmul.f32 %v8362_v63, %v3451_v40  ;;  %vm10284_vm11 = vcmp.ge.s32.totalorder %v10235_v51, 0  ;;  %vm10286_vm6 = vnez %v10285_v1 }
 0x3c3   : > { %10278 = vst [vmem:[#allocation27_spill] sm:$0xff] %v10277_v4  ;;  %vm8435_vm14 = vmand %vm10286_vm6, %vm10284_vm11  ;;  %v10287_v26 = vmov 0  ;;  %vm10290_vm5 = vcmp.lt.s32.totalorder %v7514_v2, 8  ;;  %vm10291_vm0 = vcmp.ge.s32.totalorder %v7514_v2, 0  ;;  %v3349_v62 = vadd.f32 %v3341_v58, %v3257_v31  ;;  %v10319_v4 = vld [vmem:[#allocation39_spill] sm:$0xff] }
 0x3c4   : > { %v10288_v26 = vsel %vm8435_vm14, 4294967295, %v10287_v26  ;;  %vm8443_vm15 = vmand %vm10291_vm0, %vm10290_vm5  ;;  %v3351_v8 = vadd.f32 %v3343_v9, %v3259_v19  ;;  %v10294_v42 = vrot.slane %v8034_v50, 7  ;;  %v10295_v40 = vrot.slane %v8165_v28, 7 }
 0x3c5   : > { %10289 = vst [vmem:[#allocation37_spill] sm:$0xff] %v10288_v26  ;;  %vm10296_vm11 = vcmp.lt.s32.totalorder %v7464_v14, 1  ;;  %v10299_v30 = vrot.slane %v10298_v35, 7  ;;  %v3408_v31 = vadd.f32 %v3400_v29, %v3348_v20  ;;  %v3470_v46 = vadd.f32 %v3462_v55, %v3410_v36  ;;  %v10309_v20 = vld [vmem:[#allocation63_spill] sm:$0xff] }
 0x3c6   : > { %v8458_v32 = vsel %vm10296_vm11, %v10295_v40, %v10294_v42  ;;  %v10297_v2 = vmov %v10295_v40  ;;  %vm10300_vm5 = vmmov %vm10296_vm11  ;;  %v2859_v19 = vsel %vm8391_vm8, %v7929_v25, 0.0  ;;  %v2860_v9 = vsel %vm8403_vm7, %v8128_v57, 0.0  ;;  %v10308_v25 = vld [vmem:[#allocation18_spill] sm:$0xff] }
 0x3c7   : > { %v8466_v58 = vsel %vm10300_vm5, %v10299_v30, %v10297_v2  ;;  %vm10301_vm0 = vcmp.lt.s32.totalorder %v10247_v39, 8  ;;  %v10302_v42 = vmov 0  ;;  %vm10304_vm5 = vcmp.lt.s32.totalorder %v10236_v5, 8  ;;  %v10314_v2 = vld [vmem:[#allocation28_spill] sm:$0xff] }
 0x3c8   : > { %vm8478_vm11 = vmand %vm10286_vm6, %vm10301_vm0  ;;  %vm10305_vm1 = vcmp.ge.s32.totalorder %v10236_v5, 0  ;;  %v3409_v29 = vadd.f32 %v10308_v25, %v3349_v62  ;;  %v3411_v36 = vadd.f32 %v10309_v20, %v3351_v8  ;;  %v2861_v55 = vsel %vm8416_vm13, %v8466_v58, 0.0 }
 0x3c9   : > { %v10303_v42 = vsel %vm8478_vm11, 4294967295, %v10302_v42  ;;  %vm8486_vm3 = vmand %vm10305_vm1, %vm10304_vm5  ;;  %v2862_v40 = vsel %vm8435_vm14, %v8458_v32, 0.0  ;;  %vm10310_vm0 = vcmp.lt.s32.totalorder %v10242_v21, 8  ;;  %v10311_v5 = vmov 0 }
 0x3ca   : > { %vm8502_vm1 = vmand %vm8352_vm4, %vm10310_vm0  ;;  %v3468_v62 = vadd.f32 %v3460_v53, %v3408_v31  ;;  %v3483_v8 = vadd.f32 %v8450_v34, %v3470_v46  ;;  %v2871_v25 = vmul.f32 %v10131_v27, %v2859_v19  ;;  %v2872_v20 = vmul.f32 %v10131_v27, %v2860_v9 }
 0x3cb   : > { %v10312_v5 = vsel %vm8502_vm1, 4294967295, %v10311_v5  ;;  %vm10315_vm14 = vcmp.lt.s32.totalorder %v10258_v56, 8  ;;  %v10316_v26 = vmov 0  ;;  %v3469_v13 = vadd.f32 %v3461_v59, %v3409_v29  ;;  %v10329_v29 = vld [vmem:[#allocation34_spill] sm:$0xff] }
 0x3cc   : > { %10313 = vst [vmem:[#allocation26_spill] sm:$0xff] %v10312_v5  ;;  %vm8515_vm13 = vmand %vm8372_vm10, %vm10315_vm14  ;;  %v3471_v53 = vadd.f32 %v3463_v3, %v3411_v36  ;;  %v2873_v46 = vmul.f32 %v10131_v27, %v2861_v55  ;;  %v2874_v31 = vmul.f32 %v10131_v27, %v2862_v40  ;;  %vm10320_vm7 = vcmp.lt.s32.totalorder %v10266_v33, 8 }
 0x3cd   : > { %v10317_v26 = vsel %vm8515_vm13, 4294967295, %v10316_v26  ;;  %vm8527_vm6 = vmand %vm10275_vm2, %vm10320_vm7  ;;  %v10321_v19 = vmov 0  ;;  %v3481_v9 = vadd.f32 %v8450_v34, %v3468_v62  ;;  %v3491_v1 = vmax.f32 %v3483_v8, 0.0 }
 0x3ce   : > { %10318 = vst [vmem:[#allocation48_spill] sm:$0xff] %v10317_v26  ;;  %v10322_v19 = vsel %vm8527_vm6, 4294967295, %v10321_v19  ;;  %v2935_v59 = vsel %vm8352_vm4, %v10324_v41, 0.0  ;;  %v2936_v3 = vsel %vm8372_vm10, %v10298_v35, 0.0  ;;  %vm10325_vm14 = vcmp.lt.s32.totalorder %v10259_v45, 8 }
 0x3cf   : > { %10323 = vst [vmem:[#allocation38_spill] sm:$0xff] %v10322_v19  ;;  %vm10326_vm0 = vcmp.ge.s32.totalorder %v10259_v45, 0  ;;  %v10327_v27 = vmov 0  ;;  %v3482_v36 = vadd.f32 %v8450_v34, %v3469_v13  ;;  %v3484_v55 = vadd.f32 %v8450_v34, %v3471_v53 }
 0x3d0   : > { %vm8542_vm5 = vmand %vm10326_vm0, %vm10325_vm14  ;;  %v2947_v40 = vmul.f32 %v10069_v7, %v2935_v59  ;;  %v2948_v62 = vmul.f32 %v10069_v7, %v2936_v3  ;;  %vm10330_vm10 = vcmp.ge.s32.totalorder %v7670_v60, 0  ;;  %v10331_v45 = vmov 0 }
 0x3d1   : > { %v10328_v27 = vsel %vm8542_vm5, 4294967295, %v10327_v27  ;;  %vm8556_vm0 = vmand %vm8486_vm3, %vm10330_vm10  ;;  %v3489_v8 = vmax.f32 %v3481_v9, 0.0  ;;  %v3499_v24 = vmin.f32 %v3491_v1, 6.0  ;;  %v2957_v52 = vadd.f32 %v8227_v15, %v2873_v46 }
 0x3d2   : > { %v10332_v45 = vsel %vm8556_vm0, 4294967295, %v10331_v45  ;;  %v2958_v13 = vadd.f32 %v10333_v43, %v2874_v31  ;;  %vm10334_vm14 = vcmp.ge.s32.totalorder %v7696_v48, 0  ;;  %v10335_v7 = vmov 0  ;;  %v10345_v31 = vld [vmem:[#allocation43_spill] sm:$0xff] }
 0x3d3   : > { %vm8566_vm7 = vmand %vm8542_vm5, %vm10334_vm14  ;;  %v3490_v53 = vmax.f32 %v3482_v36, 0.0  ;;  %v3492_v59 = vmax.f32 %v3484_v55, 0.0  ;;  %v2955_v3 = vadd.f32 %v2947_v40, %v2871_v25  ;;  %v2956_v38 = vadd.f32 %v2948_v62, %v2872_v20 }
 0x3d4   : > { %v10336_v7 = vsel %vm8566_vm7, 4294967295, %v10335_v7  ;;  %vm10338_vm10 = vcmp.ge.s32.totalorder %v7721_v0, 0  ;;  %v10339_v15 = vmov 0  ;;  %v3497_v43 = vmin.f32 %v3489_v8, 6.0 }
 0x3d5   : > { %10337 = vst [vmem:[#allocation10_spill] sm:$0xff] %v10336_v7  ;;  %vm8574_vm2 = vmand %vm8424_vm9, %vm10338_vm10  ;;  %v2965_v1 = vrot.slane %v8034_v50, 1  ;;  %v3036_v46 = vsel %vm8502_vm1, %v8152_v18, 0.0  ;;  %v3037_v25 = vsel %vm8515_vm13, %v8251_v12, 0.0  ;;  %vm10342_vm14 = vcmp.ge.s32.totalorder %v10235_v51, 0 }
 0x3d6   : > { %v10340_v15 = vsel %vm8574_vm2, 4294967295, %v10339_v15  ;;  %vm8589_vm4 = vmand %vm8443_vm15, %vm10342_vm14  ;;  %v10343_v20 = vmov 0  ;;  %v3498_v9 = vmin.f32 %v3490_v53, 6.0  ;;  %v3500_v36 = vmin.f32 %v3492_v59, 6.0 }
 0x3d7   : > { %10341 = vst [vmem:[#allocation58_spill] sm:$0xff] %v10340_v15  ;;  %v10344_v20 = vsel %vm8589_vm4, 4294967295, %v10343_v20  ;;  %v3048_v18 = vmul.f32 %v10141_v6, %v3036_v46  ;;  %v3049_v55 = vmul.f32 %v10141_v6, %v3037_v25  ;;  %vm10346_vm13 = vcmp.lt.s32.totalorder %v10242_v21, 8 }
 0x3d8   : > { %vm8601_vm1 = vmand %vm8486_vm3, %vm10346_vm13  ;;  %v10347_v40 = vmov 0  ;;  %v10349_v62 = vrot.slane %v8109_v61, 1  ;;  %vm10350_vm14 = vcmp.lt.s32.totalorder %v7464_v14, 7  ;;  %v10351_v53 = vrot.slane %v8165_v28, 1 }
 0x3d9   : > { %v10348_v40 = vsel %vm8601_vm1, 4294967295, %v10347_v40  ;;  %vm10352_vm10 = vmmov %vm10350_vm14  ;;  %v3120_v46 = vsel %vm8556_vm0, %v8128_v57, 0.0  ;;  %v3121_v25 = vsel %vm8566_vm7, %v8466_v58, 0.0  ;;  %vm10353_vm13 = vcmp.lt.s32.totalorder %v10258_v56, 8 }
 0x3da   : > { %v8609_v8 = vsel %vm10350_vm14, %v2965_v1, %v10349_v62  ;;  %v8615_v59 = vsel %vm10352_vm10, %v10351_v53, %v2965_v1  ;;  %vm8627_vm14 = vmand %vm8542_vm5, %vm10353_vm13  ;;  %v10354_v62 = vmov 0  ;;  %v3505_v26 = vpack.c.bf16 %v3498_v9, %v3497_v43 }
 0x3db   : > { %v10355_v62 = vsel %vm8627_vm14, 4294967295, %v10354_v62  ;;  %v3506_v5 = vpack.c.bf16 %v3500_v36, %v3499_v24  ;;  %v3038_v1 = vsel %vm8527_vm6, %v8615_v59, 0.0  ;;  %v3039_v57 = vsel %vm8478_vm11, %v8609_v8, 0.0 }
 0x3dc   : > { %vm10356_vm10 = vcmp.lt.s32.totalorder %v10266_v33, 8  ;;  %v3050_v7 = vmul.f32 %v10141_v6, %v3038_v1  ;;  %v3051_v24 = vmul.f32 %v10141_v6, %v3039_v57  ;;  %v3056_v43 = vadd.f32 %v3048_v18, %v2955_v3  ;;  %6211 = vmatprep.mubr.bf16.mxu0 %v3505_v26 }
 0x3dd   : > { %vm8641_vm8 = vmand %vm8424_vm9, %vm10356_vm10  ;;  %v3057_v9 = vadd.f32 %v3049_v55, %v2956_v38  ;;  %vm10359_vm13 = vcmp.lt.s32.totalorder %v10247_v39, 8  ;;  %vm10362_vm6 = vcmp.lt.s32.totalorder %v10314_v2, 8  ;;  %vm10363_vm10 = vcmp.ge.s32.totalorder %v10314_v2, 0  ;;  %6212 = vmatmul.mubr.bf16.vlgmr.msra.gmra.mxu0 %v3506_v5 }
 0x3de   : > { %vm8651_vm7 = vmand %vm8443_vm15, %vm10359_vm13  ;;  %v3122_v6 = vsel %vm8574_vm2, %v8458_v32, 0.0  ;;  %v3123_v38 = vsel %vm8589_vm4, %v8181_v47, 0.0  ;;  %v3132_v3 = vmul.f32 %v10173_v16, %v3120_v46  ;;  %v3133_v18 = vmul.f32 %v10173_v16, %v3121_v25 }
 0x3df   : > { %vm8659_vm11 = vmand %vm10363_vm10, %vm10362_vm6  ;;  %vm10366_vm13 = vcmp.lt.s32.totalorder %v10319_v4, 8  ;;  %vm10367_vm6 = vcmp.ge.s32.totalorder %v10319_v4, 0  ;;  %v3182_v26 = vsel %vm8424_vm9, %v8034_v50, 0.0  ;;  %v3058_v55 = vadd.f32 %v3050_v7, %v2957_v52 }
 0x3e0   : > { %vm8675_vm10 = vmand %vm10367_vm6, %vm10366_vm13  ;;  %v3059_v1 = vadd.f32 %v3051_v24, %v2958_v13  ;;  %v3134_v57 = vmul.f32 %v10173_v16, %v3122_v6  ;;  %vm10370_vm2 = vcmp.ge.s32.totalorder %v7670_v60, 0  ;;  %v10371_v46 = vmov 0 }
 0x3e1   : > { %vm8687_vm4 = vmand %vm8675_vm10, %vm10370_vm2  ;;  %v3140_v4 = vadd.f32 %v3132_v3, %v3056_v43  ;;  %v3141_v25 = vadd.f32 %v3133_v18, %v3057_v9  ;;  %v3180_v15 = vsel %vm8486_vm3, %v10298_v35, 0.0  ;;  %v3181_v52 = vsel %vm8542_vm5, %v8165_v28, 0.0 }
 0x3e2   : > { %v10372_v46 = vsel %vm8687_vm4, 4294967295, %v10371_v46  ;;  %vm10373_vm13 = vcmp.lt.s32.totalorder %v10329_v29, 8  ;;  %vm10374_vm6 = vcmp.ge.s32.totalorder %v10329_v29, 0  ;;  %v3183_v5 = vsel %vm8443_vm15, %v8109_v61, 0.0 }
 0x3e3   : > { %vm8701_vm0 = vmand %vm10374_vm6, %vm10373_vm13  ;;  %v3135_v13 = vmul.f32 %v10173_v16, %v3123_v38  ;;  %v3192_v7 = vmul.f32 %v10074_v54, %v3180_v15  ;;  %v3193_v24 = vmul.f32 %v10074_v54, %v3181_v52  ;;  %vm10377_vm2 = vcmp.ge.s32.totalorder %v7696_v48, 0 }
 0x3e4   : > { %vm8715_vm5 = vmand %vm8701_vm0, %vm10377_vm2  ;;  %v10378_v29 = vmov 0  ;;  %v3142_v43 = vadd.f32 %v3134_v57, %v3058_v55  ;;  %v3240_v9 = vsel %vm8601_vm1, %v8251_v12, 0.0  ;;  %v3241_v16 = vsel %vm8627_vm14, %v8615_v59, 0.0 }
 0x3e5   : > { %v10379_v29 = vsel %vm8715_vm5, 4294967295, %v10378_v29  ;;  %v3332_v15 = vsel %vm8687_vm4, %v8466_v58, 0.0  ;;  %vm10380_vm13 = vcmp.lt.s32.totalorder %v10242_v21, 8  ;;  %v10381_v48 = vmov 0 }
 0x3e6   : > { %vm8732_vm6 = vmand %vm8675_vm10, %vm10380_vm13  ;;  %v3200_v6 = vadd.f32 %v3192_v7, %v3140_v4  ;;  %v3201_v38 = vadd.f32 %v3193_v24, %v3141_v25  ;;  %v3252_v12 = vmul.f32 %v10237_v44, %v3240_v9  ;;  %v3253_v3 = vmul.f32 %v10237_v44, %v3241_v16 }
 0x3e7   : > { %v10382_v48 = vsel %vm8732_vm6, 4294967295, %v10381_v48  ;;  %vm10384_vm2 = vcmp.lt.s32.totalorder %v10258_v56, 8  ;;  %v10385_v58 = vmov 0  ;;  %v3143_v21 = vadd.f32 %v3135_v13, %v3059_v1 }
 0x3e8   : > { %10383 = vst [vmem:[#allocation18_spill] sm:$0xff] %v10382_v48  ;;  %vm8742_vm14 = vmand %vm8701_vm0, %vm10384_vm2  ;;  %v3333_v18 = vsel %vm8715_vm5, %v8458_v32, 0.0  ;;  %v3344_v55 = vmul.f32 %v10252_v37, %v3332_v15  ;;  %v3392_v57 = vsel %vm8675_vm10, %v8165_v28, 0.0  ;;  %vm10388_vm13 = vcmp.lt.s32.totalorder %v10345_v31, 8 }
 0x3e9   : > { %v10386_v58 = vsel %vm8742_vm14, 4294967295, %v10385_v58  ;;  %vm10389_vm4 = vcmp.ge.s32.totalorder %v10345_v31, 0  ;;  %v3260_v4 = vadd.f32 %v3252_v12, %v3200_v6  ;;  %v3261_v1 = vadd.f32 %v3253_v3, %v3201_v38 }
 0x3ea   : > { %10387 = vst [vmem:[#allocation63_spill] sm:$0xff] %v10386_v58  ;;  %vm8757_vm1 = vmand %vm10389_vm4, %vm10388_vm13  ;;  %v3345_v25 = vmul.f32 %v10252_v37, %v3333_v18  ;;  %v3393_v32 = vsel %vm8701_vm0, %v8034_v50, 0.0  ;;  %vm10392_vm2 = vcmp.ge.s32.totalorder %v7721_v0, 0  ;;  %v3242_v31 = vsel %vm8641_vm8, %v8609_v8, 0.0  ;;  %v10454_v58 = vld [vmem:[#allocation55_spill] sm:$0xff] }
 0x3eb   : > { %vm8769_vm5 = vmand %vm8757_vm1, %vm10392_vm2  ;;  %v3404_v13 = vmul.f32 %v10095_v17, %v3392_v57  ;;  %v3452_v7 = vsel %vm8732_vm6, %v8615_v59, 0.0  ;;  %v3453_v0 = vsel %vm8742_vm14, %v8609_v8, 0.0  ;;  %vm10395_vm4 = vcmp.ge.s32.totalorder %v10235_v51, 0 }
 0x3ec   : > { %vm8787_vm13 = vmand %vm8659_vm11, %vm10395_vm4  ;;  %v3352_v9 = vadd.f32 %v3344_v55, %v3260_v4  ;;  %v3353_v16 = vadd.f32 %v3345_v25, %v3261_v1  ;;  %v3405_v15 = vmul.f32 %v10095_v17, %v3393_v32  ;;  %v3464_v6 = vmul.f32 %v8362_v63, %v3452_v7  ;;  %v10398_v55 = vld [vmem:[#allocation66_spill] sm:$0xff] }
 0x3ed   : > { %v3465_v59 = vmul.f32 %v8362_v63, %v3453_v0  ;;  %v3194_v38 = vmul.f32 %v10074_v54, %v3182_v26  ;;  %v3195_v8 = vmul.f32 %v10074_v54, %v3183_v5  ;;  %v3243_v51 = vsel %vm8651_vm7, %v8195_v23, 0.0 }
 0x3ee   : > { %v3412_v12 = vadd.f32 %v3404_v13, %v3352_v9  ;;  %v3413_v3 = vadd.f32 %v3405_v15, %v3353_v16  ;;  %v3334_v18 = vsel %vm8769_vm5, %v8181_v47, 0.0  ;;  %v3335_v57 = vsel %vm8787_vm13, %v10398_v55, 0.0  ;;  %v10405_v13 = vld [vmem:[#allocation44_spill] sm:$0xff]  ;;  %v10406_v16 = vld [vmem:[#allocation53_spill] sm:$0xff] }
 0x3ef   : > { %vm10399_vm2 = vcmp.lt.s32.totalorder %v10266_v33, 8  ;;  %v10400_v54 = vmov 0  ;;  %v3254_v26 = vmul.f32 %v10237_v44, %v3242_v31  ;;  %v3202_v5 = vadd.f32 %v3194_v38, %v3142_v43 }
 0x3f0   : > { %vm8809_vm4 = vmand %vm8757_vm1, %vm10399_vm2  ;;  %v3203_v4 = vadd.f32 %v3195_v8, %v3143_v21  ;;  %v3255_v1 = vmul.f32 %v10237_v44, %v3243_v51  ;;  %vm10402_vm14 = vcmp.lt.s32.totalorder %v10247_v39, 8  ;;  %v3472_v33 = vadd.f32 %v3464_v6, %v3412_v12 }
 0x3f1   : > { %v10401_v54 = vsel %vm8809_vm4, 4294967295, %v10400_v54  ;;  %vm8819_vm6 = vmand %vm8659_vm11, %vm10402_vm14  ;;  %v3473_v25 = vadd.f32 %v3465_v59, %v3413_v3  ;;  %v3394_v32 = vsel %vm8757_vm1, %v8109_v61, 0.0  ;;  %v3395_v43 = vsel %vm8659_vm11, %v10405_v13, 0.0 }
 0x3f2   : > { %v3262_v21 = vadd.f32 %v3254_v26, %v3202_v5  ;;  %v3263_v44 = vadd.f32 %v3255_v1, %v3203_v4  ;;  %v3346_v39 = vmul.f32 %v10252_v37, %v3334_v18  ;;  %v3347_v31 = vmul.f32 %v10252_v37, %v3335_v57 }
 0x3f3   : > { %v3485_v7 = vadd.f32 %v8450_v34, %v3472_v33  ;;  %v3486_v0 = vadd.f32 %v8450_v34, %v3473_v25  ;;  %v3454_v9 = vsel %vm8809_vm4, %v8195_v23, 0.0  ;;  %v3455_v15 = vsel %vm8819_vm6, %v10406_v16, 0.0 }
 0x3f4   : > { %v3354_v6 = vadd.f32 %v3346_v39, %v3262_v21  ;;  %v3355_v59 = vadd.f32 %v3347_v31, %v3263_v44  ;;  %v3406_v38 = vmul.f32 %v10095_v17, %v3394_v32  ;;  %v3407_v8 = vmul.f32 %v10095_v17, %v3395_v43  ;;  %v6555_v44 = vld [vmem:[%s9796_s3 + $0x48] sm:$0xff]  }
 0x3f5   : > { %v3493_v51 = vmax.f32 %v3485_v7, 0.0  ;;  %v3494_v37 = vmax.f32 %v3486_v0, 0.0  ;;  %v3466_v18 = vmul.f32 %v8362_v63, %v3454_v9  ;;  %v3467_v55 = vmul.f32 %v8362_v63, %v3455_v15  ;;  %v6554_v63 = vld [vmem:[%s9796_s3 + $0x50] sm:$0xff]   ;;  %v5298_v7 = vld [vmem:[%s9798_s5 + $0x2] ss:$0 sm:$0xff] }
 0x3f6   : > { %v3414_v12 = vadd.f32 %v3406_v38, %v3354_v6  ;;  %v3415_v3 = vadd.f32 %v3407_v8, %v3355_v59  ;;  %6229 = vmatprep.subr.bf16.mxu1 %v6554_v63  ;;  %vm9986_vm14 = vmmov 0  }
 0x3f7   : > { %v3501_v57 = vmin.f32 %v3493_v51, 6.0  ;;  %v3502_v23 = vmin.f32 %v3494_v37, 6.0  ;;  %6230 = vmatpush3.bf16.msra.mxu1 %v6554_v63  ;;  %v10407_v37 = vld [vmem:[#allocation40_spill] sm:$0xff] }
 0x3f8   : > { %v3474_v26 = vadd.f32 %v3466_v18, %v3414_v12  ;;  %v3475_v5 = vadd.f32 %v3467_v55, %v3415_v3  ;;  %6231 = vmatprep.subr.bf16.mxu1 %v6555_v44  ;;  %v6563_v63 = vld [vmem:[%s9796_s3 + $0x90] sm:$0xff]  }
 0x3f9   : > { %v3507_v4 = vpack.c.bf16 %v3502_v23, %v3501_v57 }
 0x3fa   : > { %v3487_v1 = vadd.f32 %v8450_v34, %v3474_v26  ;;  %v3488_v33 = vadd.f32 %v8450_v34, %v3475_v5  ;;  %v6556_v34 = vld [vmem:[%s9796_s3 + $0x40] sm:$0xff]  }
 0x3fb   : > { %6215 = vmatprep.mubr.bf16.mxu0 %v3507_v4  ;;  %6232 = vmatpush3.bf16.msra.mxu1 %v6555_v44  ;;  %v8898_v44 = vld [vmem:[%s9798_s5 + $0x3] ss:$0 sm:$0xff] }
 0x3fc   : > { %v3495_v25 = vmax.f32 %v3487_v1, 0.0  ;;  %v3496_v17 = vmax.f32 %v3488_v33, 0.0  ;;  %6233 = vmatprep.subr.bf16.mxu1 %v6556_v34 }
 0x3fe   : > { %v3503_v32 = vmin.f32 %v3495_v25, 6.0  ;;  %v3504_v43 = vmin.f32 %v3496_v17, 6.0 }
 0x3ff   : > { %6234 = vmatpush3.bf16.msra.mxu1 %v6556_v34 }
 0x400   : > { %v3508_v21 = vpack.c.bf16 %v3504_v43, %v3503_v32  ;;  %v9989_v43 = vmov 0.0  }
 0x401   : > { %6243 = vmatprep.subr.bf16.mxu0 %v9989_v43  ;;  %6255 = vmatprep.subr.bf16.mxu1 %v9989_v43 }
 0x402   : > { %6216 = vmatmul.mubr.bf16.gmra.mxu0 %v3508_v21  ;;  %v6562_v21 = vld [vmem:[%s9796_s3 + $0x98] sm:$0xff]  }
 0x403   : > { %6251 = vmatprep.mubr.msk.bf16.mxu0 %vm9986_vm14, %v9989_v43 }
 0x49d   : > { %v6213_v39 = vpop.f32.mrf.mxu0 }
 0x49e   : > { %v3621_v15 = vadd.f32 %v6213_v39, %v5298_v7 }
 0x49f   : > { %v3612_v31 = vpop.f32.mrf.mxu0 }
 0x4a0   : > { %v3613_v9 = vadd.f32 %v5298_v7, %v3612_v31  ;;  %v3645_v12 = vadd.f32 %v3621_v15, %v10407_v37 }
 0x4a1   : > { %v6214_v0 = vpop.f32.mrf.mxu0 }
 0x4a2   : > { %v3624_v16 = vadd.f32 %v6214_v0, %v5298_v7  ;;  %v3643_v8 = vadd.f32 %v3613_v9, %v10405_v13 }
 0x4a3   : > { %v3615_v6 = vpop.f32.mrf.mxu0 }
 0x4a4   : > { %v3616_v59 = vadd.f32 %v5298_v7, %v3615_v6  ;;  %v3646_v38 = vadd.f32 %v3624_v16, %v10324_v41 }
 0x4a6   : > { %v3644_v51 = vadd.f32 %v3616_v59, %v7880_v11  ;;  %v3652_v18 = vpack.c.bf16 %v3646_v38, %v3645_v12  ;;  %v5332_v59 = vld [vmem:[%s9797_s4 + $0x10] sm:$0xff] }
 0x4a7   : > { %v10409_v12 = vld [vmem:[#allocation4_spill] sm:$0xff] }
 0x4a8   : > { %v3651_v3 = vpack.c.bf16 %v3644_v51, %v3643_v8 }
 0x4aa   : > { %6235 = vmatprep.mubr.bf16.mxu1 %v3651_v3  ;;  %v8912_v3 = vrot.slane %v5332_v59, %v10409_v12 }
 0x4ab   : > { %6236 = vmatmul.mubr.bf16.vlgmr.msra.gmra.mxu1 %v3652_v18  ;;  %v10410_v18 = vld [vmem:[#allocation5_spill] sm:$0xff] }
 0x4c2   : > { %v6217_v55 = vpop.f32.mrf.mxu0 }
 0x4c3   : > { %v3637_v4 = vadd.f32 %v6217_v55, %v5298_v7  ;;  %v8915_v55 = vrot.slane %v5332_v59, %v10410_v18 }
 0x4c4   : > { %v3628_v57 = vpop.f32.mrf.mxu0 }
 0x4c5   : > { %v3629_v26 = vadd.f32 %v5298_v7, %v3628_v57  ;;  %v3649_v25 = vadd.f32 %v3637_v4, %v8034_v50  ;;  %v6558_v50 = vld [vmem:[%s9796_s3 + $0xb8] sm:$0xff]  }
 0x4c6   : > { %v6218_v23 = vpop.f32.mrf.mxu0  ;;  %6256 = vmatpush3.bf16.msra.mxu1 %v6558_v50 }
 0x4c7   : > { %v3640_v5 = vadd.f32 %v6218_v23, %v5298_v7  ;;  %v3647_v13 = vadd.f32 %v3629_v26, %v10298_v35  ;;  %6257 = vmatprep.subr.bf16.mxu1 %v9989_v43  ;;  %v6561_v35 = vld [vmem:[%s9796_s3 + $0xa0] sm:$0xff]  }
 0x4c8   : > { %v3631_v1 = vpop.f32.mrf.mxu0  ;;  %v10411_v23 = vld [vmem:[#allocation30_spill] sm:$0xff] }
 0x4c9   : > { %v3632_v33 = vadd.f32 %v5298_v7, %v3631_v1  ;;  %v3650_v41 = vadd.f32 %v3640_v5, %v8109_v61  ;;  %v6560_v61 = vld [vmem:[%s9796_s3 + $0xa8] sm:$0xff]   ;;  %vm10412_vm2 = vnez %v10411_v23  ;;  %v10415_v1 = vld [vmem:[#allocation6_spill] sm:$0xff]  ;;  %v10424_v23 = vld [vmem:[#allocation45_spill] sm:$0xff] }
 0x4ca   : > { %v10413_v5 = vld [vmem:[#allocation31_spill] sm:$0xff] }
 0x4cb   : > { %v3648_v11 = vadd.f32 %v3632_v33, %v8165_v28  ;;  %v3654_v32 = vpack.c.bf16 %v3650_v41, %v3649_v25  ;;  %v6559_v28 = vld [vmem:[%s9796_s3 + $0xb0] sm:$0xff]   ;;  %v8924_v33 = vrot.slane %v5332_v59, %v10415_v1  ;;  %v10436_v1 = vld [vmem:[#allocation25_spill] sm:$0xff] }
 0x4cc   : > { %6258 = vmatpush3.bf16.msra.mxu1 %v6559_v28  ;;  %v10417_v25 = vld [vmem:[#allocation12_spill] sm:$0xff] }
 0x4cd   : > { %v3653_v17 = vpack.c.bf16 %v3648_v11, %v3647_v13  ;;  %6259 = vmatprep.subr.bf16.mxu1 %v9989_v43  ;;  %v10416_v13 = vld [vmem:[#allocation9_spill] sm:$0xff] }
 0x4ce   : > { %v8929_v11 = vrot.slane %v5332_v59, %v10416_v13 }
 0x4cf   : > { %6239 = vmatprep.mubr.bf16.mxu1 %v3653_v17  ;;  %v8932_v17 = vrot.slane %v5332_v59, %v10417_v25  ;;  %v10443_v25 = vld [vmem:[#allocation23_spill] sm:$0xff] }
 0x4d0   : > { %6240 = vmatmul.mubr.bf16.gmra.mxu1 %v3654_v32  ;;  %v10418_v32 = vld [vmem:[#allocation13_spill] sm:$0xff] }
 0x4d1   : > { %6271 = vmatprep.mubr.msk.bf16.mxu1 %vm9986_vm14, %v9989_v43  ;;  %6260 = vmatpush3.bf16.msra.mxu1 %v6560_v61  ;;  %vm10414_vm14 = vnez %v10413_v5  ;;  %v8935_v50 = vrot.slane %v5332_v59, %v10418_v32  ;;  %v10426_v5 = vld [vmem:[#allocation42_spill] sm:$0xff] }
 0x4d2   : > { %6261 = vmatprep.subr.bf16.mxu1 %v9989_v43  ;;  %vm10427_vm4 = vnez %v10426_v5  ;;  %v10434_v5 = vld [vmem:[#allocation46_spill] sm:$0xff] }
 0x4d5   : > { %6262 = vmatpush3.bf16.msra.mxu1 %v6561_v35 }
 0x4d6   : > { %6263 = vmatprep.subr.bf16.mxu1 %v9989_v43 }
 0x4d9   : > { %6264 = vmatpush3.bf16.msra.mxu1 %v6562_v21  ;;  %v10419_v21 = vld [vmem:[#allocation16_spill] sm:$0xff] }
 0x4da   : > { %6265 = vmatprep.subr.bf16.mxu1 %v9989_v43 }
 0x4dd   : > { %6266 = vmatpush3.bf16.msra.mxu1 %v6563_v63  ;;  %v8942_v63 = vrot.slane %v5332_v59, %v10419_v21 }
 0x4de   : > { %6267 = vmatprep.subr.bf16.mxu1 %v9989_v43 }
 0x56b   : > { %v6237_v34 = vpop.f32.mrf.mxu1 }
 0x56c   : > { %v3768_v39 = vadd.f32 %v6237_v34, %v8898_v44  ;;  %v10420_v34 = vld [vmem:[#allocation20_spill] sm:$0xff] }
 0x56d   : > { %v3759_v31 = vpop.f32.mrf.mxu1 }
 0x56e   : > { %v3792_v0 = vmax.f32 %v3768_v39, 0.0  ;;  %v3760_v9 = vadd.f32 %v8898_v44, %v3759_v31  ;;  %v8945_v39 = vrot.slane %v5332_v59, %v10420_v34 }
 0x56f   : > { %v6238_v7 = vpop.f32.mrf.mxu1 }
 0x570   : > { %v3771_v16 = vadd.f32 %v6238_v7, %v8898_v44  ;;  %v8903_v6 = vmin.f32 %v3792_v0, 6.0  ;;  %v3790_v38 = vmax.f32 %v3760_v9, 0.0 }
 0x571   : > { %v3762_v15 = vpop.f32.mrf.mxu1 }
 0x572   : > { %10408 = vst [vmem:[#allocation28_spill] sm:$0xff] %v8903_v6  ;;  %v3793_v8 = vmax.f32 %v3771_v16, 0.0  ;;  %v3763_v51 = vadd.f32 %v8898_v44, %v3762_v15  ;;  %v3856_v26 = vsel %vm10412_vm2, %v8903_v6, 0.0  ;;  %v3955_v4 = vsel %vm10414_vm14, %v8903_v6, 0.0 }
 0x573   : > { %v8926_v41 = vmin.f32 %v3790_v38, 6.0  ;;  %v3811_v61 = vrot.slane %v8903_v6, 7  ;;  %v3868_v31 = vmul.f32 %v8912_v3, %v3856_v26  ;;  %v3883_v7 = vrot.slane %v8903_v6, 1 }
 0x574   : > { %v8909_v37 = vmin.f32 %v3793_v8, 6.0  ;;  %v3791_v57 = vmax.f32 %v3763_v51, 0.0  ;;  %v3967_v0 = vmul.f32 %v8915_v55, %v3955_v4  ;;  %v10422_v8 = vld [vmem:[#allocation35_spill] sm:$0xff]  ;;  %vm10425_vm2 = vnez %v10424_v23 }
 0x575   : > { %v9993_v38 = vrot.slane %v8926_v41, 7  ;;  %vm10423_vm14 = vnez %v10422_v8  ;;  %v3953_v26 = vsel %vm10425_vm2, %v8926_v41, 0.0  ;;  %v4044_v15 = vsel %vm8659_vm11, %v8926_v41, 0.0 }
 0x576   : > { %v8937_v28 = vmin.f32 %v3791_v57, 6.0  ;;  %v9992_v35 = vrot.slane %v8909_v37, 7  ;;  %v9994_v9 = vrot.slane %v8909_v37, 1  ;;  %v3854_v51 = vsel %vm10423_vm14, %v8926_v41, 0.0 }
 0x577   : > { %vm10428_vm14 = vcmp.lt.s32.totalorder %v7464_v14, 1  ;;  %vm10435_vm11 = vnez %v10434_v5  ;;  %v9007_v5 = vmul.f32 %v8912_v3, %v3854_v51  ;;  %v9025_v18 = vmul.f32 %v8915_v55, %v3953_v26 }
 0x578   : > { %v3810_v59 = vrot.slane %v8937_v28, 7  ;;  %v3855_v4 = vsel %vm10427_vm4, %v8937_v28, 0.0  ;;  %v3882_v43 = vrot.slane %v8937_v28, 1  ;;  %v3821_v8 = vsel %vm10428_vm14, %v3811_v61, %v9992_v35  ;;  %vm10429_vm12 = vmmov %vm10428_vm14 }
 0x579   : > { %vm10431_vm2 = vmmov %vm10429_vm12  ;;  %vm10432_vm4 = vcmp.lt.s32.totalorder %v7464_v14, 7  ;;  %v3867_v21 = vmul.f32 %v8912_v3, %v3855_v4  ;;  %v10447_v4 = vld [vmem:[#allocation11_spill] sm:$0xff]  ;;  %10451 = vst [vmem:[#allocation60_spill] sm:$0xff] %v9025_v18 }
 0x57a   : > { %v8976_v57 = vsel %vm10429_vm12, %v3810_v59, %v3811_v61  ;;  %v8982_v23 = vsel %vm10431_vm2, %v9993_v38, %v3810_v59  ;;  %v8988_v19 = vsel %vm10432_vm4, %v3883_v7, %v9994_v9  ;;  %vm10437_vm12 = vnez %v10436_v1  ;;  %vm10438_vm14 = vmmov %vm10432_vm4  ;;  %v10440_v9 = vld [vmem:[#allocation47_spill] sm:$0xff] }
 0x57b   : > { %10430 = vst [vmem:[#allocation39_spill] sm:$0xff] %v8976_v57  ;;  %10433 = vst [vmem:[#allocation7_spill] sm:$0xff] %v8988_v19  ;;  %v3827_v35 = vsel %vm10435_vm11, %v8982_v23, 0.0  ;;  %v3828_v61 = vsel %vm10437_vm12, %v8976_v57, 0.0  ;;  %v8998_v34 = vsel %vm10438_vm14, %v3882_v43, %v3883_v7  ;;  %vm10441_vm2 = vnez %v10440_v9  ;;  %v10449_v9 = vld [vmem:[#allocation36_spill] sm:$0xff] }
 0x57c   : > { %10439 = vst [vmem:[#allocation34_spill] sm:$0xff] %v8998_v34  ;;  %v3839_v59 = vmul.f32 %v8929_v11, %v3827_v35  ;;  %v3840_v38 = vmul.f32 %v8929_v11, %v3828_v61  ;;  %v3899_v32 = vsel %vm10441_vm2, %v8998_v34, 0.0  ;;  %vm10442_vm4 = vnez %v10269_v10  ;;  %v10445_v35 = vld [vmem:[#allocation22_spill] sm:$0xff] }
 0x57d   : > { %v3829_v1 = vsel %vm10442_vm4, %v3821_v8, 0.0  ;;  %vm10444_vm11 = vnez %v10443_v25  ;;  %vm10446_vm12 = vnez %v10445_v35  ;;  %vm10448_vm14 = vnez %v10447_v4  ;;  %v10452_v35 = vld [vmem:[#allocation41_spill] sm:$0xff] }
 0x57e   : > { %v3857_v7 = vsel %vm10444_vm11, %v8909_v37, 0.0  ;;  %v3927_v61 = vsel %vm10446_vm12, %v8976_v57, 0.0  ;;  %v3900_v12 = vsel %vm10448_vm14, %v8988_v19, 0.0  ;;  %vm10450_vm2 = vnez %v10449_v9  ;;  %v10501_v57 = vld [vmem:[#allocation54_spill] sm:$0xff] }
 0x57f   : > { %v3956_v51 = vsel %vm10450_vm2, %v8909_v37, 0.0  ;;  %v3875_v13 = vadd.f32 %v3867_v21, %v3839_v59  ;;  %v3911_v10 = vmul.f32 %v8932_v17, %v3899_v32  ;;  %v9028_v25 = vmul.f32 %v8924_v33, %v4044_v15  ;;  %v10456_v59 = vld [vmem:[#allocation65_spill] sm:$0xff] }
 0x580   : > { %vm10453_vm4 = vnez %v10452_v35  ;;  %v3876_v16 = vadd.f32 %v3868_v31, %v3840_v38  ;;  %v3841_v4 = vmul.f32 %v8929_v11, %v3829_v1  ;;  %vm10455_vm11 = vnez %v10454_v58  ;;  %v10458_v38 = vld [vmem:[#allocation14_spill] sm:$0xff] }
 0x581   : > { %v4039_v6 = vsel %vm10453_vm4, %v8909_v37, 0.0  ;;  %v3928_v9 = vsel %vm10455_vm11, %v3821_v8, 0.0  ;;  %v3919_v48 = vadd.f32 %v3911_v10, %v3875_v13  ;;  %v3939_v21 = vmul.f32 %v8935_v50, %v3927_v61  ;;  %v10462_v61 = vld [vmem:[#allocation15_spill] sm:$0xff] }
 0x582   : > { %v3869_v32 = vmul.f32 %v8912_v3, %v3857_v7  ;;  %v3912_v26 = vmul.f32 %v8932_v17, %v3900_v12  ;;  %v3968_v15 = vmul.f32 %v8915_v55, %v3956_v51  ;;  %vm10457_vm12 = vnez %v10456_v59  ;;  %v10464_v59 = vld [vmem:[#allocation70_spill] sm:$0xff] }
 0x583   : > { %v3983_v35 = vsel %vm10457_vm12, %v8988_v19, 0.0  ;;  %v4051_v31 = vmul.f32 %v8924_v33, %v4039_v6  ;;  %vm10459_vm14 = vnez %v10458_v38  ;;  %v3947_v1 = vadd.f32 %v3939_v21, %v3919_v48  ;;  %v10466_v38 = vld [vmem:[#allocation67_spill] sm:$0xff] }
 0x584   : > { %v3926_v58 = vsel %vm10459_vm14, %v8982_v23, 0.0  ;;  %v10460_v13 = vrot.slane %v8926_v41, 1  ;;  %vm10461_vm2 = vcmp.lt.s32.totalorder %v7464_v14, 7  ;;  %v3940_v12 = vmul.f32 %v8935_v50, %v3928_v9 }
 0x585   : > { %vm10463_vm4 = vnez %v10462_v61  ;;  %v3920_v10 = vadd.f32 %v3912_v26, %v3876_v16  ;;  %vm10465_vm11 = vnez %v10464_v59  ;;  %v9057_v19 = vadd.f32 %v3869_v32, %v3841_v4  ;;  %v10473_v61 = vld [vmem:[#allocation19_spill] sm:$0xff] }
 0x586   : > { %v3895_v7 = vsel %vm10461_vm2, %v10460_v13, %v3882_v43  ;;  %v3954_v51 = vsel %vm10463_vm4, %v8937_v28, 0.0  ;;  %v4011_v6 = vsel %vm10465_vm11, %v3821_v8, 0.0  ;;  %vm10467_vm12 = vnez %v10466_v38  ;;  %v10469_v13 = vld [vmem:[#allocation64_spill] sm:$0xff]  ;;  %v10471_v8 = vld [vmem:[#allocation21_spill] sm:$0xff] }
 0x587   : > { %v4037_v48 = vsel %vm10467_vm12, %v8937_v28, 0.0  ;;  %v3975_v18 = vadd.f32 %v3967_v0, %v3947_v1  ;;  %v3995_v43 = vmul.f32 %v8942_v63, %v3983_v35  ;;  %v9064_v9 = vmul.f32 %v8935_v50, %v3926_v58 }
 0x588   : > { %vm10470_vm14 = vnez %v10469_v13  ;;  %vm10472_vm2 = vnez %v10471_v8  ;;  %vm10474_vm4 = vnez %v10473_v61  ;;  %v4072_v0 = vsel %vm8819_vm6, %v3895_v7, 0.0  ;;  %v10475_v13 = vld [vmem:[#allocation68_spill] sm:$0xff] }
 0x589   : > { %10468 = vst [vmem:[#allocation43_spill] sm:$0xff] %v9064_v9  ;;  %v3982_v16 = vsel %vm10470_vm14, %v8998_v34, 0.0  ;;  %v3898_v4 = vsel %vm10472_vm2, %v3895_v7, 0.0  ;;  %v3981_v28 = vsel %vm10474_vm4, %v3895_v7, 0.0  ;;  %v4003_v35 = vadd.f32 %v3995_v43, %v3975_v18 }
 0x58a   : > { %v4023_v58 = vmul.f32 %v8945_v39, %v4011_v6  ;;  %v3948_v38 = vadd.f32 %v3940_v12, %v3920_v10  ;;  %vm10476_vm11 = vnez %v10475_v13  ;;  %v9082_v8 = vmul.f32 %v8915_v55, %v3954_v51 }
 0x58b   : > { %v9085_v61 = vmul.f32 %v8924_v33, %v4037_v48  ;;  %v9088_v18 = vmul.f32 %v8942_v63, %v3982_v16  ;;  %v9099_v51 = vmul.f32 %v8932_v17, %v3898_v4  ;;  %v9105_v43 = vmul.f32 %v8942_v63, %v3981_v28  ;;  %v10481_v16 = vld [vmem:[#allocation69_spill] sm:$0xff]  ;;  %v10496_v28 = vld [vmem:[#allocation26_spill] sm:$0xff] }
 0x58c   : > { %10477 = vst [vmem:[#allocation66_spill] sm:$0xff] %v9082_v8  ;;  %v4031_v47 = vadd.f32 %v4023_v58, %v4003_v35  ;;  %vm10482_vm6 = vnez %v10481_v16  ;;  %vm10491_vm14 = vcmp.lt.s32.totalorder %v7464_v14, 7  ;;  %vm10497_vm4 = vnez %v10496_v28  ;;  %v10513_v8 = vld [vmem:[#allocation62_spill] sm:$0xff] }
 0x58d   : > { %10478 = vst [vmem:[#allocation44_spill] sm:$0xff] %v9085_v61  ;;  %10479 = vst [vmem:[#allocation53_spill] sm:$0xff] %v9088_v18 }
 0x58e   : > { %10480 = vst [vmem:[#allocation40_spill] sm:$0xff] %v9105_v43  ;;  %v9121_v58 = vadd.f32 %v4051_v31, %v4031_v47  ;;  %v10486_v47 = vld [vmem:[#allocation33_spill] sm:$0xff] }
 0x590   : > { %v6241_v21 = vpop.f32.mrf.mxu1 }
 0x591   : > { %v3784_v26 = vadd.f32 %v6241_v21, %v8898_v44  ;;  %v4009_v21 = vsel %vm10476_vm11, %v8982_v23, 0.0  ;;  %v9096_v23 = vld [vmem:[%s9797_s4 + $0x18] ss:$0 sm:$0xff]  ;;  %vm10498_vm11 = vnez %v10332_v45 }
 0x592   : > { %v3775_v32 = vpop.f32.mrf.mxu1  ;;  %v9102_v48 = vmul.f32 %v9096_v23, %v4072_v0  ;;  %v9119_v0 = vadd.f32 %v3968_v15, %v3948_v38 }
 0x593   : > { %v3796_v1 = vmax.f32 %v3784_v26, 0.0  ;;  %v3776_v59 = vadd.f32 %v8898_v44, %v3775_v32  ;;  %v10484_v32 = vld [vmem:[#allocation49_spill] sm:$0xff]  ;;  %v10490_v26 = vrot.slane %v8909_v37, 1 }
 0x594   : > { %v6242_v34 = vpop.f32.mrf.mxu1  ;;  %vm10485_vm12 = vnez %v10484_v32 }
 0x595   : > { %v9090_v7 = vmin.f32 %v3796_v1, 6.0  ;;  %v3794_v6 = vmax.f32 %v3776_v59, 0.0  ;;  %v3787_v12 = vadd.f32 %v6242_v34, %v8898_v44  ;;  %v9111_v34 = vmul.f32 %v8945_v39, %v4009_v21 }
 0x596   : > { %v3778_v10 = vpop.f32.mrf.mxu1 }
 0x597   : > { %10483 = vst [vmem:[#allocation30_spill] sm:$0xff] %v9111_v34  ;;  %v3860_v35 = vsel %vm10485_vm12, %v9090_v7, 0.0  ;;  %v3959_v4 = vsel %vm8424_vm9, %v9090_v7, 0.0  ;;  %v4042_v59 = vsel %vm8701_vm0, %v9090_v7, 0.0  ;;  %v9128_v13 = vmin.f32 %v3794_v6, 6.0 }
 0x598   : > { %v9131_v21 = vmul.f32 %v8912_v3, %v3860_v35  ;;  %v9134_v49 = vmul.f32 %v8915_v55, %v3959_v4  ;;  %v3797_v15 = vmax.f32 %v3787_v12, 0.0  ;;  %v3779_v31 = vadd.f32 %v8898_v44, %v3778_v10 }
 0x599   : > { %v3813_v38 = vrot.slane %v9128_v13, 7  ;;  %vm10487_vm9 = vnez %v10486_v47  ;;  %v3885_v60 = vrot.slane %v9128_v13, 1  ;;  %v3957_v6 = vsel %vm8486_vm3, %v9128_v13, 0.0 }
 0x59a   : > { %v3858_v32 = vsel %vm10487_vm9, %v9128_v13, 0.0  ;;  %v9146_v35 = vmul.f32 %v8924_v33, %v4042_v59  ;;  %v3969_v12 = vmul.f32 %v8915_v55, %v3957_v6  ;;  %v3805_v44 = vmin.f32 %v3797_v15, 6.0  ;;  %v10492_v59 = vld [vmem:[#allocation51_spill] sm:$0xff]  ;;  %v10494_v6 = vld [vmem:[#allocation29_spill] sm:$0xff] }
 0x59b   : > { %v3870_v4 = vmul.f32 %v8912_v3, %v3858_v32  ;;  %v10488_v10 = vrot.slane %v8909_v37, 7  ;;  %vm10489_vm0 = vcmp.lt.s32.totalorder %v7464_v14, 1  ;;  %v9160_v30 = vsel %vm10491_vm14, %v10490_v26, %v3885_v60  ;;  %v10499_v26 = vld [vmem:[#allocation24_spill] sm:$0xff] }
 0x59c   : > { %vm10493_vm3 = vnez %v10492_v59  ;;  %v3795_v32 = vmax.f32 %v3779_v31, 0.0  ;;  %vm10495_vm2 = vnez %v10494_v6  ;;  %vm10500_vm12 = vnez %v10499_v26  ;;  %vm10505_vm14 = vmmov %vm10489_vm0 }
 0x59d   : > { %v9154_v47 = vsel %vm10489_vm0, %v10488_v10, %v3813_v38  ;;  %v3901_v10 = vsel %vm10497_vm4, %v9160_v30, 0.0  ;;  %v3816_v6 = vrot.slane %v3805_v44, 7  ;;  %vm10502_vm9 = vnez %v10501_v57 }
 0x59e   : > { %v3830_v15 = vsel %vm10495_vm2, %v9154_v47, 0.0  ;;  %v3929_v37 = vsel %vm10498_vm11, %v9154_v47, 0.0  ;;  %v3913_v31 = vmul.f32 %v8932_v17, %v3901_v10  ;;  %v3853_v16 = vsel %vm10502_vm9, %v3805_v44, 0.0 }
 0x59f   : > { %v3842_v34 = vmul.f32 %v8929_v11, %v3830_v15  ;;  %v3941_v1 = vmul.f32 %v8935_v50, %v3929_v37  ;;  %v3888_v28 = vrot.slane %v3805_v44, 1  ;;  %v3960_v18 = vsel %vm8443_vm15, %v3805_v44, 0.0 }
 0x5a0   : > { %v4043_v45 = vsel %vm8757_vm1, %v3805_v44, 0.0  ;;  %v3921_v61 = vadd.f32 %v3913_v31, %v9057_v19  ;;  %v10503_v15 = vrot.slane %v9090_v7, 7  ;;  %v10504_v37 = vrot.slane %v8926_v41, 7 }
 0x5a1   : > { %v3878_v43 = vadd.f32 %v3870_v4, %v3842_v34  ;;  %vm10507_vm15 = vnez %v10506_v22  ;;  %v10508_v34 = vld [vmem:[#allocation59_spill] sm:$0xff]  ;;  %v3865_v4 = vmul.f32 %v8912_v3, %v3853_v16  ;;  %v10510_v44 = vrot.slane %v9090_v7, 1 }
 0x5a2   : > { %v9191_v10 = vsel %vm10489_vm0, %v10503_v15, %v3816_v6  ;;  %v9197_v57 = vsel %vm10505_vm14, %v3816_v6, %v10504_v37  ;;  %vm10509_vm1 = vnez %v10508_v34  ;;  %vm10511_vm2 = vcmp.lt.s32.totalorder %v7464_v14, 7 }
 0x5a3   : > { %v3825_v56 = vsel %vm10507_vm15, %v9191_v10, 0.0  ;;  %v3826_v19 = vsel %vm10509_vm1, %v9197_v57, 0.0  ;;  %v9210_v31 = vsel %vm10511_vm2, %v10510_v44, %v3888_v28  ;;  %v3949_v15 = vadd.f32 %v3941_v1, %v3921_v61  ;;  %vm10517_vm0 = vmmov %vm10511_vm2 }
 0x5a4   : > { %v3837_v6 = vmul.f32 %v8929_v11, %v3825_v56  ;;  %v3838_v37 = vmul.f32 %v8929_v11, %v3826_v19  ;;  %vm10512_vm4 = vnez %v10303_v42  ;;  %vm10514_vm11 = vnez %v10513_v8  ;;  %vm10528_vm2 = vmmov %vm10517_vm0 }
 0x5a5   : > { %v3904_v22 = vsel %vm10512_vm4, %v9210_v31, 0.0  ;;  %v3925_v16 = vsel %vm10514_vm11, %v9197_v57, 0.0  ;;  %vm10515_vm9 = vnez %v10344_v20  ;;  %v3972_v61 = vmul.f32 %v8915_v55, %v3960_v18  ;;  %vm10529_vm4 = vmmov %vm10517_vm0 }
 0x5a6   : > { %v3916_v34 = vmul.f32 %v8932_v17, %v3904_v22  ;;  %v3932_v44 = vsel %vm10515_vm9, %v9191_v10, 0.0  ;;  %v9225_v1 = vadd.f32 %v3969_v12, %v3949_v15  ;;  %v3873_v56 = vadd.f32 %v3865_v4, %v3837_v6  ;;  %v10519_v6 = vld [vmem:[#allocation56_spill] sm:$0xff] }
 0x5a7   : > { %v3874_v19 = vadd.f32 %v9007_v5, %v3838_v37  ;;  %v9229_v42 = vmul.f32 %v8935_v50, %v3925_v16  ;;  %v3944_v22 = vmul.f32 %v8935_v50, %v3932_v44  ;;  %v3987_v8 = vsel %vm8641_vm8, %v9210_v31, 0.0  ;;  %v10522_v16 = vld [vmem:[#allocation61_spill] sm:$0xff] }
 0x5a8   : > { %v9236_v9 = vmul.f32 %v8924_v33, %v4043_v45  ;;  %v3803_v20 = vmin.f32 %v3795_v32, 6.0  ;;  %v10516_v18 = vrot.slane %v8926_v41, 1  ;;  %v3999_v4 = vmul.f32 %v8942_v63, %v3987_v8 }
 0x5a9   : > { %v9243_v5 = vadd.f32 %v9099_v51, %v3874_v19  ;;  %v4015_v15 = vsel %vm8769_vm5, %v9191_v10, 0.0  ;;  %vm10520_vm8 = vnez %v10519_v6  ;;  %vm10521_vm14 = vnez %v10328_v27  ;;  %v10534_v6 = vld [vmem:[#allocation48_spill] sm:$0xff] }
 0x5aa   : > { %v3896_v12 = vsel %vm10517_vm0, %v3888_v28, %v10516_v18  ;;  %v3814_v53 = vrot.slane %v3803_v20, 7  ;;  %v3859_v45 = vsel %vm10520_vm8, %v3803_v20, 0.0  ;;  %v3886_v37 = vrot.slane %v3803_v20, 1 }
 0x5ab   : > { %10518 = vst [vmem:[#allocation31_spill] sm:$0xff] %v9243_v5  ;;  %v3958_v41 = vsel %vm10521_vm14, %v3803_v20, 0.0  ;;  %v3871_v32 = vmul.f32 %v8912_v3, %v3859_v45  ;;  %v4041_v51 = vsel %vm8675_vm10, %v3803_v20, 0.0  ;;  %vm10523_vm15 = vnez %v10522_v16  ;;  %v10532_v20 = vld [vmem:[#allocation37_spill] sm:$0xff]  ;;  %v10538_v16 = vld [vmem:[#allocation10_spill] sm:$0xff] }
 0x5ac   : > { %v3970_v28 = vmul.f32 %v8915_v55, %v3958_v41  ;;  %v3897_v44 = vsel %vm10523_vm15, %v3896_v12, 0.0  ;;  %v10524_v52 = vrot.slane %v9090_v7, 7  ;;  %vm10525_vm5 = vcmp.lt.s32.totalorder %v7464_v14, 1  ;;  %v10530_v55 = vld [vmem:[#allocation27_spill] sm:$0xff] }
 0x5ad   : > { %vm10526_vm1 = vmmov %vm10525_vm5  ;;  %v10527_v27 = vrot.slane %v9090_v7, 1  ;;  %v9271_v2 = vsel %vm10529_vm4, %v3885_v60, %v3886_v37  ;;  %vm10531_vm10 = vnez %v10530_v55  ;;  %vm10533_vm11 = vnez %v10532_v20 }
 0x5ae   : > { %v3818_v10 = vsel %vm10525_vm5, %v3814_v53, %v10524_v52  ;;  %v3819_v19 = vsel %vm10526_vm1, %v3813_v38, %v3814_v53  ;;  %vm10535_vm9 = vnez %v10534_v6  ;;  %v10536_v38 = vld [vmem:[#allocation38_spill] sm:$0xff]  ;;  %vm10539_vm8 = vnez %v10538_v16 }
 0x5af   : > { %v3890_v3 = vsel %vm10528_vm2, %v3886_v37, %v10527_v27  ;;  %v3831_v8 = vsel %vm10531_vm10, %v3819_v19, 0.0  ;;  %v3832_v18 = vsel %vm10533_vm11, %v3818_v10, 0.0  ;;  %v3902_v45 = vsel %vm10535_vm9, %v9271_v2, 0.0  ;;  %v10540_v27 = vld [vmem:[#allocation58_spill] sm:$0xff] }
 0x5b0   : > { %vm10537_vm0 = vnez %v10536_v38  ;;  %v3843_v53 = vmul.f32 %v8929_v11, %v3831_v8  ;;  %v3844_v41 = vmul.f32 %v8929_v11, %v3832_v18  ;;  %v3914_v60 = vmul.f32 %v8932_v17, %v3902_v45 }
 0x5b1   : > { %v3903_v7 = vsel %vm10537_vm0, %v3890_v3, 0.0  ;;  %v3930_v52 = vsel %vm10539_vm8, %v3819_v19, 0.0  ;;  %vm10541_vm14 = vnez %v10540_v27  ;;  %vm10542_vm15 = vnez %v10348_v40 }
 0x5b2   : > { %v3915_v37 = vmul.f32 %v8932_v17, %v3903_v7  ;;  %v3931_v55 = vsel %vm10541_vm14, %v3818_v10, 0.0  ;;  %v3985_v20 = vsel %vm10542_vm15, %v9271_v2, 0.0  ;;  %vm10543_vm5 = vnez %v10355_v62 }
 0x5b3   : > { %v3986_v6 = vsel %vm10543_vm5, %v3890_v3, 0.0  ;;  %v3879_v8 = vadd.f32 %v3871_v32, %v3843_v53  ;;  %v3880_v11 = vadd.f32 %v9131_v21, %v3844_v41  ;;  %v3922_v18 = vadd.f32 %v3914_v60, %v3878_v43 }
 0x5b4   : > { %v3942_v45 = vmul.f32 %v8935_v50, %v3930_v52  ;;  %v3943_v38 = vmul.f32 %v8935_v50, %v3931_v55  ;;  %v4053_v7 = vmul.f32 %v8924_v33, %v4041_v51  ;;  %v3909_v16 = vmul.f32 %v8932_v17, %v3897_v44 }
 0x5b5   : > { %v3988_v27 = vsel %vm8651_vm7, %v3896_v12, 0.0  ;;  %v3923_v40 = vadd.f32 %v3915_v37, %v3879_v8  ;;  %v3924_v5 = vadd.f32 %v3916_v34, %v3880_v11  ;;  %v4016_v43 = vsel %vm8787_vm13, %v9197_v57, 0.0 }
 0x5b6   : > { %v3950_v14 = vadd.f32 %v3942_v45, %v3922_v18  ;;  %v4000_v62 = vmul.f32 %v8942_v63, %v3988_v27  ;;  %v3917_v32 = vadd.f32 %v3909_v16, %v3873_v56  ;;  %v4027_v21 = vmul.f32 %v8945_v39, %v4015_v15 }
 0x5b7   : > { %vm10544_vm1 = vnez %v10401_v54  ;;  %v3951_v51 = vadd.f32 %v3943_v38, %v3923_v40  ;;  %v3952_v44 = vadd.f32 %v3944_v22, %v3924_v5  ;;  %v4028_v36 = vmul.f32 %v8945_v39, %v4016_v43  ;;  %v10556_v38 = vld [vmem:[#allocation17_spill] sm:$0xff] }
 0x5b8   : > { %v4071_v50 = vsel %vm10544_vm1, %v3896_v12, 0.0  ;;  %v3978_v17 = vadd.f32 %v3970_v28, %v3950_v14  ;;  %v3997_v34 = vmul.f32 %v8942_v63, %v3985_v20  ;;  %v3998_v56 = vmul.f32 %v8942_v63, %v3986_v6  ;;  %v10547_v28 = vld [vmem:[#allocation18_spill] sm:$0xff] }
 0x5b9   : > { %v4083_v53 = vmul.f32 %v9096_v23, %v4071_v50  ;;  %vm10545_vm7 = vnez %v10372_v46  ;;  %v3979_v57 = vadd.f32 %v9134_v49, %v3951_v51  ;;  %v3980_v15 = vadd.f32 %v3972_v61, %v3952_v44  ;;  %v10549_v46 = vld [vmem:[#allocation63_spill] sm:$0xff] }
 0x5ba   : > { %v4013_v24 = vsel %vm10545_vm7, %v3819_v19, 0.0  ;;  %vm10546_vm13 = vnez %v10379_v29  ;;  %v4005_v22 = vadd.f32 %v3997_v34, %v9225_v1  ;;  %v4006_v12 = vadd.f32 %v3998_v56, %v3978_v17  ;;  %v10560_v50 = vld [vmem:[#allocation43_spill] sm:$0xff] }
 0x5bb   : > { %v4014_v54 = vsel %vm10546_vm13, %v3818_v10, 0.0  ;;  %v4025_v14 = vmul.f32 %v8945_v39, %v4013_v24  ;;  %vm10548_vm2 = vnez %v10547_v28  ;;  %v4007_v60 = vadd.f32 %v3999_v4, %v3979_v57  ;;  %v10552_v4 = vld [vmem:[#allocation71_spill] sm:$0xff]  ;;  %v10562_v24 = vld [vmem:[#allocation66_spill] sm:$0xff]  ;;  %v10567_v28 = vld [vmem:[#allocation53_spill] sm:$0xff] }
 0x5bc   : > { %v4026_v5 = vmul.f32 %v8945_v39, %v4014_v54  ;;  %v4069_v41 = vsel %vm10548_vm2, %v3890_v3, 0.0  ;;  %v4008_v37 = vadd.f32 %v4000_v62, %v3980_v15  ;;  %vm10550_vm4 = vnez %v10549_v46  ;;  %v10563_v15 = vld [vmem:[#allocation34_spill] sm:$0xff] }
 0x5bd   : > { %v4070_v49 = vsel %vm10550_vm4, %v9210_v31, 0.0  ;;  %v4081_v61 = vmul.f32 %v9096_v23, %v4069_v41  ;;  %v4033_v29 = vadd.f32 %v4025_v14, %v4005_v22  ;;  %v10551_v1 = vsel %vm10500_vm12, %v9160_v30, 0.0  ;;  %v10554_v31 = vld [vmem:[#allocation32_spill] sm:$0xff] }
 0x5be   : > { %v4034_v10 = vadd.f32 %v4026_v5, %v4006_v12  ;;  %v4082_v19 = vmul.f32 %v9096_v23, %v4070_v49  ;;  %v3996_v52 = vmul.f32 %v8942_v63, %v10551_v1  ;;  %v4035_v55 = vadd.f32 %v4027_v21, %v4007_v60  ;;  %v10559_v21 = vld [vmem:[#allocation31_spill] sm:$0xff]  ;;  %v10566_v22 = vld [vmem:[#allocation40_spill] sm:$0xff] }
 0x5bf   : > { %v4036_v3 = vadd.f32 %v4028_v36, %v4008_v37  ;;  %vm10553_vm10 = vnez %v10552_v4  ;;  %vm10555_vm11 = vnez %v10554_v31  ;;  %v4061_v8 = vadd.f32 %v4053_v7, %v4033_v29  ;;  %v10569_v37 = vld [vmem:[#allocation39_spill] sm:$0xff]  ;;  %v10572_v29 = vld [vmem:[#allocation50_spill] sm:$0xff]  ;;  %v10575_v4 = vld [vmem:[#allocation8_spill] sm:$0xff] }
 0x5c0   : > { %v4012_v20 = vsel %vm10553_vm10, %v9154_v47, 0.0  ;;  %v4067_v6 = vsel %vm10555_vm11, %v9160_v30, 0.0  ;;  %v4062_v11 = vadd.f32 %v9146_v35, %v4034_v10  ;;  %v4004_v18 = vadd.f32 %v3996_v52, %v9119_v0 }
 0x5c1   : > { %v4024_v26 = vmul.f32 %v8945_v39, %v4012_v20  ;;  %v4063_v45 = vadd.f32 %v9236_v9, %v4035_v55  ;;  %v4064_v63 = vadd.f32 %v9028_v25, %v4036_v3  ;;  %vm10557_vm12 = vnez %v10556_v38  ;;  %v5335_v25 = vld [vmem:[%s9798_s5 + $0x4] ss:$0 sm:$0xff]  ;;  %v10577_v20 = vld [vmem:[#allocation28_spill] sm:$0xff] }
 0x5c2   : > { %v4068_v16 = vsel %vm10557_vm12, %v9271_v2, 0.0  ;;  %v4079_v47 = vmul.f32 %v9096_v23, %v4067_v6  ;;  %v10558_v30 = vsel %vm10493_vm3, %v9128_v13, 0.0  ;;  %v4089_v7 = vadd.f32 %v4081_v61, %v4061_v8  ;;  %v10571_v61 = vld [vmem:[#allocation7_spill] sm:$0xff]  ;;  %v10574_v55 = vld [vmem:[#allocation30_spill] sm:$0xff] }
 0x5c3   : > { %v4052_v35 = vmul.f32 %v8924_v33, %v10558_v30  ;;  %v4090_v0 = vadd.f32 %v4082_v19, %v4062_v11  ;;  %v4032_v27 = vadd.f32 %v4024_v26, %v4004_v18  ;;  %v4091_v40 = vadd.f32 %v4083_v53, %v4063_v45  ;;  %v10561_v53 = vld [vmem:[#allocation60_spill] sm:$0xff] }
 0x5c4   : > { %v4092_v9 = vadd.f32 %v9102_v48, %v4064_v63  ;;  %v4087_v2 = vadd.f32 %v4079_v47, %v9121_v58  ;;  %v3945_v62 = vadd.f32 %v9229_v42, %v3917_v32  ;;  %v4080_v13 = vmul.f32 %v9096_v23, %v4068_v16  ;;  %v10564_v58 = vld [vmem:[#allocation52_spill] sm:$0xff] }
 0x5c5   : > { %v4103_v43 = vadd.f32 %v5335_v25, %v4090_v0  ;;  %v4060_v59 = vadd.f32 %v4052_v35, %v4032_v27  ;;  %v3946_v51 = vadd.f32 %v10560_v50, %v10559_v21  ;;  %v4104_v17 = vadd.f32 %v5335_v25, %v4091_v40  ;;  %v10579_v63 = vld [vmem:[#allocation44_spill] sm:$0xff]  ;;  %v6557_v50 = vld [vmem:[%s9799_s6] sm:$0xff]  }
 0x5c6   : > { %v4105_v44 = vadd.f32 %v5335_v25, %v4092_v9  ;;  %v4102_v36 = vadd.f32 %v5335_v25, %v4089_v7  ;;  %v3973_v48 = vadd.f32 %v10561_v53, %v3945_v62  ;;  %v4100_v56 = vadd.f32 %v5335_v25, %v4087_v2  ;;  %v6569_v53 = vld [vmem:[%s9796_s3 + $0xe0] sm:$0xff]  }
 0x5c7   : > { %v4088_v34 = vadd.f32 %v4080_v13, %v4060_v59  ;;  %v3974_v57 = vadd.f32 %v10562_v24, %v3946_v51  ;;  %vm10565_vm3 = vnez %v10564_v58  ;;  %v4112_v32 = vmax.f32 %v4104_v17, 0.0  ;;  %v6565_v51 = vld [vmem:[%s9796_s3 + $0x80] sm:$0xff]   ;;  %v6566_v17 = vld [vmem:[%s9796_s3 + $0xf8] sm:$0xff]  }
 0x5c8   : > { %v4065_v42 = vsel %vm10565_vm3, %v10563_v15, 0.0  ;;  %v4113_v54 = vmax.f32 %v4105_v44, 0.0  ;;  %v4111_v14 = vmax.f32 %v4103_v43, 0.0  ;;  %v4001_v12 = vadd.f32 %v10566_v22, %v3973_v48  ;;  %v6567_v44 = vld [vmem:[%s9796_s3 + $0xf0] sm:$0xff]   ;;  %v6570_v48 = vld [vmem:[%s9796_s3 + $0xd8] sm:$0xff]  }
 0x5c9   : > { %v4101_v5 = vadd.f32 %v5335_v25, %v4088_v34  ;;  %v4002_v41 = vadd.f32 %v10567_v28, %v3974_v57  ;;  %v10570_v46 = vsel %vm10482_vm6, %v10569_v37, 0.0  ;;  %vm10573_vm9 = vnez %v10572_v29  ;;  %v6571_v34 = vld [vmem:[%s9796_s3 + $0xd0] sm:$0xff]   ;;  %v6574_v37 = vld [vmem:[%s9796_s3 + $0x138] sm:$0xff]  }
 0x5ca   : > { %v4022_v49 = vmul.f32 %v8945_v39, %v10570_v46  ;;  %v4066_v10 = vsel %vm10573_vm9, %v10571_v61, 0.0  ;;  %v4120_v19 = vmin.f32 %v4112_v32, 6.0  ;;  %v4121_v1 = vmin.f32 %v4113_v54, 6.0  ;;  %v6573_v32 = vld [vmem:[%s9796_s3 + $0xc0] sm:$0xff]   ;;  %v6575_v46 = vld [vmem:[%s9796_s3 + $0x130] sm:$0xff]   ;;  %v6578_v29 = vld [vmem:[%s9796_s3 + $0x118] sm:$0xff]  }
 0x5cb   : > { %v4110_v52 = vmax.f32 %v4102_v36, 0.0  ;;  %v4029_v3 = vadd.f32 %v10574_v55, %v4001_v12  ;;  %vm10576_vm0 = vnez %v10575_v4  ;;  %v4108_v8 = vmax.f32 %v4100_v56, 0.0  ;;  %v6568_v36 = vld [vmem:[%s9796_s3 + $0xe8] sm:$0xff]   ;;  %v6577_v61 = vld [vmem:[%s9796_s3 + $0x120] sm:$0xff]   ;;  %v6583_v55 = vld [vmem:[%s9796_s3 + $0x170] sm:$0xff]  }
 0x5cc   : > { %v10578_v31 = vsel %vm10576_vm0, %v10577_v20, 0.0  ;;  %v4030_v11 = vadd.f32 %v4022_v49, %v4002_v41  ;;  %v4077_v18 = vmul.f32 %v9096_v23, %v4065_v42  ;;  %v4127_v39 = vpack.c.bf16 %v4121_v1, %v4120_v19  ;;  %v6572_v42 = vld [vmem:[%s9796_s3 + $0xc8] sm:$0xff]   ;;  %v6581_v1 = vld [vmem:[%s9796_s3 + $0x100] sm:$0xff]   ;;  %v6586_v20 = vld [vmem:[%s9796_s3 + $0x158] sm:$0xff]  }
 0x5cd   : > { %v4050_v6 = vmul.f32 %v8924_v33, %v10578_v31  ;;  %v4119_v26 = vmin.f32 %v4111_v14, 6.0  ;;  %v4109_v45 = vmax.f32 %v4101_v5, 0.0  ;;  %v4057_v38 = vadd.f32 %v10579_v63, %v4029_v3  ;;  %v5354_v14 = vld [vmem:[%s9798_s5 + $0x5] ss:$0 sm:$0xff]  ;;  %v6576_v49 = vld [vmem:[%s9796_s3 + $0x128] sm:$0xff]  }
 0x5ce   : > { %v4078_v47 = vmul.f32 %v9096_v23, %v4066_v10  ;;  %6244 = vmatpush3.bf16.msra.mxu0 %v4127_v39  ;;  %v4118_v30 = vmin.f32 %v4110_v52, 6.0  ;;  %v10580_v7 = vmov 0.0   ;;  %v4116_v33 = vmin.f32 %v4108_v8, 6.0  ;;  %v6579_v10 = vld [vmem:[%s9796_s3 + $0x110] sm:$0xff]   ;;  %v6580_v19 = vld [vmem:[%s9796_s3 + $0x108] sm:$0xff]   ;;  %v6582_v52 = vld [vmem:[%s9796_s3 + $0x178] sm:$0xff]  }
 0x5cf   : > { %v4058_v16 = vadd.f32 %v4050_v6, %v4030_v11  ;;  %v4085_v35 = vadd.f32 %v4077_v18, %v4057_v38  ;;  %6245 = vmatprep.subr.bf16.mxu0 %v10580_v7  ;;  %v4117_v40 = vmin.f32 %v4109_v45, 6.0  ;;  %vm4133_vm6 = vcmask 523264   ;;  %v6584_v3 = vld [vmem:[%s9796_s3 + $0x168] sm:$0xff]   ;;  %v6585_v4 = vld [vmem:[%s9796_s3 + $0x160] sm:$0xff]  }
 0x5d0   : > { %v4126_v27 = vpack.c.bf16 %v4119_v26, %v4118_v30  ;;  %vm10581_vm8 = vmmov 0   ;;  %v5379_v31 = vld [vmem:[%s9798_s5 + $0x6] ss:$0 sm:$0xff]  ;;  %v10583_v11 = vld [vmem:[#allocation3_spill] sm:$0xff] }
 0x5d1   : > { %v4086_v0 = vadd.f32 %v4078_v47, %v4058_v16  ;;  %v4098_v9 = vadd.f32 %v5335_v25, %v4085_v35  ;;  %v4125_v59 = vpack.c.bf16 %v4117_v40, %v4116_v33  ;;  %v10582_v6 = vld [vmem:[#allocation2_spill] sm:$0xff]  ;;  %v4410_v18 = vshra.s32 %v10583_v11, 2 }
 0x5d2   : > { %6246 = vmatpush3.bf16.msra.mxu0 %v4126_v27  ;;  %v4409_v8 = vshra.s32 %v10582_v6, 2  ;;  %v9507_v26 = vld [vmem:[%s9797_s4 + $0x20] sm:$0xff]  ;;  %v4411_v45 = vand.u32 3, %v10582_v6  ;;  %v4412_v16 = vand.u32 3, %v10583_v11  ;;  %vm4423_vm11 = vcmp.lt.s32.totalorder %v10582_v6, 5 }
 0x5d3   : > { %v4099_v2 = vadd.f32 %v5335_v25, %v4086_v0  ;;  %v4106_v62 = vmax.f32 %v4098_v9, 0.0  ;;  %6247 = vmatprep.subr.bf16.mxu0 %v10580_v7  ;;  %v6564_v25 = vld [vmem:[%s9796_s3 + $0x88] sm:$0xff]   ;;  %v4414_v30 = vadd.s32 4294967295, %v4410_v18  ;;  %v10584_v0 = vld [vmem:[#allocation5_spill] sm:$0xff]  ;;  %vm4507_vm5 = vcmp.ge.s32.totalorder %v4410_v18, 0 }
 0x5d4   : > { %6268 = vmatpush3.bf16.msra.mxu1 %v6564_v25  ;;  %v4413_v63 = vadd.s32 4294967295, %v4409_v8  ;;  %vm4506_vm14 = vcmp.ge.s32.totalorder %v4409_v8, 0  ;;  %vm4508_vm15 = vcmp.lt.s32.totalorder %v4409_v8, 4  ;;  %v9513_v27 = vrot.slane %v9507_v26, %v10584_v0 }
 0x5d5   : > { %v4107_v43 = vmax.f32 %v4099_v2, 0.0  ;;  %v4114_v13 = vmin.f32 %v4106_v62, 6.0  ;;  %6269 = vmatprep.subr.bf16.mxu1 %v10580_v7  ;;  %vm4509_vm1 = vcmp.lt.s32.totalorder %v4410_v18, 4  ;;  %v9515_v40 = vadd.s32 4294967295, %v4411_v45  ;;  %vm9529_vm10 = vmand %vm4506_vm14, %vm4508_vm15 }
 0x5d6   : > { %6248 = vmatpush3.bf16.msra.mxu0 %v4125_v59  ;;  %vm4415_vm7 = vcmp.ge.s32.totalorder %v4413_v63, 0  ;;  %vm4417_vm13 = vcmp.lt.s32.totalorder %v4413_v63, 4  ;;  %v9517_v2 = vadd.s32 4294967295, %v4412_v16  ;;  %v9519_v62 = vadd.s32 1, %v4411_v45  ;;  %vm9558_vm15 = vmand %vm4507_vm5, %vm4509_vm1 }
 0x5d7   : > { %v4115_v21 = vmin.f32 %v4107_v43, 6.0  ;;  %6249 = vmatprep.subr.bf16.mxu0 %v10580_v7  ;;  %vm4416_vm2 = vcmp.ge.s32.totalorder %v4414_v30, 0  ;;  %vm4418_vm4 = vcmp.lt.s32.totalorder %v4414_v30, 4  ;;  %v9521_v59 = vadd.s32 1, %v4412_v16  ;;  %vm9537_vm12 = vmand %vm4415_vm7, %vm4417_vm13  ;;  %v5391_v30 = vld [vmem:[%s9798_s5 + $0x7] ss:$0 sm:$0xff] }
 0x5d8   : > { %6270 = vmatpush3.bf16.msra.mxu1 %v6565_v51  ;;  %v4575_v51 = vadd.s32 1, %v4410_v18  ;;  %vm4428_vm3 = vcmp.ge.s32.totalorder %v9515_v40, 0  ;;  %vm4452_vm9 = vcmp.lt.s32.totalorder %v10582_v6, 4  ;;  %vm9545_vm0 = vmand %vm4416_vm2, %vm4418_vm4  ;;  %vm4488_vm14 = vcmp.lt.s32.totalorder %v9519_v62, 4 }
 0x5d9   : > { %v4124_v23 = vpack.c.bf16 %v4115_v21, %v4114_v13  ;;  %6295 = vmatprep.subr.bf16.mxu1 %v10580_v7  ;;  %v9523_v13 = vadd.s32 1, %v4409_v8  ;;  %vm10003_vm7 = vcmp.lt.s32.totalorder %v9521_v59, 4  ;;  %vm9571_vm2 = vmand %vm9537_vm12, %vm4428_vm3  ;;  %vm10603_vm5 = vcmp.lt.s32.totalorder %v10582_v6, 1 }
 0x5da   : > { %vm9596_vm1 = vmand %vm9545_vm0, %vm10003_vm7 }
 0x5db   : > { %6250 = vmatpush3.bf16.msra.mxu0 %v4124_v23  ;;  %vm10604_vm4 = vmmov %vm10603_vm5 }
 0x5dc   : > { %6275 = vmatprep.subr.bf16.mxu0 %v10580_v7  ;;  %vm9613_vm7 = vmand %vm9529_vm10, %vm4428_vm3 }
 0x5de   : > { %6252 = vmatmul.mubr.msk.bf16.vlgmr.msra.gmra.mxu0 %vm4133_vm6, %v6557_v50  ;;  %v10587_v50 = vld [vmem:[#allocation9_spill] sm:$0xff]  ;;  %vm4429_vm6 = vcmp.ge.s32.totalorder %v9517_v2, 0 }
 0x5df   : > { %6291 = vmatprep.mubr.msk.bf16.mxu0 %vm10581_vm8, %v10580_v7  ;;  %6276 = vmatpush3.bf16.msra.mxu0 %v6566_v17  ;;  %v4445_v25 = vrot.slane %v9507_v26, %v10587_v50  ;;  %vm9584_vm13 = vmand %vm9545_vm0, %vm4429_vm6 }
 0x5e0   : > { %6277 = vmatprep.subr.bf16.mxu0 %v10580_v7 }
 0x5e3   : > { %6278 = vmatpush3.bf16.msra.mxu0 %v6567_v44 }
 0x5e4   : > { %6279 = vmatprep.subr.bf16.mxu0 %v10580_v7 }
 0x5e7   : > { %6280 = vmatpush3.bf16.msra.mxu0 %v6568_v36  ;;  %v10590_v36 = vld [vmem:[#allocation4_spill] sm:$0xff] }
 0x5e8   : > { %6281 = vmatprep.subr.bf16.mxu0 %v10580_v7 }
 0x5eb   : > { %6282 = vmatpush3.bf16.msra.mxu0 %v6569_v53  ;;  %v4472_v53 = vrot.slane %v9507_v26, %v10590_v36  ;;  %v6588_v36 = vld [vmem:[%s9796_s3 + $0x148] sm:$0xff]  }
 0x5ec   : > { %6283 = vmatprep.subr.bf16.mxu0 %v10580_v7 }
 0x5ef   : > { %6284 = vmatpush3.bf16.msra.mxu0 %v6570_v48 }
 0x5f0   : > { %6285 = vmatprep.subr.bf16.mxu0 %v10580_v7 }
 0x5f3   : > { %6286 = vmatpush3.bf16.msra.mxu0 %v6571_v34  ;;  %v10593_v34 = vld [vmem:[#allocation12_spill] sm:$0xff] }
 0x5f4   : > { %6287 = vmatprep.subr.bf16.mxu0 %v10580_v7 }
 0x5f7   : > { %6288 = vmatpush3.bf16.msra.mxu0 %v6572_v42 }
 0x5f8   : > { %6289 = vmatprep.subr.bf16.mxu0 %v10580_v7 }
 0x5fb   : > { %6290 = vmatpush3.bf16.msra.mxu0 %v6573_v32 }
 0x5fc   : > { %6315 = vmatprep.subr.bf16.mxu0 %v10580_v7 }
 0x69e   : > { %v4171_v56 = vpop.f32.mrf.mxu0 }
 0x6a0   : > { %v6253_v24 = vpop.f32.mrf.mxu0 }
 0x6a2   : > { %v4174_v57 = vpop.f32.mrf.mxu0 }
 0x6a3   : > { %v4178_v15 = vpack.c.bf16 %v4174_v57, %v4171_v56  ;;  %v4501_v56 = vrot.slane %v9507_v26, %v10593_v34 }
 0x6a4   : > { %v6254_v58 = vpop.f32.mrf.mxu0 }
 0x6a5   : > { %6272 = vmatmul.mubr.bf16.vlgmr.msra.gmra.mxu1 %v4178_v15  ;;  %v10596_v15 = vld [vmem:[#allocation13_spill] sm:$0xff] }
 0x6a6   : > { %6311 = vmatprep.mubr.msk.bf16.mxu1 %vm10581_vm8, %v10580_v7  ;;  %6296 = vmatpush3.bf16.msra.mxu1 %v6574_v37  ;;  %v4529_v58 = vrot.slane %v9507_v26, %v10596_v15 }
 0x6a7   : > { %6297 = vmatprep.subr.bf16.mxu1 %v10580_v7 }
 0x6aa   : > { %6298 = vmatpush3.bf16.msra.mxu1 %v6575_v46 }
 0x6ab   : > { %6299 = vmatprep.subr.bf16.mxu1 %v10580_v7 }
 0x6ae   : > { %6300 = vmatpush3.bf16.msra.mxu1 %v6576_v49 }
 0x6af   : > { %6301 = vmatprep.subr.bf16.mxu1 %v10580_v7 }
 0x6b2   : > { %6302 = vmatpush3.bf16.msra.mxu1 %v6577_v61  ;;  %v10632_v61 = vld [vmem:[#allocation6_spill] sm:$0xff] }
 0x6b3   : > { %6303 = vmatprep.subr.bf16.mxu1 %v10580_v7 }
 0x6b6   : > { %6304 = vmatpush3.bf16.msra.mxu1 %v6578_v29 }
 0x6b7   : > { %6305 = vmatprep.subr.bf16.mxu1 %v10580_v7 }
 0x6ba   : > { %6306 = vmatpush3.bf16.msra.mxu1 %v6579_v10 }
 0x6bb   : > { %6307 = vmatprep.subr.bf16.mxu1 %v10580_v7 }
 0x6be   : > { %6308 = vmatpush3.bf16.msra.mxu1 %v6580_v19 }
 0x6bf   : > { %6309 = vmatprep.subr.bf16.mxu1 %v10580_v7 }
 0x6c2   : > { %6310 = vmatpush3.bf16.msra.mxu1 %v6581_v1 }
 0x765   : > { %v4283_v54 = vpop.f32.mrf.mxu1 }
 0x766   : > { %v9440_v5 = vadd.f32 %v5354_v14, %v4283_v54 }
 0x767   : > { %v6273_v22 = vpop.f32.mrf.mxu1 }
 0x769   : > { %v4286_v12 = vpop.f32.mrf.mxu1 }
 0x76a   : > { %v9442_v28 = vadd.f32 %v5354_v14, %v4286_v12 }
 0x76b   : > { %v6274_v41 = vpop.f32.mrf.mxu1 }
 0x76c   : > { %v4290_v60 = vpack.c.bf16 %v9442_v28, %v9440_v5 }
 0x76e   : > { %6292 = vmatmul.mubr.bf16.vlgmr.msra.gmra.mxu0 %v4290_v60 }
 0x76f   : > { %6331 = vmatprep.mubr.msk.bf16.mxu0 %vm10581_vm8, %v10580_v7  ;;  %6316 = vmatpush3.bf16.msra.mxu0 %v6582_v52  ;;  %vm4479_vm8 = vcmp.lt.s32.totalorder %v10582_v6, 3 }
 0x770   : > { %6317 = vmatprep.subr.bf16.mxu0 %v10580_v7 }
 0x773   : > { %6318 = vmatpush3.bf16.msra.mxu0 %v6583_v55 }
 0x774   : > { %6319 = vmatprep.subr.bf16.mxu0 %v10580_v7 }
 0x777   : > { %6320 = vmatpush3.bf16.msra.mxu0 %v6584_v3 }
 0x778   : > { %6321 = vmatprep.subr.bf16.mxu0 %v10580_v7 }
 0x77b   : > { %6322 = vmatpush3.bf16.msra.mxu0 %v6585_v4 }
 0x77c   : > { %6323 = vmatprep.subr.bf16.mxu0 %v10580_v7 }
 0x77f   : > { %6324 = vmatpush3.bf16.msra.mxu0 %v6586_v20 }
 0x780   : > { %6325 = vmatprep.subr.bf16.mxu0 %v10580_v7 }
 0x82e   : > { %v4395_v39 = vpop.f32.mrf.mxu0 }
 0x82f   : > { %v4396_v38 = vadd.f32 %v5379_v31, %v4395_v39 }
 0x830   : > { %v6293_v47 = vpop.f32.mrf.mxu0 }
 0x831   : > { %v4402_v35 = vmax.f32 %v4396_v38, 0.0 }
 0x832   : > { %v4398_v33 = vpop.f32.mrf.mxu0 }
 0x833   : > { %v4399_v9 = vadd.f32 %v5379_v31, %v4398_v33  ;;  %v9525_v21 = vmin.f32 %v4402_v35, 6.0 }
 0x834   : > { %v6294_v43 = vpop.f32.mrf.mxu0 }
 0x835   : > { %v4403_v17 = vmax.f32 %v4399_v9, 0.0  ;;  %v4421_v42 = vrot.slane %v9525_v21, 3  ;;  %v4512_v54 = vrot.slane %v9525_v21, 7  ;;  %v4450_v60 = vrot.slane %v9525_v21, 4 }
 0x836   : > { %v4477_v37 = vrot.slane %v9525_v21, 5  ;;  %v4552_v46 = vrot.slane %v9525_v21, 1  ;;  %v4542_v57 = vsel %vm9529_vm10, %v9525_v21, 0.0 }
 0x837   : > { %v9554_v24 = vmin.f32 %v4403_v17, 6.0  ;;  %v4548_v41 = vmul.f32 %v9513_v27, %v4542_v57 }
 0x839   : > { %v4422_v14 = vrot.slane %v9554_v24, 3  ;;  %v4451_v22 = vrot.slane %v9554_v24, 4  ;;  %v4513_v12 = vrot.slane %v9554_v24, 7  ;;  %v4478_v49 = vrot.slane %v9554_v24, 5 }
 0x83a   : > { %v4553_v19 = vrot.slane %v9554_v24, 1 }
 0x83b   : > { %v4514_v29 = vsel %vm10603_vm5, %v4512_v54, %v4513_v12  ;;  %v4515_v10 = vsel %vm10604_vm4, %v4513_v12, %v4512_v54  ;;  %v9607_v1 = vsel %vm4423_vm11, %v4421_v42, %v4422_v14  ;;  %v4425_v55 = vsel %vm4423_vm11, %v4422_v14, %v4421_v42  ;;  %vm9632_vm5 = vmand %vm9558_vm15, %vm4429_vm6  ;;  %v10631_v12 = vld [vmem:[#allocation20_spill] sm:$0xff] }
 0x83c   : > { %v4441_v3 = vsel %vm9584_vm13, %v9607_v1, 0.0  ;;  %v9624_v4 = vsel %vm4452_vm9, %v4450_v60, %v4451_v22  ;;  %v4454_v20 = vsel %vm4452_vm9, %v4451_v22, %v4450_v60  ;;  %v4440_v8 = vsel %vm9571_vm2, %v4425_v55, 0.0  ;;  %vm9647_vm11 = vmand %vm9537_vm12, %vm4488_vm14 }
 0x83d   : > { %v4447_v11 = vmul.f32 %v4445_v25, %v4441_v3  ;;  %v4467_v18 = vsel %vm9537_vm12, %v4454_v20, 0.0  ;;  %v4468_v39 = vsel %vm9545_vm0, %v9624_v4, 0.0  ;;  %v4446_v63 = vmul.f32 %v4445_v25, %v4440_v8  ;;  %v5390_v3 = vld [vmem:[%s9797_s4 + $0x28] ss:$0 sm:$0xff] }
 0x83e   : > { %v4473_v38 = vmul.f32 %v4472_v53, %v4467_v18  ;;  %v4474_v16 = vmul.f32 %v4472_v53, %v4468_v39  ;;  %v4480_v47 = vsel %vm4479_vm8, %v4477_v37, %v4478_v49  ;;  %vm10611_vm9 = vcmp.lt.s32.totalorder %v9521_v59, 4 }
 0x83f   : > { %vm9657_vm13 = vmand %vm9558_vm15, %vm10611_vm9  ;;  %v4481_v35 = vsel %vm4479_vm8, %v4478_v49, %v4477_v37  ;;  %v4497_v0 = vsel %vm9596_vm1, %v4480_v47, 0.0  ;;  %v4524_v33 = vsel %vm9613_vm7, %v4515_v10, 0.0  ;;  %v4525_v9 = vsel %vm9632_vm5, %v4514_v29, 0.0 }
 0x840   : > { %vm10614_vm12 = vcmp.lt.s32.totalorder %v4575_v51, 4  ;;  %vm10615_vm0 = vcmp.ge.s32.totalorder %v4575_v51, 0  ;;  %v4475_v50 = vadd.f32 %v4473_v38, %v4446_v63  ;;  %v4476_v25 = vadd.f32 %v4474_v16, %v4447_v11  ;;  %vm9694_vm5 = vmand %vm9529_vm10, %vm4488_vm14 }
 0x841   : > { %vm9671_vm2 = vmand %vm10615_vm0, %vm10614_vm12  ;;  %v4496_v17 = vsel %vm9647_vm11, %v4481_v35, 0.0  ;;  %v4503_v44 = vmul.f32 %v4501_v56, %v4497_v0  ;;  %vm10618_vm8 = vcmp.lt.s32.totalorder %v9523_v13, 4  ;;  %vm10619_vm1 = vcmp.ge.s32.totalorder %v9523_v13, 0  ;;  %v10625_v13 = vld [vmem:[#allocation16_spill] sm:$0xff] }
 0x842   : > { %vm9681_vm7 = vmand %vm10619_vm1, %vm10618_vm8  ;;  %v4543_v51 = vsel %vm9558_vm15, %v9554_v24, 0.0  ;;  %v4502_v53 = vmul.f32 %v4501_v56, %v4496_v17  ;;  %vm10622_vm4 = vcmp.lt.s32.totalorder %v10582_v6, 7  ;;  %v4569_v15 = vrot.slane %v9507_v26, %v10625_v13 }
 0x843   : > { %v4554_v48 = vsel %vm10622_vm4, %v4552_v46, %v4553_v19  ;;  %v4505_v24 = vadd.f32 %v4503_v44, %v4476_v25  ;;  %v4531_v56 = vmul.f32 %v4529_v58, %v4525_v9  ;;  %vm10626_vm15 = vmmov %vm10622_vm4  ;;  %v4530_v14 = vmul.f32 %v4529_v58, %v4524_v33 }
 0x844   : > { %v4555_v42 = vsel %vm10626_vm15, %v4553_v19, %v4552_v46  ;;  %vm9709_vm11 = vmand %vm9671_vm2, %vm4429_vm6  ;;  %v4504_v54 = vadd.f32 %v4502_v53, %v4475_v50  ;;  %v4549_v2 = vmul.f32 %v9513_v27, %v4543_v51  ;;  %v4564_v23 = vsel %vm9694_vm5, %v4554_v48, 0.0  ;;  %v6589_v51 = vld [vmem:[%s9796_s3 + $0x140] sm:$0xff]   ;;  %v5408_v53 = vld [vmem:[%s9798_s5 + $0x8] ss:$0 sm:$0xff] }
 0x845   : > { %v4565_v22 = vsel %vm9657_vm13, %v4555_v42, 0.0  ;;  %vm9719_vm10 = vmand %vm9681_vm7, %vm4428_vm3  ;;  %v4533_v21 = vadd.f32 %v4531_v56, %v4505_v24  ;;  %v4595_v58 = vrot.slane %v9507_v26, %v10631_v12  ;;  %v4591_v40 = vsel %vm9709_vm11, %v4425_v55, 0.0 }
 0x846   : > { %v4532_v60 = vadd.f32 %v4530_v14, %v4504_v54  ;;  %v4571_v46 = vmul.f32 %v4569_v15, %v4565_v22  ;;  %v4590_v49 = vsel %vm9719_vm10, %v9607_v1, 0.0  ;;  %v4613_v29 = vrot.slane %v9507_v26, %v10632_v61  ;;  %vm10633_vm3 = vmmov %vm10611_vm9 }
 0x847   : > { %v4551_v37 = vadd.f32 %v4549_v2, %v4533_v21  ;;  %vm9740_vm6 = vmand %vm9671_vm2, %vm10633_vm3  ;;  %v4570_v19 = vmul.f32 %v4569_v15, %v4564_v23  ;;  %v4609_v52 = vsel %vm9671_vm2, %v4454_v20, 0.0  ;;  %v4597_v59 = vmul.f32 %v4595_v58, %v4591_v40 }
 0x848   : > { %v4550_v27 = vadd.f32 %v4548_v41, %v4532_v60  ;;  %vm9750_vm9 = vmand %vm9681_vm7, %vm4488_vm14  ;;  %v4608_v55 = vsel %vm9681_vm7, %v9624_v4, 0.0  ;;  %v4596_v20 = vmul.f32 %v4595_v58, %v4590_v49  ;;  %v4627_v62 = vsel %vm9740_vm6, %v4481_v35, 0.0 }
 0x849   : > { %v4573_v26 = vadd.f32 %v4571_v46, %v4551_v37  ;;  %v4615_v11 = vmul.f32 %v4613_v29, %v4609_v52  ;;  %v4626_v18 = vsel %vm9750_vm9, %v4480_v47, 0.0  ;;  %v4614_v45 = vmul.f32 %v4613_v29, %v4608_v55  ;;  %v6587_v47 = vld [vmem:[%s9796_s3 + $0x150] sm:$0xff]  }
 0x84a   : > { %v4572_v31 = vadd.f32 %v4570_v19, %v4550_v27  ;;  %v4633_v38 = vmul.f32 %v5390_v3, %v4627_v62  ;;  %v4632_v4 = vmul.f32 %v5390_v3, %v4626_v18  ;;  %6326 = vmatpush3.bf16.msra.mxu0 %v6587_v47 }
 0x84b   : > { %v4599_v8 = vadd.f32 %v4597_v59, %v4573_v26  ;;  %6327 = vmatprep.subr.bf16.mxu0 %v10580_v7 }
 0x84c   : > { %v4598_v39 = vadd.f32 %v4596_v20, %v4572_v31 }
 0x84d   : > { %v4617_v63 = vadd.f32 %v4615_v11, %v4599_v8 }
 0x84e   : > { %v4616_v16 = vadd.f32 %v4614_v45, %v4598_v39  ;;  %6328 = vmatpush3.bf16.msra.mxu0 %v6588_v36 }
 0x84f   : > { %v4635_v0 = vadd.f32 %v4633_v38, %v4617_v63  ;;  %6329 = vmatprep.subr.bf16.mxu0 %v10580_v7  ;;  %v5433_v7 = vld [vmem:[%s9798_s5 + $0x9] ss:$0 sm:$0xff] }
 0x850   : > { %v4634_v33 = vadd.f32 %v4632_v4, %v4616_v16 }
 0x851   : > { %v4642_v9 = vadd.f32 %v5391_v30, %v4635_v0 }
 0x852   : > { %v4641_v43 = vadd.f32 %v5391_v30, %v4634_v33  ;;  %6330 = vmatpush3.bf16.msra.mxu0 %v6589_v51 }
 0x853   : > { %v4644_v35 = vmax.f32 %v4642_v9, 0.0 }
 0x854   : > { %v4643_v50 = vmax.f32 %v4641_v43, 0.0 }
 0x855   : > { %v4646_v25 = vmin.f32 %v4644_v35, 6.0 }
 0x856   : > { %v4645_v17 = vmin.f32 %v4643_v50, 6.0 }
 0x858   : > { %v4647_v44 = vpack.c.bf16 %v4646_v25, %v4645_v17 }
 0x85a   : > { %6312 = vmatmul.mubr.bf16.vlgmr.msra.gmra.mxu1 %v4647_v44 }
 0x91a   : > { %v4752_v48 = vpop.f32.mrf.mxu1 }
 0x91b   : > { %v4753_v13 = vadd.f32 %v5408_v53, %v4752_v48 }
 0x91c   : > { %v6313_v34 = vpop.f32.mrf.mxu1 }
 0x91d   : > { %v4759_v56 = vadd.f32 %v4753_v13, %v9440_v5 }
 0x91e   : > { %v4755_v15 = vpop.f32.mrf.mxu1 }
 0x91f   : > { %v4756_v57 = vadd.f32 %v5408_v53, %v4755_v15 }
 0x920   : > { %v6314_v24 = vpop.f32.mrf.mxu1 }
 0x921   : > { %v4760_v42 = vadd.f32 %v4756_v57, %v9442_v28 }
 0x923   : > { %v4761_v32 = vpack.c.bf16 %v4760_v42, %v4759_v56 }
 0x925   : > { %6332 = vmatmul.mubr.bf16.vlgmr.msra.gmra.mxu0 %v4761_v32 }
 0x9e5   : > { %v4866_v54 = vpop.f32.mrf.mxu0 }
 0x9e6   : > { %v4867_v14 = vadd.f32 %v5433_v7, %v4866_v54 }
 0x9e7   : > { %v6333_v22 = vpop.f32.mrf.mxu0 }
 0x9e8   : > { %v4873_v6 = vmax.f32 %v4867_v14, 0.0 }
 0x9e9   : > { %v4869_v2 = vpop.f32.mrf.mxu0 }
 0x9ea   : > { %v4875_v21 = vmin.f32 %v4873_v6, 6.0  ;;  %v4870_v5 = vadd.f32 %v5433_v7, %v4869_v2 }
 0x9eb   : > { %v6334_v23 = vpop.f32.mrf.mxu0 }
 0x9ec   : > { %4877 = vst [vmem:[%s278_s13] sm:$0xff] %v4875_v21  ;;  %v4874_v28 = vmax.f32 %v4870_v5, 0.0 }
 0x9ee   : > { %v4876_v12 = vmin.f32 %v4874_v28, 6.0 }
 0x9f0   : > { %4878 = vst [vmem:[%s278_s13 + $0x8] sm:$0xff] %v4876_v12 }
 0x9f1 PF: > { %s17_s24 = sadd.s32 1, %s6612_s24  }
 0x9f2   : > { %p14_p4 = scmp.ge.s32.totalorder %s17_s24, 4  }
 0x9f4   :  { %16 = sbr.rel (!%p14_p4) target bundleno = 1 (0x1), region = 101 }

</bundles_post_ra>
